<compile_context>
chip_gen: v5e
topology: v5e:2x2
jax: 0.10.0
libtpu: 0.0.40
codegen_flags: <defaults>
</compile_context>

<pallas_src>
import functools

import jax
import jax.numpy as jnp
from jax import lax
from jax.experimental import pallas as pl
from jax.experimental.pallas import tpu as pltpu


def _round_up(x, m):
    return ((x + m - 1) // m) * m


def _pick_tile_h(H, W_p, rows_cap=2048):
    """H-strip size: a divisor of H that is a multiple of 8 (or H itself),
    with (TH*W_p) rows capped so the in-kernel (rows, 9*Cout) f32 intermediate
    stays VMEM/vreg friendly.  Prefers the largest fitting strip (TH == H
    avoids the halo gather entirely)."""
    cands = [d for d in range(8, H + 1, 8) if H % d == 0]
    if H not in cands:
        cands.append(H)                # whole-image strip is always legal
    fitting = [d for d in cands if d * W_p <= rows_cap]
    if fitting:
        return max(fitting)
    # TODO(synk): very large W also wants a W-tiling level inside the kernel;
    # fall back to the smallest legal H strip for now.
    return min(cands)


def _conv3x3_ps_kernel(x_ref, w_ref, b_ref, o_ref, *, TH, W, W_p, Cout):
    # x_ref: (1, 1, (TH+3)*W_p, Cin)  bf16  row-flattened zero-padded strip
    # w_ref: (Cin, 9*Cout)            bf16  packed taps, lane = tap*Cout + co
    # b_ref: (1, Cout)                f32
    # o_ref: (1, TH, W*Cout)          f32   lane-dense conv output strip
    r_out = TH * W_p

    x = x_ref[0, 0]                                      # ((TH+3)*W_p, Cin)

    # Single packed MXU matmul (bf16 in, f32 accumulate): partial products of
    # every tap for every padded pixel.
    p = jnp.dot(x, w_ref[...], preferred_element_type=jnp.float32)

    # Combine the 9 taps with shifted static slices on the output side
    # (row shift = ky*W_p + kx, lane block = that tap's Cout slice).
    acc = jnp.broadcast_to(b_ref[...], (r_out, Cout))
    for ky in range(3):
        for kx in range(3):
            tap = ky * 3 + kx
            off = ky * W_p + kx
            acc = acc + p[off:off + r_out, tap * Cout:(tap + 1) * Cout]

    # Drop the padded W columns and store lane-dense as (TH, W*Cout).
    out = acc.reshape(TH, W_p, Cout)[:, :W, :].reshape(TH, W * Cout)
    o_ref[0] = out.astype(o_ref.dtype)


@functools.partial(jax.jit, static_argnames=("out_channels", "upscale_factor"))
def upscaler_forward(x_nchw, weight_hwio, bias, *, out_channels, upscale_factor):
    N, Cin, H, W = x_nchw.shape
    r = upscale_factor
    Cout = out_channels * r * r
    assert weight_hwio.shape == (3, 3, Cin, Cout)

    W_p = _round_up(W + 2, 8)          # padded width (multiple of 8 sublanes)
    TH = _pick_tile_h(H, W_p)
    T = H // TH
    R_in = (TH + 3) * W_p

    # NCHW -> NHWC, zero-pad (top 1 / bottom 2, left 1 / right up to W_p),
    # cast to bf16.  XLA fuses this into ~one HBM pass.
    x_nhwc = jnp.transpose(x_nchw, (0, 2, 3, 1))
    x_prep = jnp.pad(
        x_nhwc, ((0, 0), (1, 2), (1, W_p - W - 1), (0, 0))
    ).astype(jnp.bfloat16)

    # Overlapping H strips (TH + 3 rows: 2-row conv halo + 1 spare zero row so
    # every shifted slice in the kernel stays in bounds).  With T == 1 (small
    # images) no gather / halo duplication happens at all.
    if T == 1:
        x_strips = x_prep[:, None]
    else:
        row_idx = (jnp.arange(T) * TH)[:, None] + jnp.arange(TH + 3)[None, :]
        x_strips = x_prep[:, row_idx]
    x_strips = x_strips.reshape(N, T, R_in, Cin)

    # Packed RHS: [ci, (ky*3 + kx)*Cout + co] = weight_hwio[ky, kx, ci, co].
    w_packed = jnp.transpose(weight_hwio, (2, 0, 1, 3)).reshape(Cin, 9 * Cout)
    w_packed = w_packed.astype(jnp.bfloat16)
    bias2d = bias.reshape(1, Cout).astype(jnp.float32)

    kernel = functools.partial(
        _conv3x3_ps_kernel, TH=TH, W=W, W_p=W_p, Cout=Cout)

    cost = pl.CostEstimate(
        flops=2 * N * H * W * Cin * Cout * 9,
        transcendentals=0,
        bytes_accessed=(x_strips.size * 2 + w_packed.size * 2
                        + bias2d.size * 4 + N * H * W * Cout * 4),
    )

    y_flat = pl.pallas_call(
        kernel,
        out_shape=jax.ShapeDtypeStruct((N, H, W * Cout), jnp.float32),
        grid_spec=pltpu.PrefetchScalarGridSpec(
            num_scalar_prefetch=0,
            grid=(N, T),
            in_specs=[
                pl.BlockSpec((1, 1, R_in, Cin), lambda n, t: (n, t, 0, 0)),
                pl.BlockSpec((Cin, 9 * Cout), lambda n, t: (0, 0)),
                pl.BlockSpec((1, Cout), lambda n, t: (0, 0)),
            ],
            out_specs=pl.BlockSpec((1, TH, W * Cout), lambda n, t: (n, t, 0)),
        ),
        compiler_params=pltpu.CompilerParams(
            dimension_semantics=("parallel", "parallel")),
        cost_estimate=cost,
    )(x_strips, w_packed, bias2d)

    # (N, H, W*Cout) -> (N, H, W, C, r, r) is a free reshape; PixelShuffle is
    # then a single transpose pass (PyTorch channel order c*r^2 + i*r + j).
    y = y_flat.reshape(N, H, W, out_channels, r, r)
    y = jnp.transpose(y, (0, 3, 1, 4, 2, 5))
    return y.reshape(N, out_channels, H * r, W * r)


class UpscalerPallas:
    """JAX/Pallas equivalent of the PyTorch Upscaler module (forward only)."""

    def __init__(self, upscale_factor, in_channels=32, out_channels=3,
                 key=jax.random.PRNGKey(0), dtype=jnp.float32):
        self.r = int(upscale_factor)
        self.in_channels = in_channels
        self.out_channels = out_channels
        cout = out_channels * self.r ** 2
        kw, kb = jax.random.split(key)
        # PyTorch Conv2d default-style init (uniform +/- 1/sqrt(fan_in)).
        fan_in = in_channels * 3 * 3
        bound = 1.0 / float(fan_in) ** 0.5
        w_oihw = jax.random.uniform(kw, (cout, in_channels, 3, 3),
                                    minval=-bound, maxval=bound, dtype=dtype)
        self.weight_hwio = jnp.transpose(w_oihw, (2, 3, 1, 0))  # (3,3,Cin,Cout)
        self.bias = jax.random.uniform(kb, (cout,), minval=-bound,
                                       maxval=bound, dtype=dtype)

    def __call__(self, x_nchw):
        return upscaler_forward(x_nchw, self.weight_hwio, self.bias,
                                out_channels=self.out_channels,
                                upscale_factor=self.r)


def _reference(x_nchw, weight_hwio, bias, out_channels, r):
    """Pure-JAX reference: lax conv with the same bf16 inputs + pixel shuffle."""
    x = jnp.transpose(x_nchw, (0, 2, 3, 1)).astype(jnp.bfloat16)
    w = weight_hwio.astype(jnp.bfloat16)
    y = lax.conv_general_dilated(
        x, w, window_strides=(1, 1), padding="SAME",
        dimension_numbers=("NHWC", "HWIO", "NHWC"),
        preferred_element_type=jnp.float32)
    y = y + bias[None, None, None, :].astype(jnp.float32)
    N, H, W, _ = y.shape
    y = y.reshape(N, H, W, out_channels, r, r)
    y = jnp.transpose(y, (0, 3, 1, 4, 2, 5))
    return y.reshape(N, out_channels, H * r, W * r)


if __name__ == "__main__":
    key = jax.random.PRNGKey(0)
    k_in, k_params = jax.random.split(key)

    # Shapes implied by the module: NCHW input, in_channels=32 (module default).
    N, Cin, H, W = 2, 32, 16, 16
    upscale_factor, out_channels = 2, 3
    x = jax.random.normal(k_in, (N, Cin, H, W), dtype=jnp.float32)

    model = UpscalerPallas(upscale_factor, in_channels=Cin,
                           out_channels=out_channels, key=k_params)

    out = jax.block_until_ready(model(x))

    expected_shape = (N, out_channels, H * upscale_factor, W * upscale_factor)
    assert out.shape == expected_shape, (out.shape, expected_shape)

    ref = jax.block_until_ready(
        _reference(x, model.weight_hwio, model.bias, out_channels,
                   upscale_factor))
    assert jnp.allclose(out, ref, atol=1e-2, rtol=1e-2), \
        float(jnp.max(jnp.abs(out - ref)))

    print("KERNEL_OK")
</pallas_src>

<mosaic_0001>
module attributes {stable_mosaic.version = 11 : i64} {
  func.func @_conv3x3_ps_kernel(%arg0: i32, %arg1: i32, %arg2: memref<1x1x456x32xbf16, #tpu.memory_space<vmem>>, %arg3: memref<32x108xbf16, #tpu.memory_space<vmem>>, %arg4: memref<1x12xf32, #tpu.memory_space<vmem>>, %arg5: memref<1x16x192xf32, #tpu.memory_space<vmem>>) attributes {dimension_semantics = [#tpu.dimension_semantics<parallel>, #tpu.dimension_semantics<parallel>], iteration_bounds = array<i64: 2, 1>, scalar_prefetch = 0 : i64, scratch_operands = 0 : i64, tpu.core_type = #tpu.core_type<tc>, window_params = [{transform_indices = @transform_0, window_bounds = array<i64: 1, 1, 456, 32>}, {pipeline_mode = #tpu.pipeline_mode<synchronous>, transform_indices = @transform_1, window_bounds = array<i64: 32, 108>}, {pipeline_mode = #tpu.pipeline_mode<synchronous>, transform_indices = @transform_2, window_bounds = array<i64: 1, 12>}, {transform_indices = @transform_3, window_bounds = array<i64: 1, 16, 192>}]} {
    %c0 = arith.constant 0 : index
    %c0_0 = arith.constant 0 : index
    %c0_1 = arith.constant 0 : index
    %c0_2 = arith.constant 0 : index
    %0 = vector.load %arg2[%c0, %c0_0, %c0_1, %c0_2] : memref<1x1x456x32xbf16, #tpu.memory_space<vmem>>, vector<1x1x456x32xbf16>
    %1 = vector.shape_cast %0 : vector<1x1x456x32xbf16> to vector<456x32xbf16>
    %c0_3 = arith.constant 0 : index
    %c0_4 = arith.constant 0 : index
    %2 = vector.load %arg3[%c0_3, %c0_4] : memref<32x108xbf16, #tpu.memory_space<vmem>>, vector<32x108xbf16>
    %cst = arith.constant dense<0.000000e+00> : vector<456x108xf32>
    %3 = tpu.matmul %1, %2, %cst {dimension_numbers = #tpu.dot_dimension_numbers<[1], [0], [0], [1], [0, 0, 1, 1], [], []>} : vector<456x32xbf16>, vector<32x108xbf16>, vector<456x108xf32> -> vector<456x108xf32>
    %c0_5 = arith.constant 0 : index
    %c0_6 = arith.constant 0 : index
    %4 = vector.load %arg4[%c0_5, %c0_6] : memref<1x12xf32, #tpu.memory_space<vmem>>, vector<1x12xf32>
    %5 = vector.shape_cast %4 : vector<1x12xf32> to vector<1x12xf32>
    %6 = vector.broadcast %5 : vector<1x12xf32> to vector<384x12xf32>
    %7 = vector.extract_strided_slice %3 {offsets = [0, 0], sizes = [384, 12], strides = [1, 1]} : vector<456x108xf32> to vector<384x12xf32>
    %8 = arith.addf %6, %7 : vector<384x12xf32>
    %9 = vector.extract_strided_slice %3 {offsets = [1, 12], sizes = [384, 12], strides = [1, 1]} : vector<456x108xf32> to vector<384x12xf32>
    %10 = arith.addf %8, %9 : vector<384x12xf32>
    %11 = vector.extract_strided_slice %3 {offsets = [2, 24], sizes = [384, 12], strides = [1, 1]} : vector<456x108xf32> to vector<384x12xf32>
    %12 = arith.addf %10, %11 : vector<384x12xf32>
    %13 = vector.extract_strided_slice %3 {offsets = [24, 36], sizes = [384, 12], strides = [1, 1]} : vector<456x108xf32> to vector<384x12xf32>
    %14 = arith.addf %12, %13 : vector<384x12xf32>
    %15 = vector.extract_strided_slice %3 {offsets = [25, 48], sizes = [384, 12], strides = [1, 1]} : vector<456x108xf32> to vector<384x12xf32>
    %16 = arith.addf %14, %15 : vector<384x12xf32>
    %17 = vector.extract_strided_slice %3 {offsets = [26, 60], sizes = [384, 12], strides = [1, 1]} : vector<456x108xf32> to vector<384x12xf32>
    %18 = arith.addf %16, %17 : vector<384x12xf32>
    %19 = vector.extract_strided_slice %3 {offsets = [48, 72], sizes = [384, 12], strides = [1, 1]} : vector<456x108xf32> to vector<384x12xf32>
    %20 = arith.addf %18, %19 : vector<384x12xf32>
    %21 = vector.extract_strided_slice %3 {offsets = [49, 84], sizes = [384, 12], strides = [1, 1]} : vector<456x108xf32> to vector<384x12xf32>
    %22 = arith.addf %20, %21 : vector<384x12xf32>
    %23 = vector.extract_strided_slice %3 {offsets = [50, 96], sizes = [384, 12], strides = [1, 1]} : vector<456x108xf32> to vector<384x12xf32>
    %24 = arith.addf %22, %23 : vector<384x12xf32>
    %25 = vector.shape_cast %24 : vector<384x12xf32> to vector<16x24x12xf32>
    %26 = vector.extract_strided_slice %25 {offsets = [0, 0, 0], sizes = [16, 16, 12], strides = [1, 1, 1]} : vector<16x24x12xf32> to vector<16x16x12xf32>
    %27 = vector.shape_cast %26 : vector<16x16x12xf32> to vector<16x192xf32>
    %c0_7 = arith.constant 0 : index
    %c0_8 = arith.constant 0 : index
    %c0_9 = arith.constant 0 : index
    %28 = vector.load %arg5[%c0_7, %c0_8, %c0_9] : memref<1x16x192xf32, #tpu.memory_space<vmem>>, vector<1x16x192xf32>
    %29 = vector.shape_cast %28 : vector<1x16x192xf32> to vector<16x192xf32>
    %30 = vector.shape_cast %27 : vector<16x192xf32> to vector<1x16x192xf32>
    tpu.vector_store %arg5[%c0_7, %c0_8, %c0_9], %30 {strides = array<i32>} : memref<1x16x192xf32, #tpu.memory_space<vmem>>, vector<1x16x192xf32>,
    return
  }
  func.func @transform_0(%arg0: i32, %arg1: i32) -> (i32, i32, i32, i32) {
    %c0_i32 = arith.constant 0 : i32
    %c0_i32_0 = arith.constant 0 : i32
    %c0_i32_1 = arith.constant 0 : i32
    return %arg0, %arg1, %c0_i32, %c0_i32_0 : i32, i32, i32, i32
  }
  func.func @transform_1(%arg0: i32, %arg1: i32) -> (i32, i32) {
    %c0_i32 = arith.constant 0 : i32
    %c0_i32_0 = arith.constant 0 : i32
    %c0_i32_1 = arith.constant 0 : i32
    return %c0_i32, %c0_i32_0 : i32, i32
  }
  func.func @transform_2(%arg0: i32, %arg1: i32) -> (i32, i32) {
    %c0_i32 = arith.constant 0 : i32
    %c0_i32_0 = arith.constant 0 : i32
    %c0_i32_1 = arith.constant 0 : i32
    return %c0_i32, %c0_i32_0 : i32, i32
  }
  func.func @transform_3(%arg0: i32, %arg1: i32) -> (i32, i32, i32) {
    %c0_i32 = arith.constant 0 : i32
    %c0_i32_0 = arith.constant 0 : i32
    return %arg0, %arg1, %c0_i32 : i32, i32, i32
  }
}

</mosaic_0001>

<bundles_post_ra>
// kernel: upscaler_forward.1
= control target key start
LH: loop header
LB: loop body
LE: loop exit
PB: predicated region body
PF: predicated region fallthrough
CT: control target
= control target key end

     0   :  { %8 = vsyncpa [#allocation3], 0  ;;  %s3067_s12 = smov 0   ;;  %s3069_s13 = smov 0   ;;  %s5115_s0 = inlined_call_operand.vmem [shape: bf16[2,1,456,32], index: 0, kind: input, shape index: {}]   ;;  %s5116_s1 = inlined_call_operand.vmem [shape: bf16[32,108], index: 1, kind: input, shape index: {}]   ;;  %s5117_s2 = inlined_call_operand.hbm [shape: f32[1,12], index: 2, kind: input, shape index: {}]   ;;  %s5118_s3 = inlined_call_operand.vmem [shape: f32[2,16,192], index: 3, kind: output, shape index: {}]  }
   0x1   :  { %s3071_s14 = smov 0  }
   0x2 LB: > { %s2703_s15 = sadd.s32 4294967295, %s3019_s14   ;;  %s26_s16 = sadd.s32 1, %s3015_s13  ;;  %s3019_s14 = sphi %s3071_s14, %s14_s14   ;;  %s3015_s13 = sphi %s3069_s13, %s5674_s13   ;;  %s3011_s12 = sphi %s3067_s12, %s5673_s12  }
   0x3   : > { %p28_p0 = scmp.ge.s32.totalorder %s26_s16, 2  ;;  %p2705_p1 = scmp.ge.s32.totalorder %s3019_s14, 1 }
   0x4   : > { %p129_p2 = scmp.lt.s32.totalorder %s3019_s14, 3  ;;  %p2910_p4 = scmp.eq.s32.totalorder %s2703_s15, 0 }
   0x5   : > { %s5676_s16 = smov (%p28_p0, %s26_s16), 0  ;;  %s144_s19 = sshll.u32 %s5117_s2, 4  ;;  %s145_s19 = int_to_ptr.hbm [resolvable:$true] %s144_s19 }
   0x6   : > { %p130_p3 = pnand %p2705_p1, %p129_p2  ;;  %s3021_s20 = smov [#allocation2]  }
   0x7   : > { %s146_s21 = sshll.u32 %s3021_s20, 4  ;;  %s147_s21 = int_to_ptr.vmem [resolvable:$true] %s146_s21 }
   0x8   : > { %p2906_p5 = pneg %p130_p3  ;;  %171 = sbr.rel (%p130_p3) target bundleno = 1139 (0x473), region = 32 }
   0xa   : > { %p2907_p6 = pnand %p2910_p4, %p2906_p5 }
   0xc   : > { %2909 = dma.hbm_to_vmem [thread:$0]  (!%p2907_p6), %s145_s19, 16, %s147_s21, [#allocation3]  }
   0xd   : > { %3006 = dma.done.wait (%p2910_p4), [#allocation3], 16  }
   0xe   : > { %3008 = vsyncadd (%p2910_p4), [#allocation3], 4294967280  ;;  %p205_p7 = scmp.lt.s32.totalorder %s3011_s12, 1  ;;  %v2894_v0 = vld [vmem:[%s5116_s1 + $0x8] sm:$0xff]  ;;  %v2893_v1 = vld [vmem:[%s5116_s1] sm:$0xff]  ;;  %vm442_vm0 = vcmask 261120  }
   0xf   : > { %536 = vmatpush.bf16.msra.mxu0 %v2894_v0  ;;  %2895 = vmatpush.bf16.msra.mxu1 %v2894_v0  ;;  %s3022_s30 = smov 92   ;;  %vm973_vm1 = vcmask 1045504   ;;  %s3023_s4 = smov 104   ;;  %vm764_vm2 = vcmask 1046528   ;;  %vm1977_vm3 = vcmask 1047556   ;;  %vm2545_vm4 = vcmask 97280  }
  0x10   : > { %s5678_s12 = smov (!%p205_p7, %s3011_s12), 1  ;;  %2896 = vmatpush.bf16.msra.mxu2 %v2894_v0  ;;  %2897 = vmatpush.bf16.msra.mxu3 %v2894_v0  ;;  %s3024_s5 = smov 116   ;;  %vm2548_vm5 = vcmask 195584   ;;  %vm2551_vm6 = vcmask 293888   ;;  %vm2554_vm7 = vcmask 392192   ;;  %vm2557_vm8 = vcmask 490496  }
  0x11   : > { %s2901_s22 = smul.u32 228, %s5678_s12  ;;  %s3025_s6 = smov 80   ;;  %vm2560_vm9 = vcmask 588800   ;;  %vm2563_vm10 = vcmask 687104   ;;  %vm2569_vm11 = vcmask 883712   ;;  %vm2566_vm12 = vcmask 785408  }
  0x12   : > { %s3026_s7 = smov 68   ;;  %s3027_s8 = smov 56   ;;  %vm2572_vm13 = vcmask 982016   ;;  %vm2575_vm14 = vcmask 31744   ;;  %vm2578_vm15 = vcmask 130048  }
  0x13   : > { %s3101_s29 = scalar_lea.vmem %s5115_s0, %s2901_s22  ;;  %537 = vmatpush.bf16.msra.mxu0 %v2893_v1  ;;  %2898 = vmatpush.bf16.msra.mxu1 %v2893_v1  ;;  %s3028_s9 = smov 44  }
  0x14   : > { %v2865_v2 = vld [vmem:[%s3101_s29] sm:$0xff]  ;;  %v2872_v3 = vld [vmem:[%s3101_s29 + $0x38] sm:$0xff]  ;;  %2899 = vmatpush.bf16.msra.mxu2 %v2893_v1  ;;  %2900 = vmatpush.bf16.msra.mxu3 %v2893_v1  ;;  %v2866_v6 = vld [vmem:[%s3101_s29 + $0x8] sm:$0xff]  ;;  %s3029_s10 = smov 32   ;;  %s3032_s11 = smov 24  }
  0x15   : > { %v2880_v4 = vld [vmem:[%s3101_s29 + $0x78] sm:$0xff]  ;;  %v2873_v7 = vld [vmem:[%s3101_s29 + $0x40] sm:$0xff]  ;;  %v2867_v10 = vld [vmem:[%s3101_s29 + $0x10] sm:$0xff]  ;;  %s3033_s15 = smov 12   ;;  %s3034_s17 = smov 36  }
  0x16   : > { %v2888_v5 = vld [vmem:[%s3101_s29 + $0xb8] sm:$0xff]  ;;  %2833 = vmatmul.msk.bf16.vlgmr.msra.gmra.mxu0 %vm442_vm0, %v2865_v2  ;;  %2840 = vmatmul.msk.bf16.vlgmr.msra.gmra.mxu1 %vm442_vm0, %v2872_v3  ;;  %v2881_v8 = vld [vmem:[%s3101_s29 + $0x80] sm:$0xff]  ;;  %v2874_v11 = vld [vmem:[%s3101_s29 + $0x48] sm:$0xff]  ;;  %s3035_s18 = smov 60   ;;  %s3036_s19 = smov 48  }
  0x17   : > { %2848 = vmatmul.msk.bf16.vlgmr.msra.gmra.mxu2 %vm442_vm0, %v2880_v4  ;;  %2856 = vmatmul.msk.bf16.vlgmr.msra.gmra.mxu3 %vm442_vm0, %v2888_v5  ;;  %v2889_v9 = vld [vmem:[%s3101_s29 + $0xc0] sm:$0xff]  ;;  %v2882_v12 = vld [vmem:[%s3101_s29 + $0x88] sm:$0xff]  ;;  %v2868_v14 = vld [vmem:[%s3101_s29 + $0x18] sm:$0xff]  ;;  %s3037_s20 = smov 72   ;;  %s3038_s21 = smov 96  }
  0x18   : > { %v2890_v13 = vld [vmem:[%s3101_s29 + $0xc8] sm:$0xff]  ;;  %v2875_v15 = vld [vmem:[%s3101_s29 + $0x50] sm:$0xff]  ;;  %v2869_v17 = vld [vmem:[%s3101_s29 + $0x20] sm:$0xff]  ;;  %s3039_s22 = smov 84   ;;  %s3040_s23 = smov 120  }
  0x19   : > { %v2883_v16 = vld [vmem:[%s3101_s29 + $0x90] sm:$0xff]  ;;  %v2884_v18 = vld [vmem:[%s3101_s29 + $0x98] sm:$0xff]  ;;  %v2870_v19 = vld [vmem:[%s3101_s29 + $0x28] sm:$0xff]  ;;  %s3041_s24 = smov 16   ;;  %s3042_s25 = smov 4  }
  0x1a   : > { %v2885_v20 = vld [vmem:[%s3101_s29 + $0xa0] sm:$0xff]  ;;  %v2876_v21 = vld [vmem:[%s3101_s29 + $0x58] sm:$0xff]  ;;  %v2871_v22 = vld [vmem:[%s3101_s29 + $0x30] sm:$0xff]  ;;  %s3043_s26 = smov 28   ;;  %s3044_s27 = smov 40  }
  0x1b   : > { %v2886_v23 = vld [vmem:[%s3101_s29 + $0xa8] sm:$0xff]  ;;  %v2887_v24 = vld [vmem:[%s3101_s29 + $0xb0] sm:$0xff]  ;;  %v2877_v32 = vld [vmem:[%s3101_s29 + $0x60] sm:$0xff]  ;;  %s3045_s28 = smov 108  }
  0x1c   : > { %v2878_v45 = vld [vmem:[%s3101_s29 + $0x68] sm:$0xff] }
  0x26   : > { %2834 = vmatmul.msk.bf16.gmra.mxu0 %vm442_vm0, %v2866_v6  ;;  %2841 = vmatmul.msk.bf16.gmra.mxu1 %vm442_vm0, %v2873_v7 }
  0x27   : > { %2849 = vmatmul.msk.bf16.gmra.mxu2 %vm442_vm0, %v2881_v8  ;;  %2857 = vmatmul.msk.bf16.gmra.mxu3 %vm442_vm0, %v2889_v9 }
  0x36   : > { %2835 = vmatmul.msk.bf16.gmra.mxu0 %vm442_vm0, %v2867_v10  ;;  %2842 = vmatmul.msk.bf16.gmra.mxu1 %vm442_vm0, %v2874_v11 }
  0x37   : > { %2850 = vmatmul.msk.bf16.gmra.mxu2 %vm442_vm0, %v2882_v12  ;;  %2858 = vmatmul.msk.bf16.gmra.mxu3 %vm442_vm0, %v2890_v13 }
  0x46   : > { %2836 = vmatmul.msk.bf16.gmra.mxu0 %vm442_vm0, %v2868_v14  ;;  %2843 = vmatmul.msk.bf16.gmra.mxu1 %vm442_vm0, %v2875_v15 }
  0x47   : > { %2851 = vmatmul.msk.bf16.gmra.mxu2 %vm442_vm0, %v2883_v16 }
  0x56   : > { %2837 = vmatmul.msk.bf16.gmra.mxu0 %vm442_vm0, %v2869_v17  ;;  %2844 = vmatmul.msk.bf16.gmra.mxu1 %vm442_vm0, %v2876_v21  ;;  %v2879_v21 = vld [vmem:[%s3101_s29 + $0x70] sm:$0xff] }
  0x57   : > { %2852 = vmatmul.msk.bf16.gmra.mxu2 %vm442_vm0, %v2884_v18 }
  0x66   : > { %2838 = vmatmul.msk.bf16.gmra.mxu0 %vm442_vm0, %v2870_v19  ;;  %2845 = vmatmul.msk.bf16.gmra.mxu1 %vm442_vm0, %v2877_v32 }
  0x67   : > { %2853 = vmatmul.msk.bf16.gmra.mxu2 %vm442_vm0, %v2885_v20 }
  0x76   : > { %2839 = vmatmul.msk.bf16.gmra.mxu0 %vm442_vm0, %v2871_v22  ;;  %2846 = vmatmul.msk.bf16.gmra.mxu1 %vm442_vm0, %v2878_v45 }
  0x77   : > { %2854 = vmatmul.msk.bf16.gmra.mxu2 %vm442_vm0, %v2886_v23 }
  0x86   : > { %2847 = vmatmul.msk.bf16.gmra.mxu1 %vm442_vm0, %v2879_v21 }
  0x87   : > { %2855 = vmatmul.msk.bf16.gmra.mxu2 %vm442_vm0, %v2887_v24 }
  0x93   : > { %v3149_v25 = vpop.f32.mrf.mxu0  ;;  %v3151_v26 = vpop.f32.mrf.mxu1 }
  0x94   : > { %5226 = vst [vmem:[#allocation5_spill] sm:$0xff] %v3149_v25  ;;  %v974_v27 = vrot.slane %v3149_v25, 2  ;;  %v765_v38 = vrot.slane %v3149_v25, 1 }
  0x9a   : > { %v3154_v28 = vpop.f32.mrf.mxu2  ;;  %v3156_v29 = vpop.f32.mrf.mxu3 }
  0x9b   : > { %5227 = vst [vmem:[#allocation6_spill] sm:$0xff] %v3154_v28  ;;  %1242 = vrot.lane.b32.xlu0 %v3156_v29, %s3022_s30  ;;  %v3160_v30 = vpop.f32.mrf.mxu0  ;;  %v3162_v31 = vpop.f32.mrf.mxu1  ;;  %1220 = vrot.lane.b32.xlu1 %v3154_v28, %s3022_s30  ;;  %v5120_v41 = vrot.slane %v3156_v29, 1  ;;  %v815_v46 = vrot.slane %v3154_v28, 1  ;;  %v5119_v51 = vrot.slane %v3156_v29, 2  ;;  %v1024_v52 = vrot.slane %v3154_v28, 2 }
  0x9c   : > { %5228 = vst [vmem:[#allocation7_spill] sm:$0xff] %v3156_v29  ;;  %v975_v33 = vrot.slane %v3160_v30, 2  ;;  %v766_v39 = vrot.slane %v3160_v30, 1  ;;  %v790_v61 = vrot.slane %v3162_v31, 1  ;;  %v999_v8 = vrot.slane %v3162_v31, 2 }
  0x9d   : > { %5229 = vst [vmem:[#allocation8_spill] sm:$0xff] %v3160_v30 }
  0x9e   : > { %5230 = vst [vmem:[#allocation9_spill] sm:$0xff] %v3162_v31  ;;  %v976_v34 = vsel %vm973_vm1, %v974_v27, %v975_v33  ;;  %v767_v42 = vsel %vm764_vm2, %v765_v38, %v766_v39 }
  0x9f   : > { %1054 = vrot.lane.b32.xlu2 %v976_v34, %s3023_s4 }
  0xa2   : > { %v656_v36 = vpop.f32.mrf.mxu3  ;;  %v3177_v37 = vpop.f32.mrf.mxu2 }
  0xa3   : > { %1200 = vrot.lane.b32.xlu0 %v3162_v31, %s3022_s30  ;;  %v3173_v35 = vpop.f32.mrf.mxu1  ;;  %5232 = vst [vmem:[#allocation11_spill] sm:$0xff] %v3177_v37  ;;  %v843_v40 = vrot.slane %v656_v36, 1  ;;  %v816_v43 = vrot.slane %v3177_v37, 1  ;;  %v1052_v47 = vrot.slane %v656_v36, 2  ;;  %v1025_v50 = vrot.slane %v3177_v37, 2  ;;  %v544_v55 = vpop.f32.mrf.mxu0 }
  0xa4   : > { %5231 = vst [vmem:[#allocation10_spill] sm:$0xff] %v3173_v35  ;;  %1202 = vrot.lane.b32.xlu1 %v3173_v35, %s3022_s30  ;;  %v768_v57 = vrot.slane %v544_v55, 1  ;;  %v791_v60 = vrot.slane %v3173_v35, 1  ;;  %v977_v2 = vrot.slane %v544_v55, 2  ;;  %v1000_v7 = vrot.slane %v3173_v35, 2 }
  0xa5   : > { %v3190_v44 = vsel %vm764_vm2, %v5120_v41, %v843_v40  ;;  %v3198_v48 = vsel %vm764_vm2, %v815_v46, %v816_v43  ;;  %v3208_v54 = vsel %vm973_vm1, %v5119_v51, %v1052_v47  ;;  %v3213_v56 = vsel %vm973_vm1, %v1024_v52, %v1025_v50 }
  0xa6   : > { %5233 = vst [vmem:[#allocation12_spill] sm:$0xff] %v3190_v44  ;;  %v769_v63 = vsel %vm764_vm2, %v766_v39, %v768_v57  ;;  %v3227_v0 = vsel %vm764_vm2, %v790_v61, %v791_v60  ;;  %v978_v4 = vsel %vm973_vm1, %v975_v33, %v977_v2  ;;  %v3251_v9 = vsel %vm973_vm1, %v999_v8, %v1000_v7 }
  0xa7   : > { %1222 = vrot.lane.b32.xlu2 %v3177_v37, %s3022_s30  ;;  %5234 = vst [vmem:[#allocation13_spill] sm:$0xff] %v3208_v54 }
  0xa8   : > { %5235 = vst [vmem:[#allocation14_spill] sm:$0xff] %v3213_v56 }
  0xa9   : > { %5238 = vst [vmem:[#allocation17_spill] sm:$0xff] %v3251_v9 }
  0xaa   : > { %v619_v49 = vpop.f32.mrf.mxu2  ;;  %v3229_v1 = vpop.f32.mrf.mxu3 }
  0xab   : > { %845 = vrot.lane.b32.xlu0 %v767_v42, %s3024_s5  ;;  %v1027_v53 = vrot.slane %v619_v49, 2  ;;  %v581_v59 = vpop.f32.mrf.mxu1  ;;  %v3240_v5 = vpop.f32.mrf.mxu0  ;;  %v818_v10 = vrot.slane %v619_v49, 1 }
  0xac   : > { %907 = vrot.lane.b32.xlu1 %v3190_v44, %s3024_s5  ;;  %v793_v62 = vrot.slane %v581_v59, 1  ;;  %5237 = vst [vmem:[#allocation16_spill] sm:$0xff] %v3240_v5  ;;  %v1002_v12 = vrot.slane %v581_v59, 2  ;;  %v770_v17 = vrot.slane %v3240_v5, 1  ;;  %v979_v32 = vrot.slane %v3240_v5, 2 }
  0xad   : > { %v3218_v58 = vsel %vm973_vm1, %v1025_v50, %v1027_v53  ;;  %v3262_v13 = vsel %vm764_vm2, %v816_v43, %v818_v10 }
  0xae   : > { %5236 = vst [vmem:[#allocation15_spill] sm:$0xff] %v3218_v58  ;;  %v3234_v3 = vsel %vm764_vm2, %v791_v60, %v793_v62  ;;  %v3269_v15 = vsel %vm973_vm1, %v1000_v7, %v1002_v12 }
  0xaf   : > { %885 = vrot.lane.b32.xlu2 %v3198_v48, %s3024_s5  ;;  %5241 = vst [vmem:[#allocation20_spill] sm:$0xff] %v3269_v15 }
  0xb2   : > { %v3244_v6 = vpop.f32.mrf.mxu3  ;;  %v3264_v14 = vpop.f32.mrf.mxu2 }
  0xb3   : > { %1116 = vrot.lane.b32.xlu0 %v3208_v54, %s3023_s4  ;;  %v3257_v11 = vpop.f32.mrf.mxu0  ;;  %5240 = vst [vmem:[#allocation19_spill] sm:$0xff] %v3264_v14  ;;  %v3273_v16 = vpop.f32.mrf.mxu1  ;;  %v1029_v47 = vrot.slane %v3264_v14, 2  ;;  %v820_v50 = vrot.slane %v3264_v14, 1 }
  0xb4   : > { %1094 = vrot.lane.b32.xlu1 %v3213_v56, %s3023_s4  ;;  %5239 = vst [vmem:[#allocation18_spill] sm:$0xff] %v3257_v11  ;;  %v771_v18 = vrot.slane %v3257_v11, 1  ;;  %v980_v23 = vrot.slane %v3257_v11, 2  ;;  %v1004_v34 = vrot.slane %v3273_v16, 2  ;;  %v795_v57 = vrot.slane %v3273_v16, 1 }
  0xb5   : > { %5242 = vst [vmem:[#allocation21_spill] sm:$0xff] %v3273_v16 }
  0xb6   : > { %v772_v22 = vsel %vm764_vm2, %v770_v17, %v771_v18  ;;  %v3300_v38 = vsel %vm973_vm1, %v979_v32, %v980_v23 }
  0xb7   : > { %1096 = vrot.lane.b32.xlu2 %v3218_v58, %s3023_s4 }
  0xba   : > { %v3286_v24 = vpop.f32.mrf.mxu2 }
  0xbb   : > { %847 = vrot.lane.b32.xlu0 %v769_v63, %s3024_s5  ;;  %v551_v19 = vpop.f32.mrf.mxu0  ;;  %5243 = vst [vmem:[#allocation22_spill] sm:$0xff] %v3286_v24  ;;  %v3294_v33 = vpop.f32.mrf.mxu1  ;;  %v821_v43 = vrot.slane %v3286_v24, 1  ;;  %v1030_v49 = vrot.slane %v3286_v24, 2 }
  0xbc   : > { %865 = vrot.lane.b32.xlu1 %v3227_v0, %s3024_s5  ;;  %v982_v20 = vrot.slane %v551_v19, 2  ;;  %5244 = vst [vmem:[#allocation23_spill] sm:$0xff] %v3294_v33  ;;  %v1005_v36 = vrot.slane %v3294_v33, 2  ;;  %v796_v59 = vrot.slane %v3294_v33, 1  ;;  %v773_v60 = vrot.slane %v551_v19, 1 }
  0xbd   : > { %v3325_v52 = vsel %vm973_vm1, %v1029_v47, %v1030_v49  ;;  %v3330_v53 = vsel %vm764_vm2, %v820_v50, %v821_v43 }
  0xbe   : > { %v3289_v27 = vsel %vm973_vm1, %v980_v23, %v982_v20  ;;  %v3305_v39 = vsel %vm973_vm1, %v1004_v34, %v1005_v36  ;;  %5247 = vst [vmem:[#allocation26_spill] sm:$0xff] %v3325_v52  ;;  %v774_v7 = vsel %vm764_vm2, %v771_v18, %v773_v60 }
  0xbf   : > { %867 = vrot.lane.b32.xlu2 %v3234_v3, %s3024_s5  ;;  %5245 = vst [vmem:[#allocation24_spill] sm:$0xff] %v3305_v39 }
  0xc2   : > { %v626_v40 = vpop.f32.mrf.mxu2 }
  0xc3   : > { %1056 = vrot.lane.b32.xlu0 %v978_v4, %s3023_s4  ;;  %v823_v42 = vrot.slane %v626_v40, 1  ;;  %v3317_v46 = vpop.f32.mrf.mxu0  ;;  %v3347_v4 = vsel %vm764_vm2, %v795_v57, %v796_v59  ;;  %v589_v8 = vpop.f32.mrf.mxu1  ;;  %v1032_v18 = vrot.slane %v626_v40, 2 }
  0xc4   : > { %1244 = vrot.lane.b32.xlu1 %v3229_v1, %s3022_s30  ;;  %5246 = vst [vmem:[#allocation25_spill] sm:$0xff] %v3317_v46  ;;  %v775_v62 = vrot.slane %v3317_v46, 1  ;;  %v1007_v19 = vrot.slane %v589_v8, 2  ;;  %v984_v40 = vrot.slane %v3317_v46, 2 }
  0xc5   : > { %v3315_v45 = vsel %vm764_vm2, %v821_v43, %v823_v42  ;;  %v798_v42 = vrot.slane %v589_v8, 1 }
  0xc6   : > { %v3370_v21 = vsel %vm973_vm1, %v1005_v36, %v1007_v19 }
  0xc7   : > { %1246 = vrot.lane.b32.xlu2 %v3244_v6, %s3022_s30  ;;  %5255 = vst [vmem:[#allocation34_spill] sm:$0xff] %v3370_v21  ;;  %v3401_v60 = vsel %vm764_vm2, %v796_v59, %v798_v42 }
  0xca   : > { %v3334_v55 = vpop.f32.mrf.mxu2 }
  0xcb   : > { %1074 = vrot.lane.b32.xlu0 %v3251_v9, %s3023_s4  ;;  %5248 = vst [vmem:[#allocation27_spill] sm:$0xff] %v3334_v55  ;;  %v3338_v61 = vpop.f32.mrf.mxu0  ;;  %v3362_v17 = vpop.f32.mrf.mxu1  ;;  %v1034_v50 = vrot.slane %v3334_v55, 2  ;;  %v825_v51 = vrot.slane %v3334_v55, 1 }
  0xcc   : > { %1184 = vrot.lane.b32.xlu1 %v3240_v5, %s3022_s30  ;;  %5249 = vst [vmem:[#allocation28_spill] sm:$0xff] %v3338_v61  ;;  %v776_v63 = vrot.slane %v3338_v61, 1  ;;  %v985_v36 = vrot.slane %v3338_v61, 2 }
  0xcd   : > { %5253 = vst [vmem:[#allocation32_spill] sm:$0xff] %v3362_v17 }
  0xce   : > { %v3354_v10 = vsel %vm764_vm2, %v775_v62, %v776_v63 }
  0xcf   : > { %1186 = vrot.lane.b32.xlu2 %v3257_v11, %s3022_s30  ;;  %5251 = vst [vmem:[#allocation30_spill] sm:$0xff] %v3354_v10 }
  0xd2   : > { %v3389_v43 = vpop.f32.mrf.mxu2 }
  0xd3   : > { %887 = vrot.lane.b32.xlu0 %v3262_v13, %s3024_s5  ;;  %v3383_v34 = vpop.f32.mrf.mxu1  ;;  %5260 = vst [vmem:[#allocation39_spill] sm:$0xff] %v3389_v43  ;;  %v1035_v57 = vrot.slane %v3389_v43, 2  ;;  %v559_v19 = vpop.f32.mrf.mxu0  ;;  %v826_v41 = vrot.slane %v3389_v43, 1 }
  0xd4   : > { %1076 = vrot.lane.b32.xlu1 %v3269_v15, %s3023_s4  ;;  %5259 = vst [vmem:[#allocation38_spill] sm:$0xff] %v3383_v34 }
  0xd5   : > { %v3410_v8 = vsel %vm973_vm1, %v1034_v50, %v1035_v57 }
  0xd6   : > { %5265 = vst [vmem:[#allocation44_spill] sm:$0xff] %v3410_v8 }
  0xd7   : > { %1204 = vrot.lane.b32.xlu2 %v3273_v16, %s3022_s30 }
  0xdb   : > { %1224 = vrot.lane.b32.xlu0 %v3264_v14, %s3022_s30 }
  0xdc   : > { %849 = vrot.lane.b32.xlu1 %v772_v22, %s3024_s5 }
  0xdf   : > { %1060 = vrot.lane.b32.xlu2 %v3289_v27, %s3023_s4 }
  0xe3   : > { %1318 = vrot.lane.b32.xlu0 %v772_v22, %s3025_s6  ;;  %v3375_v22 = vsel %vm973_vm1, %v1030_v49, %v1032_v18  ;;  %v3394_v49 = vsel %vm973_vm1, %v984_v40, %v985_v36  ;;  %v778_v40 = vrot.slane %v559_v19, 1 }
  0xe4   : > { %1058 = vrot.lane.b32.xlu1 %v3300_v38, %s3023_s4  ;;  %5256 = vst [vmem:[#allocation35_spill] sm:$0xff] %v3375_v22 }
  0xe5   : > { %5262 = vst [vmem:[#allocation41_spill] sm:$0xff] %v3394_v49  ;;  %v3425_v50 = vsel %vm764_vm2, %v776_v63, %v778_v40 }
  0xe6   : > { %5269 = vst [vmem:[#allocation48_spill] sm:$0xff] %v3425_v50 }
  0xe7   : > { %1078 = vrot.lane.b32.xlu2 %v3305_v39, %s3023_s4 }
  0xeb   : > { %1206 = vrot.lane.b32.xlu0 %v3294_v33, %s3022_s30 }
  0xec   : > { %1226 = vrot.lane.b32.xlu1 %v3286_v24, %s3022_s30 }
  0xef   : > { %891 = vrot.lane.b32.xlu2 %v3315_v45, %s3024_s5 }
  0xf3   : > { %1098 = vrot.lane.b32.xlu0 %v3325_v52, %s3023_s4 }
  0xf4   : > { %889 = vrot.lane.b32.xlu1 %v3330_v53, %s3024_s5 }
  0xf7   : > { %1228 = vrot.lane.b32.xlu2 %v3334_v55, %s3022_s30 }
  0xf9   : > { %v3344_v2 = vpop.permute.xlu2 %1054 }
  0xfa   : > { %5250 = vst [vmem:[#allocation29_spill] sm:$0xff] %v3344_v2 }
  0xfb   : > { %869 = vrot.lane.b32.xlu0 %v3347_v4, %s3024_s5 }
  0xfc   : > { %851 = vrot.lane.b32.xlu1 %v774_v7, %s3024_s5 }
  0xff   : > { %853 = vrot.lane.b32.xlu2 %v3354_v10, %s3024_s5 }
 0x101   : > { %v3358_v12 = vpop.permute.xlu2 %1222 }
 0x102   : > { %5252 = vst [vmem:[#allocation31_spill] sm:$0xff] %v3358_v12  ;;  %v596_v12 = vpop.f32.mrf.mxu1 }
 0x103   : > { %1188 = vrot.lane.b32.xlu0 %v3317_v46, %s3022_s30  ;;  %v1012_v11 = vrot.slane %v596_v12, 2 }
 0x104   : > { %1320 = vrot.lane.b32.xlu1 %v774_v7, %s3025_s6 }
 0x107   : > { %1322 = vrot.lane.b32.xlu2 %v3354_v10, %s3025_s6 }
 0x109   : > { %v3367_v20 = vpop.permute.xlu2 %885 }
 0x10a   : > { %5254 = vst [vmem:[#allocation33_spill] sm:$0xff] %v3367_v20 }
 0x10b   : > { %1080 = vrot.lane.b32.xlu0 %v3370_v21, %s3023_s4 }
 0x10c   : > { %1100 = vrot.lane.b32.xlu1 %v3375_v22, %s3023_s4 }
 0x10d   : > { %v3379_v23 = vpop.permute.xlu0 %1242  ;;  %v3381_v32 = vpop.permute.xlu1 %1220 }
 0x10e   : > { %5257 = vst [vmem:[#allocation36_spill] sm:$0xff] %v3379_v23  ;;  %v3434_v23 = vsel %vm764_vm2, %v825_v51, %v826_v41 }
 0x10f   : > { %5258 = vst [vmem:[#allocation37_spill] sm:$0xff] %v3381_v32  ;;  %1210 = vrot.lane.b32.xlu2 %v3383_v34, %s3022_s30  ;;  %v3462_v32 = vpop.f32.mrf.mxu0 }
 0x110   : > { %5271 = vst [vmem:[#allocation50_spill] sm:$0xff] %v3434_v23 }
 0x111   : > { %v3391_v47 = vpop.permute.xlu2 %1096  ;;  %5277 = vst [vmem:[#allocation56_spill] sm:$0xff] %v3462_v32 }
 0x112   : > { %5261 = vst [vmem:[#allocation40_spill] sm:$0xff] %v3391_v47  ;;  %v801_v47 = vrot.slane %v3383_v34, 1 }
 0x113   : > { %1062 = vrot.lane.b32.xlu0 %v3394_v49, %s3023_s4 }
 0x114   : > { %871 = vrot.lane.b32.xlu1 %v3401_v60, %s3024_s5 }
 0x115   : > { %v3405_v62 = vpop.permute.xlu0 %1200 }
 0x116   : > { %5263 = vst [vmem:[#allocation42_spill] sm:$0xff] %v3405_v62  ;;  %v3407_v7 = vpop.permute.xlu1 %1202  ;;  %v800_v62 = vrot.slane %v3362_v17, 1 }
 0x117   : > { %5264 = vst [vmem:[#allocation43_spill] sm:$0xff] %v3407_v7  ;;  %1102 = vrot.lane.b32.xlu2 %v3410_v8, %s3023_s4 }
 0x119   : > { %v3414_v18 = vpop.permute.xlu2 %867 }
 0x11a   : > { %5266 = vst [vmem:[#allocation45_spill] sm:$0xff] %v3414_v18  ;;  %v1009_v18 = vrot.slane %v3362_v17, 2 }
 0x11b   : > { %1230 = vrot.lane.b32.xlu0 %v3389_v43, %s3022_s30 }
 0x11c   : > { %1190 = vrot.lane.b32.xlu1 %v3338_v61, %s3022_s30 }
 0x11d   : > { %v3420_v59 = vpop.permute.xlu0 %845 }
 0x11e   : > { %5267 = vst [vmem:[#allocation46_spill] sm:$0xff] %v3420_v59  ;;  %v3422_v42 = vpop.permute.xlu1 %907  ;;  %v803_v59 = vrot.slane %v596_v12, 1 }
 0x11f   : > { %5268 = vst [vmem:[#allocation47_spill] sm:$0xff] %v3422_v42  ;;  %855 = vrot.lane.b32.xlu2 %v3425_v50, %s3024_s5  ;;  %v3447_v42 = vsel %vm764_vm2, %v800_v62, %v801_v47 }
 0x121   : > { %v3431_v7 = vpop.permute.xlu2 %1246 }
 0x122   : > { %5270 = vst [vmem:[#allocation49_spill] sm:$0xff] %v3431_v7  ;;  %v987_v7 = vrot.slane %v559_v19, 2 }
 0x123   : > { %893 = vrot.lane.b32.xlu0 %v3434_v23, %s3024_s5 }
 0x124   : > { %1208 = vrot.lane.b32.xlu1 %v3362_v17, %s3022_s30  ;;  %v3456_v20 = vsel %vm973_vm1, %v985_v36, %v987_v7  ;;  %v1010_v36 = vrot.slane %v3383_v34, 2 }
 0x125   : > { %v3442_v63 = vpop.permute.xlu0 %1116  ;;  %5275 = vst [vmem:[#allocation54_spill] sm:$0xff] %v3456_v20 }
 0x126   : > { %5272 = vst [vmem:[#allocation51_spill] sm:$0xff] %v3442_v63  ;;  %v3444_v40 = vpop.permute.xlu1 %1094  ;;  %v634_v63 = vpop.f32.mrf.mxu2  ;;  %v3478_v2 = vsel %vm973_vm1, %v1009_v18, %v1010_v36  ;;  %v3496_v18 = vsel %vm764_vm2, %v801_v47, %v803_v59 }
 0x127   : > { %5273 = vst [vmem:[#allocation52_spill] sm:$0xff] %v3444_v40  ;;  %873 = vrot.lane.b32.xlu2 %v3447_v42, %s3024_s5  ;;  %v1037_v62 = vrot.slane %v634_v63, 2 }
 0x128   : > { %5281 = vst [vmem:[#allocation60_spill] sm:$0xff] %v3478_v2 }
 0x129   : > { %v3451_v51 = vpop.permute.xlu2 %1186  ;;  %v3473_v5 = vsel %vm973_vm1, %v1035_v57, %v1037_v62  ;;  %v3491_v57 = vpop.f32.mrf.mxu0 }
 0x12a   : > { %5274 = vst [vmem:[#allocation53_spill] sm:$0xff] %v3451_v51  ;;  %v989_v51 = vrot.slane %v3462_v32, 2  ;;  %v990_v12 = vrot.slane %v3491_v57, 2 }
 0x12b   : > { %1324 = vrot.lane.b32.xlu0 %v3425_v50, %s3025_s6  ;;  %5280 = vst [vmem:[#allocation59_spill] sm:$0xff] %v3473_v5  ;;  %v828_v50 = vrot.slane %v634_v63, 1 }
 0x12c   : > { %1064 = vrot.lane.b32.xlu1 %v3456_v20, %s3023_s4  ;;  %5285 = vst [vmem:[#allocation64_spill] sm:$0xff] %v3491_v57  ;;  %v3514_v47 = vsel %vm973_vm1, %v989_v51, %v990_v12  ;;  %v780_v51 = vrot.slane %v3462_v32, 1 }
 0x12d   : > { %v3460_v40 = vpop.permute.xlu0 %847  ;;  %5290 = vst [vmem:[#allocation69_spill] sm:$0xff] %v3514_v47 }
 0x12e   : > { %5276 = vst [vmem:[#allocation55_spill] sm:$0xff] %v3460_v40  ;;  %v3464_v19 = vpop.permute.xlu1 %865  ;;  %v3505_v63 = vpop.f32.mrf.mxu2 }
 0x12f   : > { %5278 = vst [vmem:[#allocation57_spill] sm:$0xff] %v3464_v19  ;;  %1192 = vrot.lane.b32.xlu2 %v3462_v32, %s3022_s30 }
 0x130   : > { %5287 = vst [vmem:[#allocation66_spill] sm:$0xff] %v3505_v63 }
 0x131   : > { %v3470_v7 = vpop.permute.xlu2 %1204 }
 0x132   : > { %5279 = vst [vmem:[#allocation58_spill] sm:$0xff] %v3470_v7  ;;  %v3487_v7 = vsel %vm973_vm1, %v1010_v36, %v1012_v11  ;;  %v3503_v11 = vsel %vm764_vm2, %v826_v41, %v828_v50  ;;  %v2891_v50 = vld [vmem:[%s3101_s29 + $0xd0] sm:$0xff] }
 0x133   : > { %1104 = vrot.lane.b32.xlu0 %v3473_v5, %s3023_s4  ;;  %5284 = vst [vmem:[#allocation63_spill] sm:$0xff] %v3487_v7  ;;  %2859 = vmatmul.msk.bf16.gmra.mxu3 %vm442_vm0, %v2891_v50 }
 0x134   : > { %1082 = vrot.lane.b32.xlu1 %v3478_v2, %s3023_s4 }
 0x135   : > { %v3482_v19 = vpop.permute.xlu0 %1056 }
 0x136   : > { %5282 = vst [vmem:[#allocation61_spill] sm:$0xff] %v3482_v19  ;;  %v3484_v25 = vpop.permute.xlu1 %1244 }
 0x137   : > { %5283 = vst [vmem:[#allocation62_spill] sm:$0xff] %v3484_v25  ;;  %1084 = vrot.lane.b32.xlu2 %v3487_v7, %s3023_s4 }
 0x139   : > { %v3493_v62 = vpop.permute.xlu2 %1060 }
 0x13a   : > { %5286 = vst [vmem:[#allocation65_spill] sm:$0xff] %v3493_v62 }
 0x13b   : > { %875 = vrot.lane.b32.xlu0 %v3496_v18, %s3024_s5 }
 0x13c   : > { %895 = vrot.lane.b32.xlu1 %v3503_v11, %s3024_s5 }
 0x13d   : > { %v3509_v36 = vpop.permute.xlu0 %1074 }
 0x13e   : > { %5288 = vst [vmem:[#allocation67_spill] sm:$0xff] %v3509_v36  ;;  %v3511_v25 = vpop.permute.xlu1 %1184  ;;  %v3527_v36 = vpop.f32.mrf.mxu2 }
 0x13f   : > { %5289 = vst [vmem:[#allocation68_spill] sm:$0xff] %v3511_v25  ;;  %1066 = vrot.lane.b32.xlu2 %v3514_v47, %s3023_s4  ;;  %v3536_v25 = vpop.f32.mrf.mxu1  ;;  %v831_v19 = vrot.slane %v3527_v36, 1  ;;  %v1040_v14 = vrot.slane %v3527_v36, 2 }
 0x140   : > { %5293 = vst [vmem:[#allocation72_spill] sm:$0xff] %v3527_v36 }
 0x141   : > { %v3518_v59 = vpop.permute.xlu2 %1078  ;;  %5295 = vst [vmem:[#allocation74_spill] sm:$0xff] %v3536_v25 }
 0x142   : > { %5291 = vst [vmem:[#allocation70_spill] sm:$0xff] %v3518_v59  ;;  %v781_v59 = vrot.slane %v3491_v57, 1 }
 0x143   : > { %1194 = vrot.lane.b32.xlu0 %v3491_v57, %s3022_s30 }
 0x144   : > { %1232 = vrot.lane.b32.xlu1 %v3505_v63, %s3022_s30 }
 0x145   : > { %v3524_v41 = vpop.permute.xlu0 %887 }
 0x146   : > { %5292 = vst [vmem:[#allocation71_spill] sm:$0xff] %v3524_v41  ;;  %v3529_v62 = vpop.permute.xlu1 %1076  ;;  %v830_v41 = vrot.slane %v3505_v63, 1  ;;  %v641_v37 = vpop.f32.mrf.mxu2 }
 0x147   : > { %5294 = vst [vmem:[#allocation73_spill] sm:$0xff] %v3529_v62  ;;  %1234 = vrot.lane.b32.xlu2 %v3527_v36, %s3022_s30  ;;  %v3545_v62 = vsel %vm764_vm2, %v780_v51, %v781_v59  ;;  %v3560_v24 = vpop.f32.mrf.mxu1  ;;  %v1042_v28 = vrot.slane %v641_v37, 2 }
 0x148   : > { %5297 = vst [vmem:[#allocation76_spill] sm:$0xff] %v3545_v62  ;;  %v3554_v30 = vsel %vm764_vm2, %v830_v41, %v831_v19 }
 0x149   : > { %v3538_v10 = vpop.permute.xlu2 %891  ;;  %5300 = vst [vmem:[#allocation79_spill] sm:$0xff] %v3554_v30 }
 0x14a   : > { %5296 = vst [vmem:[#allocation75_spill] sm:$0xff] %v3538_v10  ;;  %v566_v10 = vpop.f32.mrf.mxu0 }
 0x14b   : > { %1212 = vrot.lane.b32.xlu0 %v3536_v25, %s3022_s30  ;;  %v783_v55 = vrot.slane %v566_v10, 1  ;;  %5302 = vst [vmem:[#allocation81_spill] sm:$0xff] %v3560_v24 }
 0x14c   : > { %1326 = vrot.lane.b32.xlu1 %v3545_v62, %s3025_s6 }
 0x14d   : > { %v3549_v40 = vpop.permute.xlu0 %1224 }
 0x14e   : > { %5298 = vst [vmem:[#allocation77_spill] sm:$0xff] %v3549_v40  ;;  %v3551_v50 = vpop.permute.xlu1 %849  ;;  %v992_v40 = vrot.slane %v566_v10, 2 }
 0x14f   : > { %5299 = vst [vmem:[#allocation78_spill] sm:$0xff] %v3551_v50  ;;  %897 = vrot.lane.b32.xlu2 %v3554_v30, %s3024_s5  ;;  %v3571_v50 = vsel %vm764_vm2, %v781_v59, %v783_v55 }
 0x150   : > { %5305 = vst [vmem:[#allocation84_spill] sm:$0xff] %v3571_v50  ;;  %v3580_v34 = vsel %vm973_vm1, %v990_v12, %v992_v40  ;;  %v1015_v40 = vrot.slane %v3560_v24, 2  ;;  %v604_v12 = vpop.f32.mrf.mxu1 }
 0x151   : > { %v3558_v43 = vpop.permute.xlu2 %1228  ;;  %5307 = vst [vmem:[#allocation86_spill] sm:$0xff] %v3580_v34 }
 0x152   : > { %5301 = vst [vmem:[#allocation80_spill] sm:$0xff] %v3558_v43  ;;  %v1039_v43 = vrot.slane %v3505_v63, 2 }
 0x153   : > { %857 = vrot.lane.b32.xlu0 %v3545_v62, %s3024_s5 }
 0x154   : > { %1214 = vrot.lane.b32.xlu1 %v3560_v24, %s3022_s30  ;;  %v3585_v55 = vsel %vm973_vm1, %v1039_v43, %v1040_v14 }
 0x155   : > { %v3566_v51 = vpop.permute.xlu0 %1318  ;;  %5308 = vst [vmem:[#allocation87_spill] sm:$0xff] %v3585_v55 }
 0x156   : > { %5303 = vst [vmem:[#allocation82_spill] sm:$0xff] %v3566_v51  ;;  %v3568_v41 = vpop.permute.xlu1 %1058  ;;  %v808_v51 = vrot.slane %v604_v12, 1 }
 0x157   : > { %5304 = vst [vmem:[#allocation83_spill] sm:$0xff] %v3568_v41  ;;  %1328 = vrot.lane.b32.xlu2 %v3571_v50, %s3025_s6  ;;  %v3594_v41 = vsel %vm973_vm1, %v1040_v14, %v1042_v28  ;;  %v3608_v28 = vpop.f32.mrf.mxu0 }
 0x158   : > { %5311 = vst [vmem:[#allocation90_spill] sm:$0xff] %v3594_v41  ;;  %v785_v33 = vrot.slane %v3608_v28, 1 }
 0x159   : > { %v3577_v62 = vpop.permute.xlu2 %853  ;;  %5314 = vst [vmem:[#allocation93_spill] sm:$0xff] %v3608_v28 }
 0x15a   : > { %5306 = vst [vmem:[#allocation85_spill] sm:$0xff] %v3577_v62  ;;  %v1014_v62 = vrot.slane %v3536_v25, 2 }
 0x15b   : > { %1068 = vrot.lane.b32.xlu0 %v3580_v34, %s3023_s4 }
 0x15c   : > { %1106 = vrot.lane.b32.xlu1 %v3585_v55, %s3023_s4  ;;  %v3603_v36 = vsel %vm973_vm1, %v1014_v62, %v1015_v40  ;;  %v805_v62 = vrot.slane %v3536_v25, 1 }
 0x15d   : > { %v3589_v10 = vpop.permute.xlu0 %1206  ;;  %5313 = vst [vmem:[#allocation92_spill] sm:$0xff] %v3603_v36 }
 0x15e   : > { %5309 = vst [vmem:[#allocation88_spill] sm:$0xff] %v3589_v10  ;;  %v3591_v59 = vpop.permute.xlu1 %1226  ;;  %v806_v10 = vrot.slane %v3560_v24, 1 }
 0x15f   : > { %5310 = vst [vmem:[#allocation89_spill] sm:$0xff] %v3591_v59  ;;  %1108 = vrot.lane.b32.xlu2 %v3594_v41, %s3023_s4  ;;  %v833_v59 = vrot.slane %v641_v37, 1 }
 0x160   : > { %v3630_v37 = vsel %vm764_vm2, %v805_v62, %v806_v10 }
 0x161   : > { %v3600_v43 = vpop.permute.xlu2 %1322  ;;  %v3625_v17 = vsel %vm764_vm2, %v831_v19, %v833_v59  ;;  %v3644_v59 = vpop.f32.mrf.mxu2 }
 0x162   : > { %5312 = vst [vmem:[#allocation91_spill] sm:$0xff] %v3600_v43  ;;  %v3617_v43 = vsel %vm764_vm2, %v806_v10, %v808_v51  ;;  %v835_v31 = vrot.slane %v3644_v59, 1 }
 0x163   : > { %1086 = vrot.lane.b32.xlu0 %v3603_v36, %s3023_s4  ;;  %5318 = vst [vmem:[#allocation97_spill] sm:$0xff] %v3625_v17 }
 0x164   : > { %859 = vrot.lane.b32.xlu1 %v3571_v50, %s3024_s5  ;;  %5323 = vst [vmem:[#allocation102_spill] sm:$0xff] %v3644_v59 }
 0x165   : > { %v3612_v14 = vpop.permute.xlu0 %1098 }
 0x166   : > { %5315 = vst [vmem:[#allocation94_spill] sm:$0xff] %v3612_v14  ;;  %v3614_v63 = vpop.permute.xlu1 %889  ;;  %v3636_v14 = vpop.f32.mrf.mxu0 }
 0x167   : > { %5316 = vst [vmem:[#allocation95_spill] sm:$0xff] %v3614_v63  ;;  %879 = vrot.lane.b32.xlu2 %v3617_v43, %s3024_s5  ;;  %v786_v62 = vrot.slane %v3636_v14, 1  ;;  %v995_v16 = vrot.slane %v3636_v14, 2 }
 0x168   : > { %5320 = vst [vmem:[#allocation99_spill] sm:$0xff] %v3636_v14 }
 0x169   : > { %v3622_v24 = vpop.permute.xlu2 %1210 }
 0x16a   : > { %5317 = vst [vmem:[#allocation96_spill] sm:$0xff] %v3622_v24 }
 0x16b   : > { %899 = vrot.lane.b32.xlu0 %v3625_v17, %s3024_s5 }
 0x16c   : > { %877 = vrot.lane.b32.xlu1 %v3630_v37, %s3024_s5 }
 0x16d   : > { %v3634_v51 = vpop.permute.xlu0 %869 }
 0x16e   : > { %5319 = vst [vmem:[#allocation98_spill] sm:$0xff] %v3634_v51  ;;  %v3638_v63 = vpop.permute.xlu1 %851  ;;  %v3653_v51 = vpop.f32.mrf.mxu1 }
 0x16f   : > { %5321 = vst [vmem:[#allocation100_spill] sm:$0xff] %v3638_v63  ;;  %1198 = vrot.lane.b32.xlu2 %v3636_v14, %s3022_s30  ;;  %v1017_v63 = vrot.slane %v604_v12, 2 }
 0x171   : > { %v3642_v19 = vpop.permute.xlu2 %1102 }
 0x172   : > { %5322 = vst [vmem:[#allocation101_spill] sm:$0xff] %v3642_v19  ;;  %v788_v19 = vrot.slane %v3151_v26, 1 }
 0x173   : > { %1236 = vrot.lane.b32.xlu0 %v3644_v59, %s3022_s30 }
 0x174   : > { %1196 = vrot.lane.b32.xlu1 %v3608_v28, %s3022_s30  ;;  %v3663_v25 = vsel %vm764_vm2, %v786_v62, %v788_v19  ;;  %v994_v19 = vrot.slane %v3608_v28, 2 }
 0x175   : > { %v3650_v10 = vpop.permute.xlu0 %1188 }
 0x176   : > { %5324 = vst [vmem:[#allocation103_spill] sm:$0xff] %v3650_v10  ;;  %v3655_v24 = vpop.permute.xlu1 %1320  ;;  %v3669_v10 = vsel %vm973_vm1, %v1015_v40, %v1017_v63  ;;  %v3689_v63 = vsel %vm973_vm1, %v994_v19, %v995_v16  ;;  %v997_v40 = vrot.slane %v3151_v26, 2  ;;  %v1019_v26 = vrot.slane %v3653_v51, 2 }
 0x177   : > { %5325 = vst [vmem:[#allocation104_spill] sm:$0xff] %v3655_v24  ;;  %1216 = vrot.lane.b32.xlu2 %v3653_v51, %s3022_s30 }
 0x178   : > { %5327 = vst [vmem:[#allocation106_spill] sm:$0xff] %v3669_v10 }
 0x179   : > { %v3660_v50 = vpop.permute.xlu2 %855  ;;  %5332 = vst [vmem:[#allocation111_spill] sm:$0xff] %v3689_v63 }
 0x17a   : > { %5326 = vst [vmem:[#allocation105_spill] sm:$0xff] %v3660_v50  ;;  %v3678_v50 = vsel %vm764_vm2, %v785_v33, %v786_v62 }
 0x17b   : > { %863 = vrot.lane.b32.xlu0 %v3663_v25, %s3024_s5  ;;  %5330 = vst [vmem:[#allocation109_spill] sm:$0xff] %v3678_v50 }
 0x17c   : > { %1088 = vrot.lane.b32.xlu1 %v3669_v10, %s3023_s4 }
 0x17d   : > { %v3673_v12 = vpop.permute.xlu0 %1080 }
 0x17e   : > { %5328 = vst [vmem:[#allocation107_spill] sm:$0xff] %v3673_v12  ;;  %v3675_v24 = vpop.permute.xlu1 %1100  ;;  %v3701_v12 = vpop.f32.mrf.mxu2 }
 0x17f   : > { %5329 = vst [vmem:[#allocation108_spill] sm:$0xff] %v3675_v24  ;;  %861 = vrot.lane.b32.xlu2 %v3678_v50, %s3024_s5  ;;  %v3699_v24 = vsel %vm973_vm1, %v995_v16, %v997_v40  ;;  %v836_v14 = vrot.slane %v3701_v12, 1 }
 0x180   : > { %5335 = vst [vmem:[#allocation114_spill] sm:$0xff] %v3699_v24 }
 0x181   : > { %v3684_v35 = vpop.permute.xlu2 %873  ;;  %5336 = vst [vmem:[#allocation115_spill] sm:$0xff] %v3701_v12 }
 0x182   : > { %5331 = vst [vmem:[#allocation110_spill] sm:$0xff] %v3684_v35  ;;  %v3703_v35 = vpop.f32.mrf.mxu1 }
 0x183   : > { %1330 = vrot.lane.b32.xlu0 %v3678_v50, %s3025_s6  ;;  %5337 = vst [vmem:[#allocation116_spill] sm:$0xff] %v3703_v35  ;;  %v1020_v50 = vrot.slane %v3703_v35, 2 }
 0x184   : > { %1070 = vrot.lane.b32.xlu1 %v3689_v63, %s3023_s4 }
 0x185   : > { %v3694_v33 = vpop.permute.xlu0 %1062 }
 0x186   : > { %5333 = vst [vmem:[#allocation112_spill] sm:$0xff] %v3694_v33  ;;  %v3696_v62 = vpop.permute.xlu1 %871  ;;  %v3720_v33 = vsel %vm973_vm1, %v1019_v26, %v1020_v50  ;;  %v649_v28 = vpop.f32.mrf.mxu2  ;;  %v3736_v26 = vsel %vm764_vm2, %v835_v31, %v836_v14 }
 0x187   : > { %5334 = vst [vmem:[#allocation113_spill] sm:$0xff] %v3696_v62  ;;  %1072 = vrot.lane.b32.xlu2 %v3699_v24, %s3023_s4  ;;  %v1044_v62 = vrot.slane %v3644_v59, 2  ;;  %v1047_v61 = vrot.slane %v649_v28, 2 }
 0x188   : > { %5341 = vst [vmem:[#allocation120_spill] sm:$0xff] %v3720_v33 }
 0x189   : > { %v3707_v19 = vpop.permute.xlu2 %1192  ;;  %5344 = vst [vmem:[#allocation123_spill] sm:$0xff] %v3736_v26 }
 0x18a   : > { %5338 = vst [vmem:[#allocation117_spill] sm:$0xff] %v3707_v19  ;;  %v1045_v19 = vrot.slane %v3701_v12, 2  ;;  %v611_v54 = vpop.f32.mrf.mxu1 }
 0x18b   : > { %1218 = vrot.lane.b32.xlu0 %v3703_v35, %s3022_s30 }
 0x18c   : > { %1238 = vrot.lane.b32.xlu1 %v3701_v12, %s3022_s30 }
 0x18d   : > { %v3715_v16 = vpop.permute.xlu0 %1230 }
 0x18e   : > { %5339 = vst [vmem:[#allocation118_spill] sm:$0xff] %v3715_v16  ;;  %v3717_v40 = vpop.permute.xlu1 %1190  ;;  %v838_v16 = vrot.slane %v649_v28, 1  ;;  %v1022_v28 = vrot.slane %v611_v54, 2 }
 0x18f   : > { %5340 = vst [vmem:[#allocation119_spill] sm:$0xff] %v3717_v40  ;;  %1090 = vrot.lane.b32.xlu2 %v3720_v33, %s3023_s4  ;;  %v3731_v40 = vsel %vm973_vm1, %v1044_v62, %v1045_v19  ;;  %v811_v62 = vrot.slane %v3703_v35, 1  ;;  %v3774_v35 = vpop.f32.mrf.mxu2 }
 0x190   : > { %5343 = vst [vmem:[#allocation122_spill] sm:$0xff] %v3731_v40  ;;  %v3745_v12 = vsel %vm764_vm2, %v836_v14, %v838_v16  ;;  %v3759_v14 = vsel %vm973_vm1, %v1045_v19, %v1047_v61  ;;  %v840_v19 = vrot.slane %v3774_v35, 1 }
 0x191   : > { %v3728_v57 = vpop.permute.xlu2 %1084  ;;  %5347 = vst [vmem:[#allocation126_spill] sm:$0xff] %v3745_v12 }
 0x192   : > { %5342 = vst [vmem:[#allocation121_spill] sm:$0xff] %v3728_v57  ;;  %v810_v57 = vrot.slane %v3653_v51, 1 }
 0x193   : > { %1110 = vrot.lane.b32.xlu0 %v3731_v40, %s3023_s4  ;;  %5349 = vst [vmem:[#allocation128_spill] sm:$0xff] %v3759_v14 }
 0x194   : > { %901 = vrot.lane.b32.xlu1 %v3736_v26, %s3024_s5  ;;  %v3754_v46 = vsel %vm764_vm2, %v810_v57, %v811_v62  ;;  %5353 = vst [vmem:[#allocation132_spill] sm:$0xff] %v3774_v35 }
 0x195   : > { %v3740_v32 = vpop.permute.xlu0 %893 }
 0x196   : > { %5345 = vst [vmem:[#allocation124_spill] sm:$0xff] %v3740_v32  ;;  %v3742_v59 = vpop.permute.xlu1 %1208 }
 0x197   : > { %5346 = vst [vmem:[#allocation125_spill] sm:$0xff] %v3742_v59  ;;  %903 = vrot.lane.b32.xlu2 %v3745_v12, %s3024_s5  ;;  %v813_v59 = vrot.slane %v611_v54, 1 }
 0x199   : > { %v3751_v31 = vpop.permute.xlu2 %1066  ;;  %v3779_v61 = vsel %vm764_vm2, %v811_v62, %v813_v59 }
 0x19a   : > { %5348 = vst [vmem:[#allocation127_spill] sm:$0xff] %v3751_v31  ;;  %v3772_v31 = vsel %vm973_vm1, %v1020_v50, %v1022_v28  ;;  %v1049_v28 = vrot.slane %v3774_v35, 2 }
 0x19b   : > { %881 = vrot.lane.b32.xlu0 %v3754_v46, %s3024_s5  ;;  %5352 = vst [vmem:[#allocation131_spill] sm:$0xff] %v3772_v31 }
 0x19c   : > { %1112 = vrot.lane.b32.xlu1 %v3759_v14, %s3023_s4 }
 0x19d   : > { %v3763_v16 = vpop.permute.xlu0 %1324 }
 0x19e   : > { %v3765_v32 = vpop.permute.xlu1 %1064 }
 0x19f   : > { %5350 = vst [vmem:[#allocation129_spill] sm:$0xff] %v3765_v32  ;;  %1334 = vrot.lane.b32.xlu2 %v3227_v0, %s3025_s6 }
 0x1a1   : > { %v3769_v57 = vpop.permute.xlu2 %1234 }
 0x1a2   : > { %5351 = vst [vmem:[#allocation130_spill] sm:$0xff] %v3769_v57  ;;  %v5357_v57 = vrot.slane %v3156_v29, 1 }
 0x1a3   : > { %1092 = vrot.lane.b32.xlu0 %v3772_v31, %s3023_s4 }
 0x1a4   : > { %883 = vrot.lane.b32.xlu1 %v3779_v61, %s3024_s5  ;;  %v3796_v59 = vsel %vm764_vm2, %v840_v19, %v5357_v57 }
 0x1a5   : > { %v3783_v54 = vpop.permute.xlu0 %1104  ;;  %5358 = vst [vmem:[#allocation136_spill] sm:$0xff] %v3796_v59 }
 0x1a6   : > { %5354 = vst [vmem:[#allocation133_spill] sm:$0xff] %v3783_v54  ;;  %v3786_v32 = vpop.permute.xlu1 %1082 }
 0x1a7   : > { %5355 = vst [vmem:[#allocation134_spill] sm:$0xff] %v3786_v32  ;;  %1240 = vrot.lane.b32.xlu2 %v3774_v35, %s3022_s30  ;;  %v5361_v32 = vrot.slane %v3156_v29, 2  ;;  %s2864_s30 = sshll.u32 %s5678_s12, 5 }
 0x1a9   : > { %v3790_v50 = vpop.permute.xlu2 %897 }
 0x1aa   : > { %5356 = vst [vmem:[#allocation135_spill] sm:$0xff] %v3790_v50  ;;  %v3809_v50 = vsel %vm973_vm1, %v1049_v28, %v5361_v32 }
 0x1ab   : > { %905 = vrot.lane.b32.xlu0 %v3796_v59, %s3024_s5  ;;  %5362 = vst [vmem:[#allocation139_spill] sm:$0xff] %v3809_v50 }
 0x1ac   : > { %1332 = vrot.lane.b32.xlu1 %v3663_v25, %s3025_s6 }
 0x1ad   : > { %v3802_v62 = vpop.permute.xlu0 %875 }
 0x1ae   : > { %5359 = vst [vmem:[#allocation137_spill] sm:$0xff] %v3802_v62  ;;  %v3804_v54 = vpop.permute.xlu1 %895 }
 0x1af   : > { %5360 = vst [vmem:[#allocation138_spill] sm:$0xff] %v3804_v54  ;;  %1114 = vrot.lane.b32.xlu2 %v3809_v50, %s3023_s4 }
 0x1b1   : > { %v3813_v57 = vpop.permute.xlu2 %1328 }
 0x1b2   : > { %5363 = vst [vmem:[#allocation140_spill] sm:$0xff] %v3813_v57 }
 0x1b3   : > { %1336 = vrot.lane.b32.xlu0 %v3234_v3, %s3025_s6 }
 0x1b4   : > { %1338 = vrot.lane.b32.xlu1 %v3347_v4, %s3025_s6 }
 0x1b5   : > { %v3819_v19 = vpop.permute.xlu0 %1194 }
 0x1b6   : > { %5364 = vst [vmem:[#allocation141_spill] sm:$0xff] %v3819_v19  ;;  %v3821_v62 = vpop.permute.xlu1 %1232 }
 0x1b7   : > { %5365 = vst [vmem:[#allocation142_spill] sm:$0xff] %v3821_v62  ;;  %1340 = vrot.lane.b32.xlu2 %v3401_v60, %s3025_s6 }
 0x1b9   : > { %v3825_v32 = vpop.permute.xlu2 %1108 }
 0x1ba   : > { %5366 = vst [vmem:[#allocation143_spill] sm:$0xff] %v3825_v32 }
 0x1bb   : > { %1342 = vrot.lane.b32.xlu0 %v3447_v42, %s3025_s6 }
 0x1bc   : > { %1344 = vrot.lane.b32.xlu1 %v3496_v18, %s3025_s6 }
 0x1bd   : > { %v3831_v28 = vpop.permute.xlu0 %1212 }
 0x1be   : > { %5367 = vst [vmem:[#allocation144_spill] sm:$0xff] %v3831_v28  ;;  %v3833_v57 = vpop.permute.xlu1 %1326 }
 0x1bf   : > { %5368 = vst [vmem:[#allocation145_spill] sm:$0xff] %v3833_v57  ;;  %1346 = vrot.lane.b32.xlu2 %v3630_v37, %s3025_s6 }
 0x1c1   : > { %v3837_v19 = vpop.permute.xlu2 %879 }
 0x1c2   : > { %5369 = vst [vmem:[#allocation146_spill] sm:$0xff] %v3837_v19 }
 0x1c3   : > { %1348 = vrot.lane.b32.xlu0 %v3617_v43, %s3025_s6 }
 0x1c4   : > { %1350 = vrot.lane.b32.xlu1 %v3754_v46, %s3025_s6 }
 0x1c5   : > { %v3843_v32 = vpop.permute.xlu0 %857 }
 0x1c6   : > { %5370 = vst [vmem:[#allocation147_spill] sm:$0xff] %v3843_v32  ;;  %v3845_v62 = vpop.permute.xlu1 %1214 }
 0x1c7   : > { %5371 = vst [vmem:[#allocation148_spill] sm:$0xff] %v3845_v62  ;;  %1352 = vrot.lane.b32.xlu2 %v3779_v61, %s3025_s6 }
 0x1c9   : > { %v3849_v28 = vpop.permute.xlu2 %1198 }
 0x1ca   : > { %5372 = vst [vmem:[#allocation149_spill] sm:$0xff] %v3849_v28 }
 0x1cb   : > { %1354 = vrot.lane.b32.xlu0 %v3198_v48, %s3025_s6 }
 0x1cc   : > { %1356 = vrot.lane.b32.xlu1 %v3262_v13, %s3025_s6 }
 0x1cd   : > { %v3855_v57 = vpop.permute.xlu0 %1068 }
 0x1ce   : > { %5373 = vst [vmem:[#allocation150_spill] sm:$0xff] %v3855_v57  ;;  %v3857_v19 = vpop.permute.xlu1 %1106 }
 0x1cf   : > { %5374 = vst [vmem:[#allocation151_spill] sm:$0xff] %v3857_v19  ;;  %1358 = vrot.lane.b32.xlu2 %v3330_v53, %s3025_s6 }
 0x1d1   : > { %v3861_v32 = vpop.permute.xlu2 %1216 }
 0x1d3   : > { %1360 = vrot.lane.b32.xlu0 %v3315_v45, %s3025_s6 }
 0x1d4   : > { %1362 = vrot.lane.b32.xlu1 %v3434_v23, %s3025_s6 }
 0x1d5   : > { %v3867_v28 = vpop.permute.xlu0 %1086 }
 0x1d6   : > { %v3869_v62 = vpop.permute.xlu1 %859 }
 0x1d7   : > { %5375 = vst [vmem:[#allocation152_spill] sm:$0xff] %v3869_v62  ;;  %1364 = vrot.lane.b32.xlu2 %v3503_v11, %s3025_s6  ;;  %v3889_v62 = vpop.f32.mrf.mxu3 }
 0x1d9   : > { %v3873_v57 = vpop.permute.xlu2 %861 }
 0x1da   : > { %5376 = vst [vmem:[#allocation153_spill] sm:$0xff] %v3873_v57 }
 0x1db   : > { %1366 = vrot.lane.b32.xlu0 %v3554_v30, %s3025_s6 }
 0x1dc   : > { %1368 = vrot.lane.b32.xlu1 %v3625_v17, %s3025_s6  ;;  %v1313_v17 = vrot.slane %v3229_v1, 1 }
 0x1dd   : > { %v3879_v19 = vpop.permute.xlu0 %899 }
 0x1de   : > { %5377 = vst [vmem:[#allocation154_spill] sm:$0xff] %v3879_v19  ;;  %v3881_v54 = vpop.permute.xlu1 %877  ;;  %v1314_v19 = vrot.slane %v3244_v6, 1 }
 0x1df   : > { %1370 = vrot.lane.b32.xlu2 %v3736_v26, %s3025_s6  ;;  %v1316_v26 = vrot.slane %v3889_v62, 1 }
 0x1e1   : > { %v3885_v23 = vpop.permute.xlu2 %1072 }
 0x1e2   : > { %5378 = vst [vmem:[#allocation155_spill] sm:$0xff] %v3885_v23 }
 0x1e3   : > { %1372 = vrot.lane.b32.xlu0 %v3745_v12, %s3025_s6  ;;  %v3905_v12 = vsel %vm764_vm2, %v1313_v17, %v1314_v19 }
 0x1e4   : > { %1374 = vrot.lane.b32.xlu1 %v3796_v59, %s3025_s6  ;;  %5382 = vst [vmem:[#allocation159_spill] sm:$0xff] %v3905_v12 }
 0x1e5   : > { %v3893_v57 = vpop.permute.xlu0 %1236 }
 0x1e6   : > { %5379 = vst [vmem:[#allocation156_spill] sm:$0xff] %v3893_v57  ;;  %v3897_v30 = vpop.permute.xlu1 %1196  ;;  %v3910_v57 = vsel %vm764_vm2, %v1314_v19, %v1316_v26 }
 0x1e7   : > { %5380 = vst [vmem:[#allocation157_spill] sm:$0xff] %v3897_v30  ;;  %1376 = vrot.lane.b32.xlu2 %v3190_v44, %s3025_s6 }
 0x1e8   : > { %5383 = vst [vmem:[#allocation160_spill] sm:$0xff] %v3910_v57 }
 0x1e9   : > { %v3902_v23 = vpop.permute.xlu2 %1090 }
 0x1ea   : > { %5381 = vst [vmem:[#allocation158_spill] sm:$0xff] %v3902_v23 }
 0x1eb   : > { %1378 = vrot.lane.b32.xlu0 %v3905_v12, %s3025_s6  ;;  %v5441_v12 = vld [vmem:[#allocation19_spill] sm:$0xff] }
 0x1ec   : > { %1380 = vrot.lane.b32.xlu1 %v3910_v57, %s3025_s6  ;;  %s5079_s6 = scalar_lea.vmem %s5118_s3, %s2864_s30 }
 0x1ed   : > { %v3914_v30 = vpop.permute.xlu0 %863 }
 0x1ee   : > { %5384 = vst [vmem:[#allocation161_spill] sm:$0xff] %v3914_v30  ;;  %v3916_v59 = vpop.permute.xlu1 %1088 }
 0x1ef   : > { %5385 = vst [vmem:[#allocation162_spill] sm:$0xff] %v3916_v59  ;;  %1451 = vrot.lane.b32.xlu2 %v3300_v38, %s3026_s7 }
 0x1f1   : > { %v3920_v44 = vpop.permute.xlu2 %903 }
 0x1f2   : > { %5386 = vst [vmem:[#allocation163_spill] sm:$0xff] %v3920_v44  ;;  %v5420_v44 = vld [vmem:[#allocation99_spill] sm:$0xff] }
 0x1f3   : > { %1453 = vrot.lane.b32.xlu0 %v3289_v27, %s3026_s7 }
 0x1f4   : > { %1455 = vrot.lane.b32.xlu1 %v3394_v49, %s3026_s7  ;;  %v5434_v49 = vld [vmem:[#allocation81_spill] sm:$0xff] }
 0x1f5   : > { %v3926_v17 = vpop.permute.xlu0 %1330 }
 0x1f6   : > { %5387 = vst [vmem:[#allocation164_spill] sm:$0xff] %v3926_v17  ;;  %v3928_v26 = vpop.permute.xlu1 %1070 }
 0x1f7   : > { %5388 = vst [vmem:[#allocation165_spill] sm:$0xff] %v3928_v26  ;;  %1457 = vrot.lane.b32.xlu2 %v3456_v20, %s3026_s7 }
 0x1f9   : > { %v3932_v19 = vpop.permute.xlu2 %1334 }
 0x1fa   : > { %5389 = vst [vmem:[#allocation166_spill] sm:$0xff] %v3932_v19 }
 0x1fb   : > { %1459 = vrot.lane.b32.xlu0 %v3514_v47, %s3026_s7  ;;  %v5426_v47 = vld [vmem:[#allocation21_spill] sm:$0xff] }
 0x1fc   : > { %1461 = vrot.lane.b32.xlu1 %v3580_v34, %s3026_s7 }
 0x1fd   : > { %v3938_v38 = vpop.permute.xlu0 %1218 }
 0x1fe   : > { %5390 = vst [vmem:[#allocation167_spill] sm:$0xff] %v3938_v38  ;;  %v3940_v27 = vpop.permute.xlu1 %1238  ;;  %v5449_v38 = vld [vmem:[#allocation66_spill] sm:$0xff] }
 0x1ff   : > { %5391 = vst [vmem:[#allocation168_spill] sm:$0xff] %v3940_v27  ;;  %1463 = vrot.lane.b32.xlu2 %v3689_v63, %s3026_s7 }
 0x201   : > { %v3944_v17 = vpop.permute.xlu2 %1240 }
 0x202   : > { %5392 = vst [vmem:[#allocation169_spill] sm:$0xff] %v3944_v17 }
 0x203   : > { %1465 = vrot.lane.b32.xlu0 %v3699_v24, %s3026_s7 }
 0x204   : > { %1467 = vrot.lane.b32.xlu1 %v3251_v9, %s3026_s7 }
 0x205   : > { %v3950_v30 = vpop.permute.xlu0 %1110 }
 0x206   : > { %5393 = vst [vmem:[#allocation170_spill] sm:$0xff] %v3950_v30  ;;  %v3952_v19 = vpop.permute.xlu1 %901 }
 0x207   : > { %5394 = vst [vmem:[#allocation171_spill] sm:$0xff] %v3952_v19  ;;  %1469 = vrot.lane.b32.xlu2 %v3269_v15, %s3026_s7 }
 0x209   : > { %v3956_v26 = vpop.permute.xlu2 %1114 }
 0x20a   : > { %5395 = vst [vmem:[#allocation172_spill] sm:$0xff] %v3956_v26 }
 0x20b   : > { %1471 = vrot.lane.b32.xlu0 %v3305_v39, %s3026_s7 }
 0x20c   : > { %1473 = vrot.lane.b32.xlu1 %v3370_v21, %s3026_s7 }
 0x20d   : > { %v3962_v63 = vpop.permute.xlu0 %881 }
 0x20e   : > { %v3964_v24 = vpop.permute.xlu1 %1112 }
 0x20f   : > { %5396 = vst [vmem:[#allocation173_spill] sm:$0xff] %v3964_v24  ;;  %1475 = vrot.lane.b32.xlu2 %v3478_v2, %s3026_s7 }
 0x211   : > { %v3968_v9 = vpop.permute.xlu2 %1340 }
 0x213   : > { %1477 = vrot.lane.b32.xlu0 %v3487_v7, %s3026_s7 }
 0x214   : > { %1479 = vrot.lane.b32.xlu1 %v3603_v36, %s3026_s7 }
 0x215   : > { %v3974_v15 = vpop.permute.xlu0 %1092 }
 0x216   : > { %v3976_v39 = vpop.permute.xlu1 %883 }
 0x217   : > { %1481 = vrot.lane.b32.xlu2 %v3669_v10, %s3026_s7 }
 0x219   : > { %v3980_v21 = vpop.permute.xlu2 %1346 }
 0x21a   : > { %5397 = vst [vmem:[#allocation174_spill] sm:$0xff] %v3980_v21 }
 0x21b   : > { %1483 = vrot.lane.b32.xlu0 %v3720_v33, %s3026_s7 }
 0x21c   : > { %1485 = vrot.lane.b32.xlu1 %v3772_v31, %s3026_s7 }
 0x21d   : > { %v3986_v2 = vpop.permute.xlu0 %905 }
 0x21e   : > { %5398 = vst [vmem:[#allocation175_spill] sm:$0xff] %v3986_v2  ;;  %v3988_v7 = vpop.permute.xlu1 %1332  ;;  %v5421_v2 = vld [vmem:[#allocation9_spill] sm:$0xff] }
 0x21f   : > { %5399 = vst [vmem:[#allocation176_spill] sm:$0xff] %v3988_v7  ;;  %1487 = vrot.lane.b32.xlu2 %v3213_v56, %s3026_s7 }
 0x221   : > { %v3992_v36 = vpop.permute.xlu2 %1352 }
 0x222   : > { %5400 = vst [vmem:[#allocation177_spill] sm:$0xff] %v3992_v36  ;;  %v5444_v36 = vld [vmem:[#allocation22_spill] sm:$0xff] }
 0x223   : > { %1489 = vrot.lane.b32.xlu0 %v3218_v58, %s3026_s7 }
 0x224   : > { %1491 = vrot.lane.b32.xlu1 %v3325_v52, %s3026_s7  ;;  %v1449_v52 = vrot.slane %v3889_v62, 2 }
 0x225   : > { %v3998_v10 = vpop.permute.xlu0 %1336 }
 0x226   : > { %5401 = vst [vmem:[#allocation178_spill] sm:$0xff] %v3998_v10  ;;  %v4000_v33 = vpop.permute.xlu1 %1338 }
 0x227   : > { %5402 = vst [vmem:[#allocation179_spill] sm:$0xff] %v4000_v33  ;;  %1493 = vrot.lane.b32.xlu2 %v3375_v22, %s3026_s7  ;;  %v1446_v33 = vrot.slane %v3229_v1, 2 }
 0x229   : > { %v4004_v31 = vpop.permute.xlu2 %1358 }
 0x22a   : > { %5403 = vst [vmem:[#allocation180_spill] sm:$0xff] %v4004_v31  ;;  %v5438_v31 = vld [vmem:[#allocation6_spill] sm:$0xff] }
 0x22b   : > { %1495 = vrot.lane.b32.xlu0 %v3410_v8, %s3026_s7 }
 0x22c   : > { %1497 = vrot.lane.b32.xlu1 %v3473_v5, %s3026_s7 }
 0x22d   : > { %v4010_v56 = vpop.permute.xlu0 %1342 }
 0x22e   : > { %v4012_v58 = vpop.permute.xlu1 %1344 }
 0x22f   : > { %1499 = vrot.lane.b32.xlu2 %v3585_v55, %s3026_s7  ;;  %v1447_v55 = vrot.slane %v3244_v6, 2 }
 0x231   : > { %v4016_v10 = vpop.permute.xlu2 %1364  ;;  %v4049_v24 = vsel %vm973_vm1, %v1447_v55, %v1449_v52  ;;  %v5416_v52 = vld [vmem:[#allocation64_spill] sm:$0xff] }
 0x232   : > { %5404 = vst [vmem:[#allocation181_spill] sm:$0xff] %v4016_v10 }
 0x233   : > { %1501 = vrot.lane.b32.xlu0 %v3594_v41, %s3026_s7  ;;  %v5407_v41 = vld [vmem:[#allocation13_spill] sm:$0xff]  ;;  %5411 = vst [vmem:[#allocation187_spill] sm:$0xff] %v4049_v24 }
 0x234   : > { %1503 = vrot.lane.b32.xlu1 %v3731_v40, %s3026_s7 }
 0x235   : > { %v4022_v22 = vpop.permute.xlu0 %1348 }
 0x236   : > { %5405 = vst [vmem:[#allocation182_spill] sm:$0xff] %v4022_v22  ;;  %v4024_v8 = vpop.permute.xlu1 %1350  ;;  %v5467_v22 = vld [vmem:[#allocation48_spill] sm:$0xff] }
 0x237   : > { %1505 = vrot.lane.b32.xlu2 %v3759_v14, %s3026_s7  ;;  %v4042_v14 = vsel %vm973_vm1, %v1446_v33, %v1447_v55  ;;  %v5414_v33 = vld [vmem:[#allocation28_spill] sm:$0xff] }
 0x238   : > { %5409 = vst [vmem:[#allocation185_spill] sm:$0xff] %v4042_v14 }
 0x239   : > { %v4028_v5 = vpop.permute.xlu2 %1370 }
 0x23a   : > { %5406 = vst [vmem:[#allocation183_spill] sm:$0xff] %v4028_v5 }
 0x23b   : > { %1507 = vrot.lane.b32.xlu0 %v3809_v50, %s3026_s7 }
 0x23c   : > { %1509 = vrot.lane.b32.xlu1 %v5407_v41, %s3026_s7  ;;  %v5412_v41 = vld [vmem:[#allocation25_spill] sm:$0xff] }
 0x23d   : > { %v4036_v40 = vpop.permute.xlu0 %1354 }
 0x23e   : > { %5408 = vst [vmem:[#allocation184_spill] sm:$0xff] %v4036_v40  ;;  %v4039_v7 = vpop.permute.xlu1 %1356 }
 0x23f   : > { %1511 = vrot.lane.b32.xlu2 %v4042_v14, %s3026_s7 }
 0x241   : > { %v4046_v26 = vpop.permute.xlu2 %1376 }
 0x242   : > { %5410 = vst [vmem:[#allocation186_spill] sm:$0xff] %v4046_v26  ;;  %v5415_v26 = vld [vmem:[#allocation56_spill] sm:$0xff] }
 0x243   : > { %1513 = vrot.lane.b32.xlu0 %v4049_v24, %s3026_s7 }
 0x244   : > { %1581 = vrot.lane.b32.xlu1 %v5412_v41, %s3027_s8  ;;  %v5419_v41 = vld [vmem:[#allocation93_spill] sm:$0xff] }
 0x245   : > { %v4055_v62 = vpop.permute.xlu0 %1360 }
 0x246   : > { %5413 = vst [vmem:[#allocation188_spill] sm:$0xff] %v4055_v62  ;;  %v4057_v50 = vpop.permute.xlu1 %1362 }
 0x247   : > { %1583 = vrot.lane.b32.xlu2 %v5414_v33, %s3027_s8 }
 0x249   : > { %v4061_v14 = vpop.permute.xlu2 %1451 }
 0x24b   : > { %1585 = vrot.lane.b32.xlu0 %v5415_v26, %s3027_s8 }
 0x24c   : > { %1587 = vrot.lane.b32.xlu1 %v5416_v52, %s3027_s8  ;;  %v5424_v52 = vld [vmem:[#allocation10_spill] sm:$0xff] }
 0x24d   : > { %v4067_v55 = vpop.permute.xlu0 %1366 }
 0x24e   : > { %5417 = vst [vmem:[#allocation189_spill] sm:$0xff] %v4067_v55  ;;  %v4069_v24 = vpop.permute.xlu1 %1368  ;;  %v5432_v55 = vld [vmem:[#allocation38_spill] sm:$0xff] }
 0x24f   : > { %5418 = vst [vmem:[#allocation190_spill] sm:$0xff] %v4069_v24  ;;  %1589 = vrot.lane.b32.xlu2 %v5419_v41, %s3027_s8  ;;  %v5427_v41 = vld [vmem:[#allocation23_spill] sm:$0xff] }
 0x250   : > { %v5454_v24 = vld [vmem:[#allocation115_spill] sm:$0xff] }
 0x251   : > { %v4073_v5 = vpop.permute.xlu2 %1457 }
 0x253   : > { %1591 = vrot.lane.b32.xlu0 %v5420_v44, %s3027_s8 }
 0x254   : > { %1593 = vrot.lane.b32.xlu1 %v5421_v2, %s3027_s8  ;;  %v5430_v2 = vld [vmem:[#allocation32_spill] sm:$0xff] }
 0x255   : > { %v4079_v27 = vpop.permute.xlu0 %1372 }
 0x256   : > { %5422 = vst [vmem:[#allocation191_spill] sm:$0xff] %v4079_v27  ;;  %v4081_v26 = vpop.permute.xlu1 %1374 }
 0x257   : > { %5423 = vst [vmem:[#allocation192_spill] sm:$0xff] %v4081_v26  ;;  %1595 = vrot.lane.b32.xlu2 %v5424_v52, %s3027_s8  ;;  %v5440_v26 = vld [vmem:[#allocation11_spill] sm:$0xff] }
 0x259   : > { %v4085_v34 = vpop.permute.xlu2 %1463 }
 0x25a   : > { %5425 = vst [vmem:[#allocation10_spill] sm:$0xff] %v4085_v34  ;;  %v5433_v34 = vld [vmem:[#allocation74_spill] sm:$0xff] }
 0x25b   : > { %1597 = vrot.lane.b32.xlu0 %v5426_v47, %s3027_s8 }
 0x25c   : > { %1599 = vrot.lane.b32.xlu1 %v5427_v41, %s3027_s8 }
 0x25d   : > { %v4091_v20 = vpop.permute.xlu0 %1378 }
 0x25e   : > { %5428 = vst [vmem:[#allocation21_spill] sm:$0xff] %v4091_v20  ;;  %v4093_v44 = vpop.permute.xlu1 %1380 }
 0x25f   : > { %5429 = vst [vmem:[#allocation23_spill] sm:$0xff] %v4093_v44  ;;  %1601 = vrot.lane.b32.xlu2 %v5430_v2, %s3027_s8  ;;  %v5435_v44 = vld [vmem:[#allocation116_spill] sm:$0xff] }
 0x261   : > { %v4097_v27 = vpop.permute.xlu2 %1469 }
 0x262   : > { %5431 = vst [vmem:[#allocation32_spill] sm:$0xff] %v4097_v27 }
 0x263   : > { %1603 = vrot.lane.b32.xlu0 %v5432_v55, %s3027_s8 }
 0x264   : > { %1605 = vrot.lane.b32.xlu1 %v5433_v34, %s3027_s8 }
 0x265   : > { %v1454_v10 = vpop.permute.xlu0 %1453 }
 0x266   : > { %v4103_v33 = vpop.permute.xlu1 %1455 }
 0x267   : > { %1607 = vrot.lane.b32.xlu2 %v5434_v49, %s3027_s8 }
 0x269   : > { %v4107_v20 = vpop.permute.xlu2 %1475 }
 0x26b   : > { %1609 = vrot.lane.b32.xlu0 %v3653_v51, %s3027_s8 }
 0x26c   : > { %1611 = vrot.lane.b32.xlu1 %v5435_v44, %s3027_s8 }
 0x26d   : > { %v4113_v27 = vpop.permute.xlu0 %1459 }
 0x26e   : > { %5436 = vst [vmem:[#allocation38_spill] sm:$0xff] %v4113_v27  ;;  %v4115_v62 = vpop.permute.xlu1 %1461 }
 0x26f   : > { %5437 = vst [vmem:[#allocation74_spill] sm:$0xff] %v4115_v62  ;;  %1613 = vrot.lane.b32.xlu2 %v5438_v31, %s3027_s8  ;;  %v5446_v62 = vld [vmem:[#allocation27_spill] sm:$0xff] }
 0x270   : > { %v5447_v31 = vld [vmem:[#allocation39_spill] sm:$0xff] }
 0x271   : > { %v4119_v57 = vpop.permute.xlu2 %1481 }
 0x272   : > { %5439 = vst [vmem:[#allocation81_spill] sm:$0xff] %v4119_v57  ;;  %v5460_v57 = vld [vmem:[#allocation55_spill] sm:$0xff] }
 0x273   : > { %1615 = vrot.lane.b32.xlu0 %v5440_v26, %s3027_s8 }
 0x274   : > { %1617 = vrot.lane.b32.xlu1 %v5441_v12, %s3027_s8 }
 0x275   : > { %v4125_v17 = vpop.permute.xlu0 %1465 }
 0x276   : > { %5442 = vst [vmem:[#allocation116_spill] sm:$0xff] %v4125_v17  ;;  %v4127_v40 = vpop.permute.xlu1 %1467 }
 0x277   : > { %5443 = vst [vmem:[#allocation19_spill] sm:$0xff] %v4127_v40  ;;  %1619 = vrot.lane.b32.xlu2 %v5444_v36, %s3027_s8  ;;  %v5451_v40 = vld [vmem:[#allocation72_spill] sm:$0xff]  ;;  %v5452_v36 = vld [vmem:[#allocation102_spill] sm:$0xff] }
 0x279   : > { %v4131_v27 = vpop.permute.xlu2 %1487 }
 0x27a   : > { %5445 = vst [vmem:[#allocation193_spill] sm:$0xff] %v4131_v27 }
 0x27b   : > { %1621 = vrot.lane.b32.xlu0 %v5446_v62, %s3027_s8 }
 0x27c   : > { %1623 = vrot.lane.b32.xlu1 %v5447_v31, %s3027_s8 }
 0x27d   : > { %v4137_v30 = vpop.permute.xlu0 %1471 }
 0x27e   : > { %5448 = vst [vmem:[#allocation39_spill] sm:$0xff] %v4137_v30  ;;  %v4139_v26 = vpop.permute.xlu1 %1473 }
 0x27f   : > { %1625 = vrot.lane.b32.xlu2 %v5449_v38, %s3027_s8  ;;  %v4159_v38 = vpop.f32.mrf.mxu3 }
 0x280   : > { %5456 = vst [vmem:[#allocation196_spill] sm:$0xff] %v4159_v38 }
 0x281   : > { %v4143_v17 = vpop.permute.xlu2 %1493 }
 0x282   : > { %5450 = vst [vmem:[#allocation194_spill] sm:$0xff] %v4143_v17 }
 0x283   : > { %1627 = vrot.lane.b32.xlu0 %v5451_v40, %s3027_s8 }
 0x284   : > { %1629 = vrot.lane.b32.xlu1 %v5452_v36, %s3027_s8 }
 0x285   : > { %v4149_v27 = vpop.permute.xlu0 %1477 }
 0x286   : > { %v4151_v62 = vpop.permute.xlu1 %1479 }
 0x287   : > { %5453 = vst [vmem:[#allocation102_spill] sm:$0xff] %v4151_v62  ;;  %1631 = vrot.lane.b32.xlu2 %v5454_v24, %s3027_s8  ;;  %v4171_v24 = vld [vmem:[#allocation2] ss:$0 sm:$0xff]  ;;  %v4182_v23 = vpop.f32.mrf.mxu3 }
 0x289   : > { %v4155_v30 = vpop.permute.xlu2 %1499 }
 0x28a   : > { %5455 = vst [vmem:[#allocation195_spill] sm:$0xff] %v4155_v30 }
 0x28b   : > { %1633 = vrot.lane.b32.xlu0 %v3774_v35, %s3027_s8  ;;  %v5459_v35 = vld [vmem:[#allocation8_spill] sm:$0xff] }
 0x28c   : > { %1635 = vrot.lane.b32.xlu1 %v3156_v29, %s3027_s8  ;;  %v685_v30 = vadd.f32 %v4171_v24, %v5459_v35  ;;  %5461 = vst [vmem:[#allocation8_spill] sm:$0xff] %v4182_v23  ;;  %v5465_v35 = vld [vmem:[#allocation30_spill] sm:$0xff] }
 0x28d   : > { %v4163_v40 = vpop.permute.xlu0 %1483 }
 0x28e   : > { %v4165_v17 = vpop.permute.xlu1 %1485 }
 0x28f   : > { %5457 = vst [vmem:[#allocation197_spill] sm:$0xff] %v4165_v17  ;;  %1637 = vrot.lane.b32.xlu2 %v3229_v1, %s3027_s8  ;;  %v942_v17 = vadd.f32 %v5460_v57, %v685_v30  ;;  %v5468_v57 = vld [vmem:[#allocation104_spill] sm:$0xff] }
 0x291   : > { %v4169_v59 = vpop.permute.xlu2 %1505 }
 0x292   : > { %5458 = vst [vmem:[#allocation198_spill] sm:$0xff] %v4169_v59  ;;  %v5463_v59 = vld [vmem:[#allocation61_spill] sm:$0xff] }
 0x293   : > { %1639 = vrot.lane.b32.xlu0 %v3244_v6, %s3027_s8  ;;  %v1151_v62 = vadd.f32 %v5463_v59, %v942_v17 }
 0x294   : > { %1641 = vrot.lane.b32.xlu1 %v4159_v38, %s3027_s8  ;;  %v5466_v38 = vld [vmem:[#allocation53_spill] sm:$0xff] }
 0x295   : > { %v4179_v29 = vpop.permute.xlu0 %1489  ;;  %v1281_v19 = vadd.f32 %v5466_v38, %v1151_v62  ;;  %v5473_v38 = vld [vmem:[#allocation109_spill] sm:$0xff] }
 0x296   : > { %v4184_v1 = vpop.permute.xlu1 %1491 }
 0x297   : > { %5462 = vst [vmem:[#allocation55_spill] sm:$0xff] %v4184_v1  ;;  %1643 = vrot.lane.b32.xlu2 %v4182_v23, %s3027_s8  ;;  %v1415_v1 = vadd.f32 %v5468_v57, %v1281_v19  ;;  %v5470_v23 = vld [vmem:[#allocation76_spill] sm:$0xff]  ;;  %v5475_v19 = vld [vmem:[#allocation5_spill] sm:$0xff] }
 0x299   : > { %v4189_v6 = vpop.permute.xlu2 %1511  ;;  %v1548_v59 = vadd.f32 %v1454_v10, %v1415_v1  ;;  %v5477_v1 = vld [vmem:[#allocation46_spill] sm:$0xff] }
 0x29a   : > { %5464 = vst [vmem:[#allocation61_spill] sm:$0xff] %v4189_v6 }
 0x29b   : > { %1715 = vrot.lane.b32.xlu0 %v5465_v35, %s3028_s9  ;;  %v5472_v35 = vld [vmem:[#allocation84_spill] sm:$0xff] }
 0x29c   : > { %1717 = vrot.lane.b32.xlu1 %v5467_v22, %s3028_s9 }
 0x29d   : > { %v4196_v30 = vpop.permute.xlu0 %1495 }
 0x29e   : > { %v4199_v21 = vpop.permute.xlu1 %1497 }
 0x29f   : > { %5469 = vst [vmem:[#allocation30_spill] sm:$0xff] %v4199_v21  ;;  %1719 = vrot.lane.b32.xlu2 %v5470_v23, %s3028_s9  ;;  %v684_v23 = vadd.f32 %v4171_v24, %v5475_v19  ;;  %v5486_v21 = vld [vmem:[#allocation82_spill] sm:$0xff] }
 0x2a1   : > { %v1584_v17 = vpop.permute.xlu2 %1583  ;;  %v941_v57 = vadd.f32 %v5477_v1, %v684_v23  ;;  %v5483_v1 = vld [vmem:[#allocation18_spill] sm:$0xff] }
 0x2a2   : > { %v4203_v6 = vadd.f32 %v1584_v17, %v1548_v59 }
 0x2a3   : > { %1721 = vrot.lane.b32.xlu0 %v5472_v35, %s3028_s9  ;;  %v5480_v35 = vld [vmem:[#allocation29_spill] sm:$0xff] }
 0x2a4   : > { %5471 = vst [vmem:[#allocation53_spill] sm:$0xff] %v4203_v6  ;;  %1723 = vrot.lane.b32.xlu1 %v5473_v38, %s3028_s9  ;;  %v1150_v38 = vadd.f32 %v5480_v35, %v941_v57  ;;  %v5487_v35 = vld [vmem:[#allocation100_spill] sm:$0xff] }
 0x2a5   : > { %v4209_v22 = vpop.permute.xlu0 %1501 }
 0x2a6   : > { %v4211_v62 = vpop.permute.xlu1 %1503 }
 0x2a7   : > { %5474 = vst [vmem:[#allocation48_spill] sm:$0xff] %v4211_v62  ;;  %1725 = vrot.lane.b32.xlu2 %v3663_v25, %s3028_s9  ;;  %v5481_v25 = vld [vmem:[#allocation16_spill] sm:$0xff] }
 0x2a8   : > { %v686_v19 = vadd.f32 %v4171_v24, %v5481_v25 }
 0x2a9   : > { %v4217_v10 = vpop.permute.xlu2 %1589 }
 0x2aa   : > { %5476 = vst [vmem:[#allocation104_spill] sm:$0xff] %v4217_v10  ;;  %v5482_v10 = vld [vmem:[#allocation68_spill] sm:$0xff] }
 0x2ab   : > { %1727 = vrot.lane.b32.xlu0 %v3227_v0, %s3028_s9  ;;  %v1280_v23 = vadd.f32 %v5482_v10, %v1150_v38  ;;  %v687_v0 = vadd.f32 %v4171_v24, %v5483_v1  ;;  %v5489_v10 = vld [vmem:[#allocation113_spill] sm:$0xff] }
 0x2ac   : > { %1729 = vrot.lane.b32.xlu1 %v3234_v3, %s3028_s9  ;;  %v5485_v3 = vld [vmem:[#allocation78_spill] sm:$0xff] }
 0x2ad   : > { %v4224_v59 = vpop.permute.xlu0 %1507  ;;  %v943_v62 = vadd.f32 %v5485_v3, %v686_v19  ;;  %v1414_v57 = vadd.f32 %v5486_v21, %v1280_v23  ;;  %v5490_v3 = vld [vmem:[#allocation103_spill] sm:$0xff]  ;;  %v5491_v21 = vld [vmem:[#allocation65_spill] sm:$0xff] }
 0x2ae   : > { %5478 = vst [vmem:[#allocation76_spill] sm:$0xff] %v4224_v59  ;;  %v4226_v17 = vpop.permute.xlu1 %1509  ;;  %v944_v59 = vadd.f32 %v5487_v35, %v687_v0 }
 0x2af   : > { %5479 = vst [vmem:[#allocation84_spill] sm:$0xff] %v4226_v17  ;;  %1731 = vrot.lane.b32.xlu2 %v3347_v4, %s3028_s9  ;;  %v697_v17 = vadd.f32 %v4171_v24, %v5427_v41  ;;  %v5488_v4 = vld [vmem:[#allocation83_spill] sm:$0xff]  ;;  %v1547_v1 = vadd.f32 %v4061_v14, %v1414_v57 }
 0x2b0   : > { %v1152_v25 = vadd.f32 %v5488_v4, %v943_v62  ;;  %v1153_v23 = vadd.f32 %v5491_v21, %v944_v59  ;;  %v5494_v14 = vld [vmem:[#allocation91_spill] sm:$0xff]  ;;  %v5495_v59 = vld [vmem:[#allocation96_spill] sm:$0xff] }
 0x2b1   : > { %v4236_v6 = vpop.permute.xlu2 %1595  ;;  %v954_v38 = vadd.f32 %v5489_v10, %v697_v17  ;;  %v5493_v17 = vld [vmem:[#allocation119_spill] sm:$0xff] }
 0x2b2   : > { %5484 = vst [vmem:[#allocation109_spill] sm:$0xff] %v4236_v6  ;;  %v1282_v41 = vadd.f32 %v5490_v3, %v1152_v25  ;;  %v1283_v35 = vadd.f32 %v5493_v17, %v1153_v23  ;;  %v706_v23 = vadd.f32 %v4171_v24, %v5441_v12 }
 0x2b3   : > { %1733 = vrot.lane.b32.xlu0 %v3401_v60, %s3028_s9  ;;  %v5492_v60 = vld [vmem:[#allocation107_spill] sm:$0xff] }
 0x2b4   : > { %1735 = vrot.lane.b32.xlu1 %v3447_v42, %s3028_s9  ;;  %v1163_v62 = vadd.f32 %v5492_v60, %v954_v38  ;;  %v700_v42 = vadd.f32 %v4171_v24, %v5433_v34  ;;  %v1416_v57 = vadd.f32 %v5494_v14, %v1282_v41  ;;  %v1417_v25 = vadd.f32 %v3763_v16, %v1283_v35  ;;  %v5496_v60 = vld [vmem:[#allocation98_spill] sm:$0xff]  ;;  %v5499_v35 = vld [vmem:[#allocation31_spill] sm:$0xff] }
 0x2b5   : > { %v4250_v19 = vpop.permute.xlu0 %1513 }
 0x2b6   : > { %v1582_v6 = vpop.permute.xlu1 %1581  ;;  %v1549_v10 = vadd.f32 %v4103_v33, %v1416_v57  ;;  %v1550_v38 = vadd.f32 %v4073_v5, %v1417_v25  ;;  %v5501_v25 = vld [vmem:[#allocation70_spill] sm:$0xff] }
 0x2b7   : > { %v4254_v0 = vadd.f32 %v1582_v6, %v1547_v1  ;;  %1737 = vrot.lane.b32.xlu2 %v3496_v18, %s3028_s9  ;;  %v957_v6 = vadd.f32 %v3881_v54, %v700_v42  ;;  %v1293_v18 = vadd.f32 %v5495_v59, %v1163_v62  ;;  %v5500_v42 = vld [vmem:[#allocation73_spill] sm:$0xff]  ;;  %v5503_v59 = vld [vmem:[#allocation88_spill] sm:$0xff] }
 0x2b9   : > { %v4260_v4 = vpop.permute.xlu2 %1601  ;;  %v1427_v34 = vadd.f32 %v4012_v58, %v1293_v18 }
 0x2bb   : > { %1739 = vrot.lane.b32.xlu0 %v3630_v37, %s3028_s9  ;;  %v1166_v37 = vadd.f32 %v3867_v28, %v957_v6  ;;  %v1560_v54 = vadd.f32 %v4149_v27, %v1427_v34 }
 0x2bc   : > { %1741 = vrot.lane.b32.xlu1 %v3617_v43, %s3028_s9  ;;  %v703_v43 = vadd.f32 %v4171_v24, %v5435_v44 }
 0x2bd   : > { %v1586_v1 = vpop.permute.xlu0 %1585  ;;  %v1296_v21 = vadd.f32 %v3861_v32, %v1166_v37 }
 0x2be   : > { %v4275_v3 = vadd.f32 %v1586_v1, %v1549_v10  ;;  %v1588_v16 = vpop.permute.xlu1 %1587  ;;  %v960_v58 = vadd.f32 %v3976_v39, %v703_v43  ;;  %v696_v39 = vadd.f32 %v4171_v24, %v5426_v47  ;;  %v5504_v10 = vld [vmem:[#allocation94_spill] sm:$0xff] }
 0x2bf   : > { %v4277_v41 = vadd.f32 %v1588_v16, %v1550_v38  ;;  %1743 = vrot.lane.b32.xlu2 %v3754_v46, %s3028_s9  ;;  %v1430_v28 = vadd.f32 %v4024_v8, %v1296_v21  ;;  %v699_v16 = vadd.f32 %v4171_v24, %v5432_v55 }
 0x2c0   : > { %v1169_v44 = vadd.f32 %v3974_v15, %v960_v58  ;;  %v953_v62 = vadd.f32 %v5496_v60, %v696_v39  ;;  %v5506_v58 = vld [vmem:[#allocation137_spill] sm:$0xff]  ;;  %v5509_v39 = vld [vmem:[#allocation80_spill] sm:$0xff] }
 0x2c1   : > { %v1608_v33 = vpop.permute.xlu2 %1607  ;;  %v956_v21 = vadd.f32 %v5506_v58, %v699_v16  ;;  %v5521_v16 = vld [vmem:[#allocation171_spill] sm:$0xff] }
 0x2c2   : > { %v4285_v5 = vadd.f32 %v1608_v33, %v1560_v54  ;;  %v1299_v47 = vadd.f32 %v5499_v35, %v1169_v44  ;;  %v1162_v6 = vadd.f32 %v5501_v25, %v953_v62  ;;  %v709_v54 = vadd.f32 %v4171_v24, %v5447_v31  ;;  %v5508_v44 = vld [vmem:[#allocation138_spill] sm:$0xff]  ;;  %v5510_v31 = vld [vmem:[#allocation79_spill] sm:$0xff]  ;;  %v5514_v35 = vld [vmem:[#allocation133_spill] sm:$0xff] }
 0x2c3   : > { %1745 = vrot.lane.b32.xlu0 %v3779_v61, %s3028_s9  ;;  %v1563_v61 = vadd.f32 %v4163_v40, %v1430_v28  ;;  %v5498_v40 = vld [vmem:[#allocation95_spill] sm:$0xff]  ;;  %v5507_v28 = vld [vmem:[#allocation110_spill] sm:$0xff] }
 0x2c4   : > { %1747 = vrot.lane.b32.xlu1 %v3198_v48, %s3028_s9  ;;  %v695_v48 = vadd.f32 %v4171_v24, %v5424_v52  ;;  %v963_v17 = vadd.f32 %v5498_v40, %v706_v23  ;;  %v1433_v14 = vadd.f32 %v4039_v7, %v1299_v47  ;;  %v698_v7 = vadd.f32 %v4171_v24, %v5430_v2  ;;  %v5511_v23 = vld [vmem:[#allocation134_spill] sm:$0xff]  ;;  %v5515_v47 = vld [vmem:[#allocation144_spill] sm:$0xff] }
 0x2c5   : > { %v4293_v46 = vpop.permute.xlu0 %1591  ;;  %v702_v40 = vadd.f32 %v4171_v24, %v3653_v51  ;;  %v712_v51 = vadd.f32 %v4171_v24, %v5452_v36  ;;  %v5525_v36 = vld [vmem:[#allocation158_spill] sm:$0xff] }
 0x2c6   : > { %v4296_v27 = vpop.permute.xlu1 %1593  ;;  %v1172_v38 = vadd.f32 %v5504_v10, %v963_v17  ;;  %v1566_v1 = vadd.f32 %v4179_v29, %v1433_v14  ;;  %v955_v55 = vadd.f32 %v5507_v28, %v698_v7 }
 0x2c7   : > { %1749 = vrot.lane.b32.xlu2 %v3262_v13, %s3028_s9  ;;  %v5497_v13 = vld [vmem:[#allocation45_spill] sm:$0xff]  ;;  %v959_v25 = vadd.f32 %v3962_v63, %v702_v40  ;;  %v969_v63 = vadd.f32 %v5521_v16, %v712_v51  ;;  %v5533_v40 = vld [vmem:[#allocation11_spill] sm:$0xff]  ;;  %v4413_v16 = vpop.f32.mrf.mxu3 }
 0x2c8   : > { %v952_v15 = vadd.f32 %v5497_v13, %v695_v48  ;;  %v1302_v2 = vadd.f32 %v5509_v39, %v1172_v38  ;;  %v1164_v60 = vadd.f32 %v5511_v23, %v955_v55  ;;  %v5512_v13 = vld [vmem:[#allocation121_spill] sm:$0xff]  ;;  %v5518_v38 = vld [vmem:[#allocation182_spill] sm:$0xff]  ;;  %v5538_v51 = vld [vmem:[#allocation71_spill] sm:$0xff] }
 0x2c9   : > { %v1614_v32 = vpop.permute.xlu2 %1613  ;;  %v1168_v58 = vadd.f32 %v5525_v36, %v959_v25  ;;  %v5527_v55 = vld [vmem:[#allocation162_spill] sm:$0xff] }
 0x2ca   : > { %v4308_v8 = vadd.f32 %v1614_v32, %v1563_v61  ;;  %v1161_v12 = vadd.f32 %v5500_v42, %v952_v15  ;;  %v966_v61 = vadd.f32 %v5508_v44, %v709_v54  ;;  %v1165_v15 = vadd.f32 %v5512_v13, %v956_v21  ;;  %v5523_v54 = vld [vmem:[#allocation102_spill] sm:$0xff]  ;;  %v5526_v21 = vld [vmem:[#allocation81_spill] sm:$0xff] }
 0x2cb   : > { %1751 = vrot.lane.b32.xlu0 %v3330_v53, %s3028_s9  ;;  %v5502_v53 = vld [vmem:[#allocation50_spill] sm:$0xff]  ;;  %v1294_v42 = vadd.f32 %v5515_v47, %v1164_v60 }
 0x2cc   : > { %1753 = vrot.lane.b32.xlu1 %v3315_v45, %s3028_s9  ;;  %v1291_v18 = vadd.f32 %v5503_v59, %v1161_v12  ;;  %v5505_v45 = vld [vmem:[#allocation125_spill] sm:$0xff]  ;;  %v5517_v59 = vld [vmem:[#allocation174_spill] sm:$0xff] }
 0x2cd   : > { %v4318_v52 = vpop.permute.xlu0 %1597  ;;  %v1292_v34 = vadd.f32 %v5505_v45, %v1162_v6  ;;  %v5519_v45 = vld [vmem:[#allocation123_spill] sm:$0xff]  ;;  %v5531_v60 = vld [vmem:[#allocation170_spill] sm:$0xff] }
 0x2ce   : > { %v4322_v57 = vpop.permute.xlu1 %1599  ;;  %v1425_v33 = vadd.f32 %v3968_v9, %v1291_v18  ;;  %v1428_v18 = vadd.f32 %v5517_v59, %v1294_v42  ;;  %v5532_v13 = vld [vmem:[#allocation6_spill] sm:$0xff]  ;;  %v5535_v42 = vld [vmem:[#allocation177_spill] sm:$0xff]  ;;  %v5539_v59 = vld [vmem:[#allocation184_spill] sm:$0xff] }
 0x2cf   : > { %1755 = vrot.lane.b32.xlu2 %v5502_v53, %s3028_s9  ;;  %v1426_v29 = vadd.f32 %v4010_v56, %v1292_v34  ;;  %v1436_v56 = vadd.f32 %v4057_v50, %v1302_v2  ;;  %v5516_v50 = vld [vmem:[#allocation148_spill] sm:$0xff]  ;;  %v701_v53 = vadd.f32 %v4171_v24, %v5434_v49 }
 0x2d0   : > { %v1558_v32 = vadd.f32 %v4139_v26, %v1425_v33  ;;  %v5513_v26 = vld [vmem:[#allocation97_spill] sm:$0xff]  ;;  %v1295_v14 = vadd.f32 %v5516_v50, %v1165_v15  ;;  %v1561_v49 = vadd.f32 %v5523_v54, %v1428_v18  ;;  %v5524_v33 = vld [vmem:[#allocation126_spill] sm:$0xff]  ;;  %v704_v15 = vadd.f32 %v4171_v24, %v5532_v13  ;;  %v5545_v54 = vld [vmem:[#allocation52_spill] sm:$0xff] }
 0x2d1   : > { %v1620_v37 = vpop.permute.xlu2 %1619  ;;  %v1559_v9 = vadd.f32 %v4107_v20, %v1426_v29  ;;  %v1175_v20 = vadd.f32 %v5514_v35, %v966_v61  ;;  %v1569_v12 = vadd.f32 %v4196_v30, %v1436_v56  ;;  %v5520_v30 = vld [vmem:[#allocation146_spill] sm:$0xff]  ;;  %v1178_v56 = vadd.f32 %v5531_v60, %v969_v63  ;;  %v5534_v35 = vld [vmem:[#allocation37_spill] sm:$0xff]  ;;  %v5543_v63 = vld [vmem:[#allocation159_spill] sm:$0xff] }
 0x2d2   : > { %v4338_v43 = vadd.f32 %v1620_v37, %v1566_v1  ;;  %v1429_v1 = vadd.f32 %v5518_v38, %v1295_v14  ;;  %v958_v34 = vadd.f32 %v5520_v30, %v701_v53  ;;  %v5522_v37 = vld [vmem:[#allocation130_spill] sm:$0xff]  ;;  %v5536_v14 = vld [vmem:[#allocation33_spill] sm:$0xff]  ;;  %v5540_v38 = vld [vmem:[#allocation12_spill] sm:$0xff] }
 0x2d3   : > { %1757 = vrot.lane.b32.xlu0 %v3503_v11, %s3028_s9  ;;  %v1305_v7 = vadd.f32 %v5522_v37, %v1175_v20  ;;  %v5528_v61 = vld [vmem:[#allocation190_spill] sm:$0xff]  ;;  %v1298_v20 = vadd.f32 %v5534_v35, %v1168_v58  ;;  %v961_v25 = vadd.f32 %v5536_v14, %v704_v15  ;;  %v5542_v30 = vld [vmem:[#allocation197_spill] sm:$0xff]  ;;  %v5544_v37 = vld [vmem:[#allocation47_spill] sm:$0xff] }
 0x2d4   : > { %1759 = vrot.lane.b32.xlu1 %v5510_v31, %s3028_s9  ;;  %v1562_v29 = vadd.f32 %v5526_v21, %v1429_v1  ;;  %v1167_v44 = vadd.f32 %v5527_v55, %v958_v34  ;;  %v5541_v1 = vld [vmem:[#allocation169_spill] sm:$0xff]  ;;  %v5547_v21 = vld [vmem:[#allocation196_spill] sm:$0xff] }
 0x2d5   : > { %v1604_v48 = vpop.permute.xlu0 %1603  ;;  %v1439_v39 = vadd.f32 %v5528_v61, %v1305_v7  ;;  %v1432_v18 = vadd.f32 %v5539_v59, %v1298_v20  ;;  %v5553_v15 = vld [vmem:[#allocation77_spill] sm:$0xff] }
 0x2d6   : > { %v4353_v62 = vadd.f32 %v1604_v48, %v1558_v32  ;;  %v1606_v11 = vpop.permute.xlu1 %1605  ;;  %v5530_v48 = vld [vmem:[#allocation167_spill] sm:$0xff]  ;;  %v5555_v20 = vld [vmem:[#allocation89_spill] sm:$0xff] }
 0x2d7   : > { %v4358_v17 = vadd.f32 %v1606_v11, %v1559_v9  ;;  %1761 = vrot.lane.b32.xlu2 %v5513_v26, %s3028_s9  ;;  %v5529_v9 = vld [vmem:[#allocation136_spill] sm:$0xff]  ;;  %v1297_v23 = vadd.f32 %v5530_v48, %v1167_v44  ;;  %v1572_v11 = vadd.f32 %v4209_v22, %v1439_v39  ;;  %v705_v26 = vadd.f32 %v4171_v24, %v5533_v40 }
 0x2d8   : > { %v5549_v44 = vld [vmem:[#allocation192_spill] sm:$0xff] }
 0x2d9   : > { %v1626_v6 = vpop.permute.xlu2 %1625  ;;  %v962_v22 = vadd.f32 %v5538_v51, %v705_v26  ;;  %v5554_v26 = vld [vmem:[#allocation76_spill] sm:$0xff] }
 0x2da   : > { %v4372_v10 = vadd.f32 %v1626_v6, %v1569_v12  ;;  %v1431_v12 = vadd.f32 %v5535_v42, %v1297_v23  ;;  %v5537_v6 = vld [vmem:[#allocation7_spill] sm:$0xff]  ;;  %v1713_v23 = vrot.slane %v4413_v16, 1 }
 0x2db   : > { %1763 = vrot.lane.b32.xlu0 %v5519_v45, %s3028_s9  ;;  %v715_v53 = vadd.f32 %v4171_v24, %v5537_v6  ;;  %v1308_v45 = vadd.f32 %v5541_v1, %v1178_v56  ;;  %v5551_v56 = vld [vmem:[#allocation160_spill] sm:$0xff]  ;;  %v5556_v42 = vld [vmem:[#allocation27_spill] sm:$0xff] }
 0x2dc   : > { %1765 = vrot.lane.b32.xlu1 %v5524_v33, %s3028_s9  ;;  %v1564_v34 = vadd.f32 %v5542_v30, %v1431_v12  ;;  %v5546_v33 = vld [vmem:[#allocation193_spill] sm:$0xff]  ;;  %v708_v12 = vadd.f32 %v4171_v24, %v5556_v42  ;;  %v5560_v1 = vld [vmem:[#allocation188_spill] sm:$0xff] }
 0x2dd   : > { %v1610_v28 = vpop.permute.xlu0 %1609  ;;  %v972_v7 = vadd.f32 %v5544_v37, %v715_v53  ;;  %v1565_v36 = vadd.f32 %v5546_v33, %v1432_v18  ;;  %v1442_v61 = vadd.f32 %v5549_v44, %v1308_v45  ;;  %v5558_v53 = vld [vmem:[#allocation180_spill] sm:$0xff]  ;;  %v5562_v37 = vld [vmem:[#allocation49_spill] sm:$0xff]  ;;  %v5564_v33 = vld [vmem:[#allocation194_spill] sm:$0xff] }
 0x2de   : > { %v4387_v2 = vadd.f32 %v1610_v28, %v1561_v49  ;;  %v1612_v32 = vpop.permute.xlu1 %1611  ;;  %v1170_v49 = vadd.f32 %v5545_v54, %v961_v25  ;;  %v5548_v28 = vld [vmem:[#allocation8_spill] sm:$0xff]  ;;  %v5557_v25 = vld [vmem:[#allocation22_spill] sm:$0xff]  ;;  %v5563_v54 = vld [vmem:[#allocation55_spill] sm:$0xff] }
 0x2df   : > { %v4389_v31 = vadd.f32 %v1612_v32, %v1562_v29  ;;  %1767 = vrot.lane.b32.xlu2 %v5529_v9, %s3028_s9  ;;  %v1710_v29 = vrot.slane %v5547_v21, 1  ;;  %v1711_v55 = vrot.slane %v5548_v28, 1  ;;  %v5550_v9 = vld [vmem:[#allocation40_spill] sm:$0xff]  ;;  %v1575_v35 = vadd.f32 %v5554_v26, %v1442_v61  ;;  %v5566_v61 = vld [vmem:[#allocation23_spill] sm:$0xff]  ;;  %v5570_v26 = vld [vmem:[#allocation142_spill] sm:$0xff] }
 0x2e0   : > { %v1171_v48 = vadd.f32 %v5550_v9, %v962_v22  ;;  %v1300_v40 = vadd.f32 %v5553_v15, %v1170_v49  ;;  %v707_v6 = vadd.f32 %v4171_v24, %v5557_v25  ;;  %v5559_v18 = vld [vmem:[#allocation124_spill] sm:$0xff]  ;;  %v5573_v25 = vld [vmem:[#allocation66_spill] sm:$0xff] }
 0x2e1   : > { %v1632_v47 = vpop.permute.xlu2 %1631  ;;  %v1712_v59 = vsel %vm764_vm2, %v1710_v29, %v1711_v55  ;;  %v1714_v30 = vsel %vm764_vm2, %v1711_v55, %v1713_v23  ;;  %v5565_v29 = vld [vmem:[#allocation108_spill] sm:$0xff]  ;;  %vm2587_vm2 = vcmask 424960  }
 0x2e2   : > { %v4402_v50 = vadd.f32 %v1632_v47, %v1572_v11  ;;  %v5552_v11 = vld [vmem:[#allocation51_spill] sm:$0xff]  ;;  %v1301_v47 = vadd.f32 %v5555_v20, %v1171_v48  ;;  %v1434_v51 = vadd.f32 %v5558_v53, %v1300_v40  ;;  %v5571_v20 = vld [vmem:[#allocation72_spill] sm:$0xff]  ;;  %v5574_v53 = vld [vmem:[#allocation181_spill] sm:$0xff] }
 0x2e3   : > { %1769 = vrot.lane.b32.xlu0 %v5540_v38, %s3028_s9  ;;  %v1181_v13 = vadd.f32 %v5552_v11, %v972_v7  ;;  %v965_v38 = vadd.f32 %v5559_v18, %v708_v12  ;;  %v5568_v11 = vld [vmem:[#allocation41_spill] sm:$0xff]  ;;  %v5572_v12 = vld [vmem:[#allocation28_spill] sm:$0xff]  ;;  %v5575_v18 = vld [vmem:[#allocation154_spill] sm:$0xff] }
 0x2e4   : > { %1771 = vrot.lane.b32.xlu1 %v5543_v63, %s3028_s9  ;;  %v1435_v45 = vadd.f32 %v5560_v1, %v1301_v47  ;;  %v1567_v49 = vadd.f32 %v5563_v54, %v1434_v51  ;;  %v711_v47 = vadd.f32 %v4171_v24, %v5571_v20  ;;  %v5576_v1 = vld [vmem:[#allocation189_spill] sm:$0xff] }
 0x2e5   : > { %v1616_v58 = vpop.permute.xlu0 %1615  ;;  %v1311_v7 = vadd.f32 %v5562_v37, %v1181_v13  ;;  %v5569_v13 = vld [vmem:[#allocation118_spill] sm:$0xff] }
 0x2e6   : > { %v4423_v39 = vadd.f32 %v1616_v58, %v1564_v34  ;;  %v1618_v32 = vpop.permute.xlu1 %1617  ;;  %v5561_v34 = vld [vmem:[#allocation75_spill] sm:$0xff] }
 0x2e7   : > { %v4427_v60 = vadd.f32 %v1618_v32, %v1565_v36  ;;  %1773 = vrot.lane.b32.xlu2 %v5551_v56, %s3028_s9  ;;  %v964_v63 = vadd.f32 %v5561_v34, %v707_v6  ;;  %v1568_v36 = vadd.f32 %v5564_v33, %v1435_v45  ;;  %v1445_v32 = vadd.f32 %v5566_v61, %v1311_v7  ;;  %v5567_v56 = vld [vmem:[#allocation101_spill] sm:$0xff]  ;;  %v5577_v45 = vld [vmem:[#allocation54_spill] sm:$0xff]  ;;  %v5582_v33 = vld [vmem:[#allocation195_spill] sm:$0xff] }
 0x2e8   : > { %v1174_v55 = vadd.f32 %v5567_v56, %v965_v38  ;;  %v710_v6 = vadd.f32 %v4171_v24, %v5573_v25  ;;  %v968_v38 = vadd.f32 %v5575_v18, %v711_v47  ;;  %v5580_v7 = vld [vmem:[#allocation30_spill] sm:$0xff]  ;;  %v5584_v61 = vld [vmem:[#allocation151_spill] sm:$0xff]  ;;  %v5589_v47 = vld [vmem:[#allocation93_spill] sm:$0xff] }
 0x2e9   : > { %v1638_v14 = vpop.permute.xlu2 %1637  ;;  %v1173_v44 = vadd.f32 %v5565_v29, %v964_v63  ;;  %v1578_v40 = vadd.f32 %v4250_v19, %v1445_v32  ;;  %v5579_v63 = vld [vmem:[#allocation135_spill] sm:$0xff]  ;;  %v5583_v29 = vld [vmem:[#allocation129_spill] sm:$0xff] }
 0x2ea   : > { %v4440_v22 = vadd.f32 %v1638_v14, %v1575_v35  ;;  %v1304_v35 = vadd.f32 %v5570_v26, %v1174_v55  ;;  %v689_v14 = vadd.f32 %v4171_v24, %v5572_v12  ;;  %v967_v37 = vadd.f32 %v5579_v63, %v710_v6  ;;  %v5585_v55 = vld [vmem:[#allocation143_spill] sm:$0xff]  ;;  %v5587_v26 = vld [vmem:[#allocation86_spill] sm:$0xff]  ;;  %v5590_v12 = vld [vmem:[#allocation156_spill] sm:$0xff] }
 0x2eb   : > { %1775 = vrot.lane.b32.xlu0 %v1712_v59, %s3028_s9  ;;  %v1303_v15 = vadd.f32 %v5569_v13, %v1173_v44  ;;  %v5586_v13 = vld [vmem:[#allocation132_spill] sm:$0xff]  ;;  %v5591_v25 = vld [vmem:[#allocation115_spill] sm:$0xff] }
 0x2ec   : > { %1777 = vrot.lane.b32.xlu1 %v1714_v30, %s3028_s9  ;;  %v1438_v19 = vadd.f32 %v5576_v1, %v1304_v35  ;;  %v5578_v30 = vld [vmem:[#allocation105_spill] sm:$0xff]  ;;  %v1176_v32 = vadd.f32 %v5584_v61, %v967_v37  ;;  %v713_v6 = vadd.f32 %v4171_v24, %v5591_v25  ;;  %v5593_v18 = vld [vmem:[#allocation175_spill] sm:$0xff]  ;;  %v5601_v61 = vld [vmem:[#allocation140_spill] sm:$0xff] }
 0x2ed   : > { %v1622_v58 = vpop.permute.xlu0 %1621  ;;  %v1437_v51 = vadd.f32 %v5574_v53, %v1303_v15  ;;  %v946_v34 = vadd.f32 %v5578_v30, %v689_v14  ;;  %v714_v15 = vadd.f32 %v4171_v24, %v5586_v13  ;;  %v5588_v35 = vld [vmem:[#allocation141_spill] sm:$0xff]  ;;  %v5592_v53 = vld [vmem:[#allocation168_spill] sm:$0xff]  ;;  %v5595_v30 = vld [vmem:[#allocation163_spill] sm:$0xff] }
 0x2ee   : > { %v4454_v9 = vadd.f32 %v1622_v58, %v1567_v49  ;;  %v1624_v48 = vpop.permute.xlu1 %1623  ;;  %v5581_v49 = vld [vmem:[#allocation69_spill] sm:$0xff]  ;;  %v1306_v14 = vadd.f32 %v5590_v12, %v1176_v32  ;;  %v5596_v63 = vld [vmem:[#allocation183_spill] sm:$0xff]  ;;  %v5604_v13 = vld [vmem:[#allocation172_spill] sm:$0xff] }
 0x2ef   : > { %v4457_v23 = vadd.f32 %v1624_v48, %v1568_v36  ;;  %1848 = vrot.lane.b32.xlu2 %v5568_v11, %s3029_s10  ;;  %v1570_v54 = vadd.f32 %v5580_v7, %v1437_v51  ;;  %v1571_v36 = vadd.f32 %v5582_v33, %v1438_v19  ;;  %v1155_v44 = vadd.f32 %v5583_v29, %v946_v34  ;;  %v5594_v19 = vld [vmem:[#allocation153_spill] sm:$0xff]  ;;  %v5598_v33 = vld [vmem:[#allocation111_spill] sm:$0xff] }
 0x2f0   : > { %v1177_v11 = vadd.f32 %v5585_v55, %v968_v38  ;;  %v971_v38 = vadd.f32 %v5593_v18, %v714_v15  ;;  %v970_v34 = vadd.f32 %v5595_v30, %v713_v6  ;;  %v1440_v37 = vadd.f32 %v5596_v63, %v1306_v14  ;;  %v5600_v29 = vld [vmem:[#allocation173_spill] sm:$0xff]  ;;  %v5611_v30 = vld [vmem:[#allocation186_spill] sm:$0xff] }
 0x2f1   : > { %v1644_v42 = vpop.permute.xlu2 %1643  ;;  %v1285_v20 = vadd.f32 %v5588_v35, %v1155_v44  ;;  %v5607_v6 = vld [vmem:[#allocation17_spill] sm:$0xff] }
 0x2f2   : > { %v4471_v59 = vadd.f32 %v1644_v42, %v1578_v40  ;;  %v692_v42 = vadd.f32 %v4171_v24, %v5589_v47  ;;  %v1307_v51 = vadd.f32 %v5592_v53, %v1177_v11  ;;  %v1179_v44 = vadd.f32 %v5600_v29, %v970_v34  ;;  %v5603_v11 = vld [vmem:[#allocation114_spill] sm:$0xff]  ;;  %v5615_v29 = vld [vmem:[#allocation84_spill] sm:$0xff] }
 0x2f3   : > { %1850 = vrot.lane.b32.xlu0 %v5577_v45, %s3029_s10  ;;  %v1419_v32 = vadd.f32 %v5601_v61, %v1285_v20  ;;  %v1180_v15 = vadd.f32 %v5604_v13, %v971_v38  ;;  %v5606_v47 = vld [vmem:[#allocation74_spill] sm:$0xff] }
 0x2f4   : > { %1852 = vrot.lane.b32.xlu1 %v5581_v49, %s3029_s10  ;;  %v949_v45 = vadd.f32 %v5594_v19, %v692_v42  ;;  %v5608_v20 = vld [vmem:[#allocation42_spill] sm:$0xff] }
 0x2f5   : > { %v1628_v58 = vpop.permute.xlu0 %1627  ;;  %v1552_v42 = vadd.f32 %v5606_v47, %v1419_v32  ;;  %v5610_v38 = vld [vmem:[#allocation62_spill] sm:$0xff] }
 0x2f6   : > { %v4485_v48 = vadd.f32 %v1628_v58, %v1570_v54  ;;  %v1630_v56 = vpop.permute.xlu1 %1629  ;;  %v5597_v54 = vld [vmem:[#allocation191_spill] sm:$0xff]  ;;  %v1310_v19 = vadd.f32 %v5610_v38, %v1180_v15  ;;  %v5625_v38 = vld [vmem:[#allocation64_spill] sm:$0xff] }
 0x2f7   : > { %v4490_v40 = vadd.f32 %v1630_v56, %v1571_v36  ;;  %1854 = vrot.lane.b32.xlu2 %v5587_v26, %s3029_s10  ;;  %v1441_v49 = vadd.f32 %v5597_v54, %v1307_v51  ;;  %v5599_v36 = vld [vmem:[#allocation165_spill] sm:$0xff]  ;;  %v5602_v56 = vld [vmem:[#allocation48_spill] sm:$0xff] }
 0x2f8   : > { %v1158_v58 = vadd.f32 %v5599_v36, %v949_v45  ;;  %v1573_v55 = vadd.f32 %v5602_v56, %v1440_v37  ;;  %v5609_v51 = vld [vmem:[#allocation36_spill] sm:$0xff]  ;;  %v5612_v37 = vld [vmem:[#allocation21_spill] sm:$0xff]  ;;  %v5618_v56 = vld [vmem:[#allocation19_spill] sm:$0xff] }
 0x2f9   : > { %v1720_v1 = vpop.permute.xlu2 %1719  ;;  %v1309_v18 = vadd.f32 %v5609_v51, %v1179_v44  ;;  %v1444_v54 = vadd.f32 %v5612_v37, %v1310_v19  ;;  %v5616_v44 = vld [vmem:[#allocation24_spill] sm:$0xff]  ;;  %v5623_v51 = vld [vmem:[#allocation63_spill] sm:$0xff]  ;;  %v691_v19 = vadd.f32 %v4171_v24, %v5625_v38 }
 0x2fa   : > { %v4506_v7 = vadd.f32 %v1720_v1, %v4275_v3  ;;  %v5605_v3 = vld [vmem:[#allocation198_spill] sm:$0xff]  ;;  %v1288_v53 = vadd.f32 %v5608_v20, %v1158_v58  ;;  %v1682_v1 = vadd.f32 %v4293_v46, %v1552_v42  ;;  %v5617_v46 = vld [vmem:[#allocation61_spill] sm:$0xff] }
 0x2fb   : > { %1856 = vrot.lane.b32.xlu0 %v5598_v33, %s3029_s10  ;;  %v1574_v26 = vadd.f32 %v5605_v3, %v1441_v49  ;;  %v1443_v34 = vadd.f32 %v5611_v30, %v1309_v18  ;;  %v5613_v49 = vld [vmem:[#allocation20_spill] sm:$0xff]  ;;  %v5614_v33 = vld [vmem:[#allocation166_spill] sm:$0xff]  ;;  %v1577_v61 = vadd.f32 %v5617_v46, %v1444_v54  ;;  %v5627_v54 = vld [vmem:[#allocation117_spill] sm:$0xff] }
 0x2fc   : > { %1858 = vrot.lane.b32.xlu1 %v5603_v11, %s3029_s10  ;;  %v1422_v36 = vadd.f32 %v5614_v33, %v1288_v53  ;;  %v5619_v3 = vld [vmem:[#allocation34_spill] sm:$0xff]  ;;  %v5622_v53 = vld [vmem:[#allocation60_spill] sm:$0xff]  ;;  %v5631_v46 = vld [vmem:[#allocation147_spill] sm:$0xff] }
 0x2fd   : > { %v1634_v35 = vpop.permute.xlu0 %1633  ;;  %v1576_v58 = vadd.f32 %v5615_v29, %v1443_v34  ;;  %v5624_v18 = vld [vmem:[#allocation112_spill] sm:$0xff]  ;;  %v5629_v29 = vld [vmem:[#allocation53_spill] sm:$0xff] }
 0x2fe   : > { %v4520_v12 = vadd.f32 %v1634_v35, %v1573_v55  ;;  %v1636_v14 = vpop.permute.xlu1 %1635  ;;  %v1555_v55 = vadd.f32 %v5618_v56, %v1422_v36  ;;  %v5620_v35 = vld [vmem:[#allocation25_spill] sm:$0xff]  ;;  %v5628_v33 = vld [vmem:[#allocation152_spill] sm:$0xff] }
 0x2ff   : > { %v4522_v25 = vadd.f32 %v1636_v14, %v1574_v26  ;;  %1860 = vrot.lane.b32.xlu2 %v5607_v6, %s3029_s10  ;;  %v688_v47 = vadd.f32 %v4171_v24, %v5620_v35  ;;  %v5621_v6 = vld [vmem:[#allocation85_spill] sm:$0xff]  ;;  %v948_v36 = vadd.f32 %v5628_v33, %v691_v19 }
 0x300   : > { %v1685_v26 = vadd.f32 %v4318_v52, %v1555_v55  ;;  %v5643_v33 = vld [vmem:[#allocation149_spill] sm:$0xff] }
 0x301   : > { %v1726_v45 = vpop.permute.xlu2 %1725  ;;  %v945_v20 = vadd.f32 %v5621_v6, %v688_v47  ;;  %v5635_v47 = vld [vmem:[#allocation106_spill] sm:$0xff] }
 0x302   : > { %v4531_v63 = vadd.f32 %v1726_v45, %v1682_v1  ;;  %v5626_v45 = vld [vmem:[#allocation56_spill] sm:$0xff] }
 0x303   : > { %1862 = vrot.lane.b32.xlu0 %v5613_v49, %s3029_s10  ;;  %v1154_v1 = vadd.f32 %v5624_v18, %v945_v20  ;;  %v690_v30 = vadd.f32 %v4171_v24, %v5626_v45  ;;  %v5637_v20 = vld [vmem:[#allocation99_spill] sm:$0xff]  ;;  %v5639_v18 = vld [vmem:[#allocation104_spill] sm:$0xff] }
 0x304   : > { %1864 = vrot.lane.b32.xlu1 %v5616_v44, %s3029_s10  ;;  %v5630_v44 = vld [vmem:[#allocation92_spill] sm:$0xff] }
 0x305   : > { %v1640_v32 = vpop.permute.xlu0 %1639  ;;  %v1284_v49 = vadd.f32 %v5627_v54, %v1154_v1  ;;  %v5642_v54 = vld [vmem:[#allocation9_spill] sm:$0xff] }
 0x306   : > { %v4542_v11 = vadd.f32 %v1640_v32, %v1576_v58  ;;  %v1642_v13 = vpop.permute.xlu1 %1641  ;;  %v5632_v32 = vld [vmem:[#allocation145_spill] sm:$0xff] }
 0x307   : > { %v4544_v15 = vadd.f32 %v1642_v13, %v1577_v61  ;;  %1866 = vrot.lane.b32.xlu2 %v5619_v3, %s3029_s10  ;;  %v947_v61 = vadd.f32 %v5631_v46, %v690_v30  ;;  %v1418_v56 = vadd.f32 %v5632_v32, %v1284_v49  ;;  %v694_v49 = vadd.f32 %v4171_v24, %v5642_v54  ;;  %v5645_v46 = vld [vmem:[#allocation164_spill] sm:$0xff]  ;;  %v5646_v32 = vld [vmem:[#allocation57_spill] sm:$0xff]  ;;  %v5656_v54 = vld [vmem:[#allocation58_spill] sm:$0xff] }
 0x309   : > { %v1732_v42 = vpop.permute.xlu2 %1731 }
 0x30a   : > { %v4551_v14 = vadd.f32 %v1732_v42, %v1685_v26  ;;  %v5634_v26 = vld [vmem:[#allocation38_spill] sm:$0xff]  ;;  %v5636_v42 = vld [vmem:[#allocation127_spill] sm:$0xff] }
 0x30b   : > { %1868 = vrot.lane.b32.xlu0 %v5622_v53, %s3029_s10  ;;  %v1551_v35 = vadd.f32 %v5634_v26, %v1418_v56  ;;  %v1156_v6 = vadd.f32 %v5636_v42, %v947_v61  ;;  %v693_v53 = vadd.f32 %v4171_v24, %v5637_v20  ;;  %v951_v56 = vadd.f32 %v5646_v32, %v694_v49  ;;  %v5651_v20 = vld [vmem:[#allocation116_spill] sm:$0xff] }
 0x30c   : > { %1870 = vrot.lane.b32.xlu1 %v5623_v51, %s3029_s10  ;;  %v5638_v51 = vld [vmem:[#allocation120_spill] sm:$0xff] }
 0x30d   : > { %v1716_v52 = vpop.permute.xlu0 %1715  ;;  %v1681_v1 = vadd.f32 %v5639_v18, %v1551_v35 }
 0x30e   : > { %v4564_v34 = vadd.f32 %v1716_v52, %v4254_v0  ;;  %v1718_v37 = vpop.permute.xlu1 %1717  ;;  %v5633_v0 = vld [vmem:[#allocation150_spill] sm:$0xff]  ;;  %v5641_v52 = vld [vmem:[#allocation161_spill] sm:$0xff] }
 0x30f   : > { %v4569_v58 = vadd.f32 %v1718_v37, %v5629_v29  ;;  %1872 = vrot.lane.b32.xlu2 %v5630_v44, %s3029_s10  ;;  %v1157_v3 = vadd.f32 %v5633_v0, %v948_v36  ;;  %v950_v45 = vadd.f32 %v5641_v52, %v693_v53  ;;  %v5644_v44 = vld [vmem:[#allocation131_spill] sm:$0xff] }
 0x310   : > { %v5655_v52 = vld [vmem:[#allocation43_spill] sm:$0xff] }
 0x311   : > { %v1738_v55 = vpop.permute.xlu2 %1737  ;;  %v1287_v36 = vadd.f32 %v5643_v33, %v1157_v3  ;;  %v5650_v3 = vld [vmem:[#allocation67_spill] sm:$0xff] }
 0x312   : > { %v4576_v13 = vadd.f32 %v1738_v55, %v4353_v62  ;;  %v5640_v62 = vld [vmem:[#allocation157_spill] sm:$0xff]  ;;  %v5647_v55 = vld [vmem:[#allocation176_spill] sm:$0xff] }
 0x313   : > { %1874 = vrot.lane.b32.xlu0 %v5635_v47, %s3029_s10  ;;  %v1286_v19 = vadd.f32 %v5640_v62, %v1156_v6  ;;  %v1421_v0 = vadd.f32 %v5647_v55, %v1287_v36  ;;  %v5649_v47 = vld [vmem:[#allocation10_spill] sm:$0xff]  ;;  %v1160_v6 = vadd.f32 %v5650_v3, %v951_v56  ;;  %v5660_v56 = vld [vmem:[#allocation32_spill] sm:$0xff] }
 0x314   : > { %1876 = vrot.lane.b32.xlu1 %v5638_v51, %s3029_s10  ;;  %v5652_v51 = vld [vmem:[#allocation14_spill] sm:$0xff] }
 0x315   : > { %v1722_v38 = vpop.permute.xlu0 %1721  ;;  %v1420_v61 = vadd.f32 %v5645_v46, %v1286_v19  ;;  %v1554_v53 = vadd.f32 %v5651_v20, %v1421_v0  ;;  %v1290_v49 = vadd.f32 %v5656_v54, %v1160_v6  ;;  %v5657_v36 = vld [vmem:[#allocation26_spill] sm:$0xff]  ;;  %v5659_v46 = vld [vmem:[#allocation179_spill] sm:$0xff]  ;;  %v5668_v54 = vld [vmem:[#allocation128_spill] sm:$0xff] }
 0x316   : > { %v4591_v30 = vadd.f32 %v1722_v38, %v4277_v41  ;;  %v1724_v37 = vpop.permute.xlu1 %1723  ;;  %v5648_v41 = vld [vmem:[#allocation155_spill] sm:$0xff]  ;;  %v5654_v38 = vld [vmem:[#allocation109_spill] sm:$0xff] }
 0x317   : > { %v4596_v29 = vadd.f32 %v1724_v37, %v1681_v1  ;;  %1878 = vrot.lane.b32.xlu2 %v5644_v44, %s3029_s10  ;;  %v1159_v35 = vadd.f32 %v5648_v41, %v950_v45  ;;  %v1553_v42 = vadd.f32 %v5649_v47, %v1420_v61  ;;  %v5653_v1 = vld [vmem:[#allocation15_spill] sm:$0xff]  ;;  %v1684_v62 = vadd.f32 %v5654_v38, %v1554_v53  ;;  %v5658_v44 = vld [vmem:[#allocation178_spill] sm:$0xff] }
 0x318   : > { %v1424_v61 = vadd.f32 %v5659_v46, %v1290_v49  ;;  %v5665_v38 = vld [vmem:[#allocation87_spill] sm:$0xff] }
 0x319   : > { %v1744_v26 = vpop.permute.xlu2 %1743  ;;  %v1683_v18 = vadd.f32 %v4296_v27, %v1553_v42  ;;  %v1289_v45 = vadd.f32 %v5655_v52, %v1159_v35  ;;  %v5662_v35 = vld [vmem:[#allocation35_spill] sm:$0xff]  ;;  %v5663_v42 = vld [vmem:[#allocation44_spill] sm:$0xff] }
 0x31a   : > { %v4606_v24 = vadd.f32 %v1744_v26, %v4387_v2  ;;  %v5661_v26 = vld [vmem:[#allocation39_spill] sm:$0xff] }
 0x31b   : > { %1880 = vrot.lane.b32.xlu0 %v5652_v51, %s3029_s10  ;;  %v1423_v27 = vadd.f32 %v5658_v44, %v1289_v45  ;;  %v1557_v41 = vadd.f32 %v5661_v26, %v1424_v61  ;;  %v5667_v45 = vld [vmem:[#allocation122_spill] sm:$0xff]  ;;  %v5669_v49 = vld [vmem:[#allocation139_spill] sm:$0xff] }
 0x31c   : > { %1882 = vrot.lane.b32.xlu1 %v5653_v1, %s3029_s10 }
 0x31d   : > { %v1728_v19 = vpop.permute.xlu0 %1727  ;;  %v1556_v55 = vadd.f32 %v5660_v56, %v1423_v27  ;;  %v1687_v3 = vadd.f32 %v4260_v4, %v1557_v41  ;;  %v1844_v27 = vrot.slane %v5548_v28, 2  ;;  %v5671_v56 = vld [vmem:[#allocation185_spill] sm:$0xff]  ;;  %v1846_v28 = vrot.slane %v4413_v16, 2 }
 0x31e   : > { %v4617_v37 = vadd.f32 %v1728_v19, %v1683_v18  ;;  %v1730_v2 = vpop.permute.xlu1 %1729 }
 0x31f   : > { %v4620_v33 = vadd.f32 %v1730_v2, %v1684_v62  ;;  %1884 = vrot.lane.b32.xlu2 %v5657_v36, %s3029_s10  ;;  %v1686_v47 = vadd.f32 %v4322_v57, %v1556_v55  ;;  %v5666_v57 = vld [vmem:[#allocation90_spill] sm:$0xff] }
 0x321   : > { %v1750_v32 = vpop.permute.xlu2 %1749 }
 0x322   : > { %v4628_v0 = vadd.f32 %v1750_v32, %v4423_v39  ;;  %v5664_v39 = vld [vmem:[#allocation59_spill] sm:$0xff] }
 0x323   : > { %1886 = vrot.lane.b32.xlu0 %v5662_v35, %s3029_s10 }
 0x324   : > { %1888 = vrot.lane.b32.xlu1 %v5663_v42, %s3029_s10 }
 0x325   : > { %v1734_v6 = vpop.permute.xlu0 %1733 }
 0x326   : > { %v1820_v20 = vadd.f32 %v1734_v6, %v1686_v47  ;;  %v1736_v53 = vpop.permute.xlu1 %1735  ;;  %v1847_v47 = vsel %vm973_vm1, %v1844_v27, %v1846_v28 }
 0x327   : > { %v4637_v51 = vadd.f32 %v1736_v53, %v1687_v3  ;;  %1890 = vrot.lane.b32.xlu2 %v5664_v39, %s3029_s10 }
 0x329   : > { %v1756_v18 = vpop.permute.xlu2 %1755 }
 0x32a   : > { %v4642_v1 = vadd.f32 %v1756_v18, %v4454_v9 }
 0x32b   : > { %1892 = vrot.lane.b32.xlu0 %v5665_v38, %s3029_s10 }
 0x32c   : > { %1894 = vrot.lane.b32.xlu1 %v5666_v57, %s3029_s10 }
 0x32d   : > { %v1740_v62 = vpop.permute.xlu0 %1739 }
 0x32e   : > { %v4649_v4 = vadd.f32 %v1740_v62, %v4358_v17  ;;  %v1742_v19 = vpop.permute.xlu1 %1741 }
 0x32f   : > { %v4652_v52 = vadd.f32 %v1742_v19, %v4285_v5  ;;  %1896 = vrot.lane.b32.xlu2 %v5667_v45, %s3029_s10  ;;  %v1843_v5 = vrot.slane %v5547_v21, 2 }
 0x331   : > { %v1762_v2 = vpop.permute.xlu2 %1761 }
 0x332   : > { %v4657_v9 = vadd.f32 %v1762_v2, %v4485_v48  ;;  %v5670_v48 = vld [vmem:[#allocation13_spill] sm:$0xff] }
 0x333   : > { %1898 = vrot.lane.b32.xlu0 %v5668_v54, %s3029_s10 }
 0x334   : > { %1900 = vrot.lane.b32.xlu1 %v5669_v49, %s3029_s10 }
 0x335   : > { %v1746_v36 = vpop.permute.xlu0 %1745 }
 0x336   : > { %v4664_v17 = vadd.f32 %v1746_v36, %v4389_v31  ;;  %v1748_v44 = vpop.permute.xlu1 %1747  ;;  %v1845_v31 = vsel %vm973_vm1, %v1843_v5, %v1844_v27  ;;  %vm2584_vm1 = vcmask 326656  }
 0x337   : > { %v4669_v46 = vadd.f32 %v1748_v44, %v4308_v8  ;;  %1902 = vrot.lane.b32.xlu2 %v5670_v48, %s3029_s10 }
 0x339   : > { %v1768_v61 = vpop.permute.xlu2 %1767 }
 0x33a   : > { %v4674_v32 = vadd.f32 %v1768_v61, %v4520_v12  ;;  %v5672_v12 = vld [vmem:[#allocation187_spill] sm:$0xff] }
 0x33b   : > { %1904 = vrot.lane.b32.xlu0 %v5671_v56, %s3029_s10 }
 0x33c   : > { %1908 = vrot.lane.b32.xlu1 %v1845_v31, %s3029_s10 }
 0x33d   : > { %v1752_v21 = vpop.permute.xlu0 %1751 }
 0x33e   : > { %v4682_v8 = vadd.f32 %v1752_v21, %v4427_v60  ;;  %v1754_v55 = vpop.permute.xlu1 %1753 }
 0x33f   : > { %v4685_v26 = vadd.f32 %v1754_v55, %v4338_v43  ;;  %1906 = vrot.lane.b32.xlu2 %v5672_v12, %s3029_s10 }
 0x341   : > { %v1774_v41 = vpop.permute.xlu2 %1773 }
 0x342   : > { %v4690_v35 = vadd.f32 %v1774_v41, %v4542_v11 }
 0x343   : > { %1910 = vrot.lane.b32.xlu0 %v1847_v47, %s3029_s10 }
 0x345   : > { %v1758_v42 = vpop.permute.xlu0 %1757 }
 0x346   : > { %v4695_v16 = vadd.f32 %v1758_v42, %v4457_v23  ;;  %v1760_v60 = vpop.permute.xlu1 %1759 }
 0x347   : > { %v4698_v3 = vadd.f32 %v1760_v60, %v4372_v10 }
 0x349   : > { %v1849_v43 = vpop.permute.xlu2 %1848 }
 0x34a   : > { %v1944_v56 = vadd.f32 %v1849_v43, %v4564_v34 }
 0x34c   : > { %v1979_v21 = vrot.slane %v1944_v56, 4 }
 0x34d   : > { %v1764_v6 = vpop.permute.xlu0 %1763 }
 0x34e   : > { %v4701_v53 = vadd.f32 %v1764_v6, %v4490_v40  ;;  %v1766_v39 = vpop.permute.xlu1 %1765 }
 0x34f   : > { %v4704_v11 = vadd.f32 %v1766_v39, %v4402_v50 }
 0x351   : > { %v1855_v18 = vpop.permute.xlu2 %1854 }
 0x352   : > { %v4707_v38 = vadd.f32 %v1855_v18, %v4591_v30 }
 0x355   : > { %v1770_v57 = vpop.permute.xlu0 %1769 }
 0x356   : > { %v4710_v23 = vadd.f32 %v1770_v57, %v4522_v25  ;;  %v1772_v62 = vpop.permute.xlu1 %1771 }
 0x357   : > { %v4713_v10 = vadd.f32 %v1772_v62, %v4440_v22  ;;  %v3030_v22 = vmov 1983009808  }
 0x358   : > { %v1982_v44 = vunpack.c.l.s4 %v3030_v22 }
 0x359   : > { %v1861_v19 = vpop.permute.xlu2 %1860 }
 0x35a   : > { %v1950_v49 = vadd.f32 %v1861_v19, %v4617_v37 }
 0x35c   : > { %v1989_v27 = vrot.slane %v1950_v49, 4 }
 0x35d   : > { %v1776_v45 = vpop.permute.xlu0 %1775 }
 0x35e   : > { %v4716_v40 = vadd.f32 %v1776_v45, %v4544_v15  ;;  %v1778_v2 = vpop.permute.xlu1 %1777 }
 0x35f   : > { %v4719_v50 = vadd.f32 %v1778_v2, %v4471_v59 }
 0x361   : > { %v1867_v54 = vpop.permute.xlu2 %1866 }
 0x362   : > { %v4721_v30 = vadd.f32 %v1867_v54, %v1820_v20  ;;  %v4728_v20 = vunpack.c.0.s8 %v1982_v44  ;;  %v2215_v44 = vrot.slane %v4707_v38, 4 }
 0x365   : > { %v1851_v25 = vpop.permute.xlu0 %1850 }
 0x366   : > { %v1945_v36 = vadd.f32 %v1851_v25, %v4569_v58  ;;  %v1853_v5 = vpop.permute.xlu1 %1852 }
 0x367   : > { %v1946_v15 = vadd.f32 %v1853_v5, %v4506_v7 }
 0x368   : > { %v2203_v7 = vrot.slane %v1945_v36, 4 }
 0x369   : > { %v1990_v48 = vsel %vm1977_vm3, %v1989_v27, %v1946_v15  ;;  %v1991_v61 = vrot.slane %v1946_v15, 4  ;;  %v1873_v59 = vpop.permute.xlu2 %1872 }
 0x36a   : > { %v1996_v28 = vperm.slane %v1990_v48, %v4728_v20  ;;  %v1956_v57 = vadd.f32 %v1873_v59, %v4649_v4 }
 0x36b   : > { %v1992_v37 = vsel %vm1977_vm3, %v1950_v49, %v1991_v61 }
 0x36c   : > { %v2000_v31 = vperm.slane %v1992_v37, %v4728_v20  ;;  %v2025_v18 = vrot.slane %v1996_v28, 4  ;;  %v2001_v15 = vrot.slane %v1956_v57, 4 }
 0x36d   : > { %v1857_v58 = vpop.permute.xlu0 %1856 }
 0x36e   : > { %v1948_v55 = vadd.f32 %v1857_v58, %v4596_v29  ;;  %v1859_v12 = vpop.permute.xlu1 %1858  ;;  %v2037_v34 = vrot.slane %v2000_v31, 4 }
 0x36f   : > { %v1949_v41 = vadd.f32 %v1859_v12, %v4531_v63 }
 0x370   : > { %v1976_v47 = vrot.slane %v1948_v55, 4  ;;  %v1980_v42 = vsel %vm1977_vm3, %v1948_v55, %v1979_v21 }
 0x371   : > { %v1988_v60 = vperm.slane %v1980_v42, %v4728_v20  ;;  %v2201_v43 = vrot.slane %v1949_v41, 4  ;;  %v2204_v6 = vsel %vm1977_vm3, %v1949_v41, %v2203_v7  ;;  %v1879_v39 = vpop.permute.xlu2 %1878 }
 0x372   : > { %v1978_v62 = vsel %vm1977_vm3, %v1976_v47, %v1944_v56  ;;  %v2212_v54 = vperm.slane %v2204_v6, %v4728_v20  ;;  %v3031_v56 = vmov 1934713408   ;;  %v1959_v7 = vadd.f32 %v1879_v39, %v4664_v17 }
 0x373   : > { %v1984_v29 = vperm.slane %v1978_v62, %v4728_v20  ;;  %v2038_v19 = vsel %vm1977_vm3, %v2037_v34, %v1988_v60  ;;  %v2039_v63 = vrot.slane %v1988_v60, 4  ;;  %v2202_v45 = vsel %vm1977_vm3, %v2201_v43, %v1945_v36 }
 0x374   : > { %v2208_v4 = vperm.slane %v2202_v45, %v4728_v20  ;;  %v2030_v37 = vunpack.c.l.s4 %v3031_v56  ;;  %v2263_v58 = vrot.slane %v2212_v54, 4  ;;  %v2237_v39 = vrot.slane %v1959_v7, 4 }
 0x375   : > { %v2027_v2 = vrot.slane %v1984_v29, 4  ;;  %v1863_v49 = vpop.permute.xlu0 %1862  ;;  %v2026_v25 = vsel %vm1977_vm3, %v2025_v18, %v1984_v29  ;;  %v2040_v22 = vsel %vm1977_vm3, %v2000_v31, %v2039_v63 }
 0x376   : > { %v1951_v5 = vadd.f32 %v1863_v49, %v4620_v33  ;;  %v1865_v27 = vpop.permute.xlu1 %1864  ;;  %v2251_v33 = vrot.slane %v2208_v4, 4  ;;  %v4764_v43 = vunpack.c.0.s8 %v2030_v37 }
 0x377   : > { %v1952_v48 = vadd.f32 %v1865_v27, %v4551_v14  ;;  %v2028_v36 = vsel %vm1977_vm3, %v1996_v28, %v2027_v2 }
 0x378   : > { %v2213_v61 = vrot.slane %v1951_v5, 4  ;;  %v2216_v59 = vsel %vm1977_vm3, %v1951_v5, %v2215_v44  ;;  %v4772_v45 = vperm.slane %v2038_v19, %v4764_v43  ;;  %v4775_v2 = vperm.slane %v2026_v25, %v4764_v43 }
 0x379   : > { %v2224_v31 = vperm.slane %v2216_v59, %v4728_v20  ;;  %v2002_v21 = vsel %vm1977_vm3, %v2001_v15, %v1952_v48  ;;  %v2003_v55 = vrot.slane %v1952_v48, 4  ;;  %v4754_v12 = vpop.permute.xlu2 %1884  ;;  %v2227_v5 = vrot.slane %v4721_v30, 4 }
 0x37a   : > { %v2214_v14 = vsel %vm1977_vm3, %v2213_v61, %v4707_v38  ;;  %v2083_v25 = vrot.slane %v4772_v45, 4  ;;  %v2075_v48 = vrot.slane %v4775_v2, 4 }
 0x37b   : > { %v2220_v28 = vperm.slane %v2214_v14, %v4728_v20  ;;  %v2261_v41 = vrot.slane %v2224_v31, 4  ;;  %v2004_v47 = vsel %vm1977_vm3, %v1956_v57, %v2003_v55  ;;  %v4762_v42 = vsel %vm1977_vm3, %v2224_v31, %v2263_v58 }
 0x37d   : > { %v2249_v34 = vrot.slane %v2220_v28, 4  ;;  %v1869_v60 = vpop.permute.xlu0 %1868  ;;  %v2262_v6 = vsel %vm1977_vm3, %v2261_v41, %v2212_v54  ;;  %v2252_v18 = vsel %vm1977_vm3, %v2220_v28, %v2251_v33  ;;  %v4778_v54 = vperm.slane %v2040_v22, %v4764_v43 }
 0x37e   : > { %v1871_v17 = vpop.permute.xlu1 %1870  ;;  %v1954_v49 = vadd.f32 %v1869_v60, %v4637_v51  ;;  %v2012_v22 = vperm.slane %v2004_v47, %v4728_v20  ;;  %v4811_v47 = vperm.slane %v2262_v6, %v4764_v43 }
 0x37f   : > { %v1955_v38 = vadd.f32 %v1871_v17, %v4576_v13  ;;  %v2250_v62 = vsel %vm1977_vm3, %v2249_v34, %v2208_v4  ;;  %v4783_v13 = vperm.slane %v2028_v36, %v4764_v43  ;;  %v2008_v4 = vperm.slane %v2002_v21, %v4728_v20 }
 0x380   : > { %v2087_v36 = vrot.slane %v4778_v54, 4  ;;  %v2015_v61 = vrot.slane %v1954_v49, 4  ;;  %v2063_v28 = vrot.slane %v2012_v22, 4 }
 0x381   : > { %v2238_v29 = vsel %vm1977_vm3, %v2237_v39, %v1955_v38  ;;  %v2239_v57 = vrot.slane %v1955_v38, 4  ;;  %v1891_v63 = vpop.permute.xlu2 %1890  ;;  %v2079_v37 = vrot.slane %v4783_v13, 4  ;;  %v2051_v58 = vrot.slane %v2008_v4, 4 }
 0x382   : > { %v4796_v59 = vperm.slane %v2238_v29, %v4728_v20  ;;  %v1965_v31 = vadd.f32 %v1891_v63, %v4695_v16 }
 0x383   : > { %v2240_v44 = vsel %vm1977_vm3, %v1959_v7, %v2239_v57  ;;  %v4823_v57 = vperm.slane %v2252_v18, %v4764_v43 }
 0x384   : > { %v4788_v19 = vperm.slane %v2240_v44, %v4728_v20  ;;  %v2273_v16 = vrot.slane %v4796_v59, 4  ;;  %v2313_v6 = vrot.slane %v1965_v31, 4  ;;  %v2256_v44 = vperm.slane %v2250_v62, %v4764_v43 }
 0x385   : > { %v1875_v27 = vpop.permute.xlu0 %1874 }
 0x386   : > { %v1957_v15 = vadd.f32 %v1875_v27, %v4652_v52  ;;  %v1877_v51 = vpop.permute.xlu1 %1876  ;;  %v2285_v52 = vrot.slane %v4788_v19, 4 }
 0x387   : > { %v1958_v56 = vadd.f32 %v1877_v51, %v4606_v24 }
 0x388   : > { %v2225_v21 = vrot.slane %v1957_v15, 4  ;;  %v2228_v55 = vsel %vm1977_vm3, %v1957_v15, %v2227_v5 }
 0x389   : > { %v4804_v33 = vperm.slane %v2228_v55, %v4728_v20  ;;  %v2013_v7 = vrot.slane %v1958_v56, 4  ;;  %v2016_v14 = vsel %vm1977_vm3, %v1958_v56, %v2015_v61  ;;  %v4818_v39 = vpop.permute.xlu2 %1896 }
 0x38a   : > { %v2226_v24 = vsel %vm1977_vm3, %v2225_v21, %v4721_v30  ;;  %v2024_v41 = vperm.slane %v2016_v14, %v4728_v20 }
 0x38b   : > { %v2232_v34 = vperm.slane %v2226_v24, %v4728_v20  ;;  %v2286_v60 = vsel %vm1977_vm3, %v2285_v52, %v4804_v33  ;;  %v2014_v17 = vsel %vm1977_vm3, %v2013_v7, %v1954_v49 }
 0x38c   : > { %v2020_v38 = vperm.slane %v2014_v17, %v4728_v20  ;;  %v2061_v29 = vrot.slane %v2024_v41, 4  ;;  %v2064_v30 = vsel %vm1977_vm3, %v2024_v41, %v2063_v28  ;;  %v2292_v52 = vperm.slane %v2286_v60, %v4764_v43 }
 0x38d   : > { %v1881_v63 = vpop.permute.xlu0 %1880  ;;  %v2274_v5 = vsel %vm1977_vm3, %v2273_v16, %v2232_v34  ;;  %v2072_v27 = vperm.slane %v2064_v30, %v4764_v43  ;;  %v2275_v15 = vrot.slane %v2232_v34, 4  ;;  %v2287_v41 = vrot.slane %v4804_v33, 4 }
 0x38e   : > { %v2049_v49 = vrot.slane %v2020_v38, 4  ;;  %v1883_v51 = vpop.permute.xlu1 %1882  ;;  %v2052_v61 = vsel %vm1977_vm3, %v2020_v38, %v2051_v58  ;;  %v2062_v56 = vsel %vm1977_vm3, %v2061_v29, %v2012_v22  ;;  %v2280_v7 = vperm.slane %v2274_v5, %v4764_v43 }
 0x38f   : > { %v1961_v21 = vadd.f32 %v1883_v51, %v4628_v0  ;;  %v2060_v18 = vperm.slane %v2052_v61, %v4764_v43  ;;  %v2068_v55 = vperm.slane %v2062_v56, %v4764_v43  ;;  %v4837_v14 = vsel %vm1977_vm3, %v2072_v27, %v2087_v36 }
 0x390   : > { %v2050_v62 = vsel %vm1977_vm3, %v2049_v49, %v2008_v4  ;;  %v2085_v28 = vrot.slane %v2072_v27, 4  ;;  %v1960_v16 = vadd.f32 %v1881_v63, %v4669_v46  ;;  %v2297_v33 = vrot.slane %v2280_v7, 4 }
 0x391   : > { %v2314_v58 = vsel %vm1977_vm3, %v2313_v6, %v1961_v21  ;;  %v2315_v24 = vrot.slane %v1961_v21, 4  ;;  %v2077_v22 = vrot.slane %v2060_v18, 4  ;;  %v2056_v0 = vperm.slane %v2050_v62, %v4764_v43 }
 0x392   : > { %v4844_v34 = vsel %vm1977_vm3, %v2068_v55, %v2083_v25  ;;  %v2081_v4 = vrot.slane %v2068_v55, 4  ;;  %v4851_v38 = vsel %vm1977_vm3, %v2060_v18, %v2079_v37  ;;  %v2303_v25 = vrot.slane %v4823_v57, 4 }
 0x393   : > { %v2316_v60 = vsel %vm1977_vm3, %v1965_v31, %v2315_v24  ;;  %v2078_v36 = vsel %vm1977_vm3, %v2077_v22, %v4783_v13  ;;  %v2076_v17 = vsel %vm1977_vm3, %v2056_v0, %v2075_v48  ;;  %v2272_v13 = vperm.slane %v4762_v42, %v4764_v43  ;;  %v4863_v31 = vpop.permute.xlu2 %1902 }
 0x394   : > { %2435 = vrot.lane.b32.xlu0 %v2078_v36, %s3032_s11  ;;  %2427 = vrot.lane.b32.xlu1 %v2076_v17, %s3033_s15  ;;  %v4857_v46 = vsel %vm1977_vm3, %v2081_v4, %v4772_v45  ;;  %v2307_v48 = vrot.slane %v4811_v47, 4  ;;  %v4867_v29 = vsel %vm1977_vm3, %v2085_v28, %v4778_v54  ;;  %v2305_v30 = vrot.slane %v2292_v52, 4 }
 0x395   : > { %v1887_v37 = vpop.permute.xlu0 %1886  ;;  %v2276_v45 = vsel %vm1977_vm3, %v4796_v59, %v2275_v15  ;;  %v2091_v6 = vrot.slane %v1960_v16, 4  ;;  %v2288_v42 = vsel %vm1977_vm3, %v4788_v19, %v2287_v41  ;;  %v2299_v27 = vrot.slane %v2256_v44, 4 }
 0x396   : > { %v1889_v63 = vpop.permute.xlu1 %1888  ;;  %v2284_v5 = vperm.slane %v2276_v45, %v4764_v43  ;;  %v4876_v51 = vsel %vm1977_vm3, %v2297_v33, %v2256_v44  ;;  %v4880_v54 = vsel %vm1977_vm3, %v2305_v30, %v4811_v47  ;;  %v2296_v61 = vperm.slane %v2288_v42, %v4764_v43 }
 0x397   : > { %v1964_v49 = vadd.f32 %v1889_v63, %v4642_v1  ;;  %v4887_v56 = vsel %vm1977_vm3, %v2292_v52, %v2307_v48  ;;  %v2311_v19 = vrot.slane %v2272_v13, 4  ;;  %v4891_v44 = vsel %vm1977_vm3, %v2280_v7, %v2299_v27 }
 0x398   : > { %v4884_v59 = vsel %vm1977_vm3, %v2284_v5, %v2303_v25  ;;  %v2301_v15 = vrot.slane %v2284_v5, 4  ;;  %v2309_v18 = vrot.slane %v2296_v61, 4  ;;  %v1962_v47 = vadd.f32 %v4754_v12, %v4682_v8 }
 0x399   : > { %v2089_v21 = vrot.slane %v1964_v49, 4  ;;  %v2092_v1 = vsel %vm1977_vm3, %v1964_v49, %v2091_v6  ;;  %v4900_v62 = vsel %vm1977_vm3, %v2296_v61, %v2311_v19  ;;  %v1963_v52 = vadd.f32 %v1887_v37, %v4685_v26 }
 0x39a   : > { %v4897_v55 = vsel %vm1977_vm3, %v2301_v15, %v4823_v57  ;;  %v4905_v24 = vsel %vm1977_vm3, %v2309_v18, %v2272_v13  ;;  %v2073_v22 = vrot.slane %v2056_v0, 4  ;;  %v2324_v7 = vperm.slane %v2316_v60, %v4728_v20 }
 0x39b   : > { %v2090_v28 = vsel %vm1977_vm3, %v2089_v21, %v1960_v16  ;;  %v2100_v41 = vperm.slane %v2092_v1, %v4728_v20  ;;  %v2103_v57 = vrot.slane %v1962_v47, 4  ;;  %v2327_v16 = vrot.slane %v1963_v52, 4  ;;  %v1907_v17 = vpop.permute.xlu2 %1906 }
 0x39c   : > { %v4911_v12 = vsel %vm1977_vm3, %v2073_v22, %v4775_v2  ;;  %v2096_v4 = vperm.slane %v2090_v28, %v4728_v20  ;;  %v2320_v0 = vperm.slane %v2314_v58, %v4728_v20  ;;  %v2375_v60 = vrot.slane %v2324_v7, 4 }
 0x39d   : > { %v1893_v8 = vpop.permute.xlu0 %1892  ;;  %v2151_v37 = vrot.slane %v2100_v41, 4 }
 0x39e   : > { %v1966_v26 = vadd.f32 %v1893_v8, %v4698_v3  ;;  %v1895_v36 = vpop.permute.xlu1 %1894  ;;  %v2139_v45 = vrot.slane %v2096_v4, 4  ;;  %v1973_v3 = vadd.f32 %v1907_v17, %v4690_v35  ;;  %v2363_v61 = vrot.slane %v2320_v0, 4 }
 0x39f   : > { %v1967_v25 = vadd.f32 %v1895_v36, %v4657_v9  ;;  %v1968_v36 = vadd.f32 %v4818_v39, %v4701_v53 }
 0x3a0   : > { %v2101_v13 = vrot.slane %v1966_v26, 4  ;;  %v2104_v48 = vsel %vm1977_vm3, %v1966_v26, %v2103_v57  ;;  %v2337_v1 = vrot.slane %v1973_v3, 4 }
 0x3a1   : > { %v2112_v2 = vperm.slane %v2104_v48, %v4728_v20  ;;  %v2325_v33 = vrot.slane %v1967_v25, 4  ;;  %v2328_v30 = vsel %vm1977_vm3, %v1967_v25, %v2327_v16  ;;  %v2115_v39 = vrot.slane %v1968_v36, 4 }
 0x3a2   : > { %v2102_v6 = vsel %vm1977_vm3, %v2101_v13, %v1962_v47  ;;  %v2336_v63 = vperm.slane %v2328_v30, %v4728_v20 }
 0x3a3   : > { %v2108_v9 = vperm.slane %v2102_v6, %v4728_v20  ;;  %v2149_v58 = vrot.slane %v2112_v2, 4  ;;  %v2326_v5 = vsel %vm1977_vm3, %v2325_v33, %v1963_v52  ;;  %v2152_v42 = vsel %vm1977_vm3, %v2112_v2, %v2151_v37 }
 0x3a4   : > { %v2332_v27 = vperm.slane %v2326_v5, %v4728_v20  ;;  %v2376_v49 = vsel %vm1977_vm3, %v2336_v63, %v2375_v60  ;;  %v2373_v47 = vrot.slane %v2336_v63, 4  ;;  %v4948_v60 = vperm.slane %v2152_v42, %v4764_v43 }
 0x3a5   : > { %v2137_v15 = vrot.slane %v2108_v9, 4  ;;  %v1899_v19 = vpop.permute.xlu0 %1898  ;;  %v2140_v35 = vsel %vm1977_vm3, %v2108_v9, %v2139_v45  ;;  %v2150_v21 = vsel %vm1977_vm3, %v2149_v58, %v2100_v41  ;;  %v4938_v41 = vadd.f32 %v4863_v31, %v4710_v23  ;;  %v2892_v31 = vld [vmem:[%s3101_s29 + $0xd8] sm:$0xff] }
 0x3a6   : > { %v2361_v18 = vrot.slane %v2332_v27, 4  ;;  %v1969_v28 = vadd.f32 %v1899_v19, %v4704_v11  ;;  %v1901_v22 = vpop.permute.xlu1 %1900  ;;  %v2364_v8 = vsel %vm1977_vm3, %v2332_v27, %v2363_v61  ;;  %v2374_v17 = vsel %vm1977_vm3, %v2373_v47, %v2324_v7  ;;  %2860 = vmatmul.msk.bf16.gmra.mxu3 %vm442_vm0, %v2892_v31 }
 0x3a7   : > { %v2138_v52 = vsel %vm1977_vm3, %v2137_v15, %v2096_v4  ;;  %v1970_v4 = vadd.f32 %v1901_v22, %v4674_v32  ;;  %v4945_v25 = vperm.slane %v2140_v35, %v4764_v43  ;;  %v4951_v53 = vperm.slane %v2150_v21, %v4764_v43 }
 0x3a8   : > { %v2338_v57 = vsel %vm1977_vm3, %v2337_v1, %v1969_v28  ;;  %v2339_v26 = vrot.slane %v1969_v28, 4  ;;  %v2362_v11 = vsel %vm1977_vm3, %v2361_v18, %v2320_v0  ;;  %v2351_v13 = vrot.slane %v4938_v41, 4 }
 0x3a9   : > { %v4957_v7 = vperm.slane %v2138_v52, %v4764_v43  ;;  %v4960_v32 = vperm.slane %v2376_v49, %v4764_v43  ;;  %v2127_v37 = vrot.slane %v1970_v4, 4  ;;  %v2191_v33 = vrot.slane %v4945_v25, 4 }
 0x3aa   : > { %v2340_v16 = vsel %vm1977_vm3, %v1973_v3, %v2339_v26  ;;  %v2199_v30 = vrot.slane %v4948_v60, 4  ;;  %v4967_v45 = vperm.slane %v2338_v57, %v4728_v20  ;;  %v2195_v6 = vrot.slane %v4951_v53, 4 }
 0x3ab   : > { %v2348_v5 = vperm.slane %v2340_v16, %v4728_v20  ;;  %v2187_v49 = vrot.slane %v4957_v7, 4  ;;  %v4983_v35 = vperm.slane %v2374_v17, %v4764_v43  ;;  %v4988_v47 = vperm.slane %v2362_v11, %v4764_v43 }
 0x3ac   : > { %v2387_v21 = vrot.slane %v4967_v45, 4  ;;  %v2423_v57 = vrot.slane %v4960_v32, 4 }
 0x3ad   : > { %v1905_v23 = vpop.permute.xlu0 %1904 }
 0x3ae   : > { %v1972_v0 = vadd.f32 %v1905_v23, %v4713_v10  ;;  %v1909_v48 = vpop.permute.xlu1 %1908  ;;  %v2419_v23 = vrot.slane %v4983_v35, 4 }
 0x3af   : > { %v1974_v2 = vadd.f32 %v1909_v48, %v4716_v40  ;;  %v4974_v40 = vperm.slane %v2364_v8, %v4764_v43 }
 0x3b0   : > { %v2113_v10 = vrot.slane %v1972_v0, 4  ;;  %v2116_v3 = vsel %vm1977_vm3, %v1972_v0, %v2115_v39 }
 0x3b1   : > { %v2124_v63 = vperm.slane %v2116_v3, %v4728_v20  ;;  %v2125_v9 = vrot.slane %v1974_v2, 4  ;;  %v2128_v58 = vsel %vm1977_vm3, %v1974_v2, %v2127_v37  ;;  %v2415_v8 = vrot.slane %v4974_v40, 4 }
 0x3b2   : > { %v2114_v42 = vsel %vm1977_vm3, %v2113_v10, %v1968_v36  ;;  %v2136_v27 = vperm.slane %v2128_v58, %v4728_v20 }
 0x3b3   : > { %v2120_v61 = vperm.slane %v2114_v42, %v4728_v20  ;;  %v2175_v15 = vrot.slane %v2124_v63, 4  ;;  %v2126_v19 = vsel %vm1977_vm3, %v2125_v9, %v1970_v4  ;;  %v2399_v4 = vrot.slane %v2348_v5, 4 }
 0x3b4   : > { %v2132_v1 = vperm.slane %v2126_v19, %v4728_v20  ;;  %v2173_v18 = vrot.slane %v2136_v27, 4 }
 0x3b5   : > { %v2163_v28 = vrot.slane %v2120_v61, 4  ;;  %v2176_v22 = vsel %vm1977_vm3, %v2136_v27, %v2175_v15  ;;  %v1911_v52 = vpop.permute.xlu0 %1910 }
 0x3b6   : > { %v2161_v26 = vrot.slane %v2132_v1, 4  ;;  %v1975_v36 = vadd.f32 %v1911_v52, %v4719_v50  ;;  %v2184_v16 = vperm.slane %v2176_v22, %v4764_v43  ;;  %v2174_v17 = vsel %vm1977_vm3, %v2173_v18, %v2124_v63 }
 0x3b7   : > { %v2164_v39 = vsel %vm1977_vm3, %v2132_v1, %v2163_v28  ;;  %v2180_v11 = vperm.slane %v2174_v17, %v4764_v43  ;;  %v282_v1 = vld [vmem:[%s3101_s29 + $0xe0] sm:$0xf]  ;;  %s3046_s29 = smov 52  }
 0x3b8   : > { %v2349_v31 = vrot.slane %v1975_v36, 4  ;;  %v2352_v0 = vsel %vm1977_vm3, %v1975_v36, %v2351_v13  ;;  %v2172_v48 = vperm.slane %v2164_v39, %v4764_v43  ;;  %v2162_v37 = vsel %vm1977_vm3, %v2161_v26, %v2120_v61 }
 0x3b9   : > { %v2360_v50 = vperm.slane %v2352_v0, %v4728_v20  ;;  %v2168_v2 = vperm.slane %v2162_v37, %v4764_v43  ;;  %v2197_v10 = vrot.slane %v2184_v16, 4  ;;  %v2196_v3 = vsel %vm1977_vm3, %v2180_v11, %v2195_v6 }
 0x3ba   : > { %v2350_v63 = vsel %vm1977_vm3, %v2349_v31, %v4938_v41  ;;  %v2192_v9 = vsel %vm1977_vm3, %v2172_v48, %v2191_v33  ;;  %v2189_v58 = vrot.slane %v2172_v48, 4  ;;  %v2193_v42 = vrot.slane %v2180_v11, 4 }
 0x3bb   : > { %v2356_v13 = vperm.slane %v2350_v63, %v4728_v20  ;;  %v2397_v27 = vrot.slane %v2360_v50, 4  ;;  %2445 = vrot.lane.b32.xlu0 %v2192_v9, %s3034_s17  ;;  %v2188_v61 = vsel %vm1977_vm3, %v2168_v2, %v2187_v49  ;;  %v2198_v15 = vsel %vm1977_vm3, %v2197_v10, %v4948_v60 }
 0x3bc   : > { %v2190_v6 = vsel %vm1977_vm3, %v2189_v58, %v4945_v25  ;;  %2429 = vrot.lane.b32.xlu2 %v2188_v61, %s3033_s15  ;;  %v2194_v41 = vsel %vm1977_vm3, %v2193_v42, %v4951_v53  ;;  %v2200_v33 = vsel %vm1977_vm3, %v2184_v16, %v2199_v30  ;;  %v2400_v20 = vsel %vm1977_vm3, %v2360_v50, %v2399_v4 }
 0x3bd   : > { %v2385_v19 = vrot.slane %v2356_v13, 4  ;;  %2437 = vrot.lane.b32.xlu1 %v2190_v6, %s3032_s11  ;;  %v2388_v49 = vsel %vm1977_vm3, %v2356_v13, %v2387_v21  ;;  %v2398_v60 = vsel %vm1977_vm3, %v2397_v27, %v2348_v5  ;;  %v2408_v18 = vperm.slane %v2400_v20, %v4764_v43 }
 0x3be   : > { %v2396_v25 = vperm.slane %v2388_v49, %v4764_v43  ;;  %v400_v28 = vunpack.c.l.b16 %v282_v1  ;;  %v2404_v22 = vperm.slane %v2398_v60, %v4764_v43  ;;  %v2185_v53 = vrot.slane %v2168_v2, 4 }
 0x3bf   : > { %v2386_v30 = vsel %vm1977_vm3, %v2385_v19, %v4967_v45  ;;  %v2424_v52 = vsel %vm1977_vm3, %v2408_v18, %v2423_v57  ;;  %v2411_v26 = vrot.slane %v4988_v47, 4  ;;  %v2421_v36 = vrot.slane %v2408_v18, 4 }
 0x3c0   : > { %v2413_v21 = vrot.slane %v2396_v25, 4  ;;  %v2392_v16 = vperm.slane %v2386_v30, %v4764_v43  ;;  %v429_v5 = vpack.c.b16 %v400_v28, %v400_v28  ;;  %v2420_v17 = vsel %vm1977_vm3, %v2404_v22, %v2419_v23 }
 0x3c1   : > { %v2417_v4 = vrot.slane %v2404_v22, 4  ;;  %v2416_v39 = vsel %vm1977_vm3, %v2396_v25, %v2415_v8  ;;  %v2422_v11 = vsel %vm1977_vm3, %v2421_v36, %v4960_v32  ;;  %v5038_v45 = vsel %vm1977_vm3, %v2185_v53, %v4957_v7 }
 0x3c2   : > { %v2414_v57 = vsel %vm1977_vm3, %v2413_v21, %v4974_v40  ;;  %v2409_v31 = vrot.slane %v2392_v16, 4  ;;  %2861 = vmatmul.msk.bf16.gmra.mxu3 %vm442_vm0, %v429_v5  ;;  %v2412_v43 = vsel %vm1977_vm3, %v2392_v16, %v2411_v26  ;;  %vm2581_vm0 = vcmask 228352  }
 0x3c3   : > { %2459 = vrot.lane.b32.xlu0 %v4844_v34, %s3035_s18  ;;  %v2418_v8 = vsel %vm1977_vm3, %v2417_v4, %v4983_v35 }
 0x3c4   : > { %2443 = vrot.lane.b32.xlu2 %v4851_v38, %s3034_s17  ;;  %v2410_v7 = vsel %vm1977_vm3, %v2409_v31, %v4988_v47  ;;  %vm2591_vm3 = vcmask 523264  }
 0x3c5   : > { %2451 = vrot.lane.b32.xlu1 %v4857_v46, %s3036_s19 }
 0x3cb   : > { %2469 = vrot.lane.b32.xlu0 %v2198_v15, %s3037_s20 }
 0x3cc   : > { %2453 = vrot.lane.b32.xlu2 %v2194_v41, %s3036_s19 }
 0x3cd   : > { %2461 = vrot.lane.b32.xlu1 %v2196_v3, %s3035_s18 }
 0x3d3   : > { %2483 = vrot.lane.b32.xlu0 %v4876_v51, %s3038_s21 }
 0x3d4   : > { %2467 = vrot.lane.b32.xlu2 %v4867_v29, %s3037_s20 }
 0x3d5   : > { %2475 = vrot.lane.b32.xlu1 %v4837_v14, %s3039_s22 }
 0x3db   : > { %2501 = vrot.lane.b32.xlu0 %v2414_v57, %s3040_s23 }
 0x3dc   : > { %2477 = vrot.lane.b32.xlu2 %v2200_v33, %s3039_s22 }
 0x3dd   : > { %2485 = vrot.lane.b32.xlu1 %v2410_v7, %s3038_s21 }
 0x3e3   : > { %2515 = vrot.lane.b32.xlu0 %v4880_v54, %s3041_s24 }
 0x3e4   : > { %2499 = vrot.lane.b32.xlu2 %v4897_v55, %s3040_s23 }
 0x3e5   : > { %2507 = vrot.lane.b32.xlu1 %v4884_v59, %s3042_s25 }
 0x3eb   : > { %2525 = vrot.lane.b32.xlu0 %v2420_v17, %s3043_s26 }
 0x3ec   : > { %2509 = vrot.lane.b32.xlu2 %v2416_v39, %s3042_s25 }
 0x3ed   : > { %2517 = vrot.lane.b32.xlu1 %v2418_v8, %s3041_s24 }
 0x3f3   : > { %2531 = vrot.lane.b32.xlu0 %v4905_v24, %s3044_s27 }
 0x3f4   : > { %2523 = vrot.lane.b32.xlu2 %v4887_v56, %s3043_s26 }
 0x3f5   : > { %2491 = vrot.lane.b32.xlu1 %v4891_v44, %s3045_s28 }
 0x3fb   : > { %2541 = vrot.lane.b32.xlu0 %v2424_v52, %s3046_s29 }
 0x3fc   : > { %2493 = vrot.lane.b32.xlu2 %v2412_v43, %s3045_s28 }
 0x3fd   : > { %2533 = vrot.lane.b32.xlu1 %v2422_v11, %s3044_s27 }
 0x404   : > { %2539 = vrot.lane.b32.xlu2 %v4900_v62, %s3046_s29 }
 0x406   : > { %v2428_v34 = vpop.permute.xlu1 %2427  ;;  %v2436_v38 = vpop.permute.xlu0 %2435 }
 0x407   : > { %v2546_v46 = vsel %vm2545_vm4, %v4911_v12, %v2428_v34 }
 0x408   : > { %v2549_v29 = vsel %vm2548_vm5, %v2546_v46, %v2436_v38 }
 0x416   : > { %v2430_v14 = vpop.permute.xlu2 %2429 }
 0x417   : > { %v2547_v50 = vsel %vm2545_vm4, %v5038_v45, %v2430_v14 }
 0x41e   : > { %v2444_v51 = vpop.permute.xlu2 %2443 }
 0x41f   : > { %v2552_v54 = vsel %vm2551_vm6, %v2549_v29, %v2444_v51 }
 0x426   : > { %v2454_v59 = vpop.permute.xlu2 %2453 }
 0x429   : > { %v674_v24 = vpop.f32.mrf.mxu3 }
 0x42d   : > { %v2446_v56 = vpop.permute.xlu0 %2445 }
 0x42e   : > { %v2468_v44 = vpop.permute.xlu2 %2467 }
 0x42f   : > { %v2438_v55 = vpop.permute.xlu1 %2437 }
 0x430   : > { %v2550_v10 = vsel %vm2548_vm5, %v2547_v50, %v2438_v55 }
 0x431   : > { %v675_v35 = vpop.f32.mrf.mxu3  ;;  %v2553_v3 = vsel %vm2551_vm6, %v2550_v10, %v2446_v56 }
 0x432   : > { %v2556_v58 = vsel %vm2554_vm7, %v2553_v3, %v2454_v59 }
 0x435   : > { %v2460_v62 = vpop.permute.xlu0 %2459 }
 0x436   : > { %v2478_v32 = vpop.permute.xlu2 %2477 }
 0x437   : > { %v2452_v40 = vpop.permute.xlu1 %2451 }
 0x438   : > { %v2555_v1 = vsel %vm2554_vm7, %v2552_v54, %v2452_v40 }
 0x439   : > { %v2558_v28 = vsel %vm2557_vm8, %v2555_v1, %v2460_v62 }
 0x43a   : > { %v2561_v53 = vsel %vm2560_vm9, %v2558_v28, %v2468_v44 }
 0x43d   : > { %v2470_v47 = vpop.permute.xlu0 %2469 }
 0x43e   : > { %v2500_v23 = vpop.permute.xlu2 %2499 }
 0x43f   : > { %v2462_v0 = vpop.permute.xlu1 %2461 }
 0x440   : > { %v2559_v13 = vsel %vm2557_vm8, %v2556_v58, %v2462_v0 }
 0x441   : > { %v2562_v61 = vsel %vm2560_vm9, %v2559_v13, %v2470_v47 }
 0x442   : > { %v2565_v15 = vsel %vm2563_vm10, %v2562_v61, %v2478_v32 }
 0x445   : > { %v2484_v12 = vpop.permute.xlu0 %2483  ;;  %v677_v48 = vpop.f32.mrf.mxu3 }
 0x446   : > { %v2510_v37 = vpop.permute.xlu2 %2509 }
 0x447   : > { %v2476_v2 = vpop.permute.xlu1 %2475 }
 0x448   : > { %v2564_v30 = vsel %vm2563_vm10, %v2561_v53, %v2476_v2 }
 0x449   : > { %v2567_v17 = vsel %vm2566_vm12, %v2564_v30, %v2484_v12 }
 0x44d   : > { %v2502_v63 = vpop.permute.xlu0 %2501  ;;  %v678_v9 = vpop.f32.mrf.mxu3 }
 0x44e   : > { %v2524_v42 = vpop.permute.xlu2 %2523  ;;  %v2577_v11 = vsel %vm2575_vm14, %v2502_v63, %v2510_v37 }
 0x44f   : > { %v2486_v27 = vpop.permute.xlu1 %2485 }
 0x450   : > { %v2568_v41 = vsel %vm2566_vm12, %v2565_v15, %v2486_v27 }
 0x455   : > { %v2516_v6 = vpop.permute.xlu0 %2515 }
 0x456   : > { %v2494_v33 = vpop.permute.xlu2 %2493 }
 0x457   : > { %v2508_v20 = vpop.permute.xlu1 %2507  ;;  %v2571_v19 = vsel %vm2569_vm11, %v2568_v41, %v2494_v33 }
 0x458   : > { %v2574_v49 = vsel %vm2572_vm13, %v2571_v19, %v2502_v63  ;;  %v2576_v18 = vsel %vm2575_vm14, %v2500_v23, %v2508_v20 }
 0x459   : > { %2593 = vst [vmem:[%s5079_s6 + $0x10] sm:$0xff] %v2574_v49  ;;  %v2579_v22 = vsel %vm2578_vm15, %v2576_v18, %v2516_v6 }
 0x45a   : > { %v2582_v52 = vsel %vm2581_vm0, %v2579_v22, %v2524_v42 }
 0x45d   : > { %v2526_v60 = vpop.permute.xlu0 %2525 }
 0x45e   : > { %v2540_v36 = vpop.permute.xlu2 %2539 }
 0x45f   : > { %v2518_v25 = vpop.permute.xlu1 %2517 }
 0x460   : > { %v2580_v45 = vsel %vm2578_vm15, %v2577_v11, %v2518_v25 }
 0x461   : > { %v2583_v31 = vsel %vm2581_vm0, %v2580_v45, %v2526_v60 }
 0x465   : > { %v2532_v26 = vpop.permute.xlu0 %2531 }
 0x466   : > { %v2585_v21 = vsel %vm2584_vm1, %v2582_v52, %v2532_v26 }
 0x467   : > { %v2588_v16 = vsel %vm2587_vm2, %v2585_v21, %v2540_v36  ;;  %v2492_v5 = vpop.permute.xlu1 %2491 }
 0x468   : > { %2592 = vst.msk [vmem:[%s5079_s6 + $0x8] sm:$0xff] %vm2591_vm3, %v2588_v16  ;;  %v2570_v4 = vsel %vm2569_vm11, %v2567_v17, %v2492_v5 }
 0x469   : > { %v2573_v39 = vsel %vm2572_vm13, %v2570_v4, %v2500_v23 }
 0x46a   : > { %2590 = vst [vmem:[%s5079_s6] sm:$0xff] %v2573_v39 }
 0x46d   : > { %v2542_v43 = vpop.permute.xlu0 %2541 }
 0x46f   : > { %v2534_v57 = vpop.permute.xlu1 %2533 }
 0x470   : > { %v2586_v8 = vsel %vm2584_vm1, %v2583_v31, %v2534_v57 }
 0x471   : > { %v2589_v7 = vsel %vm2587_vm2, %v2586_v8, %v2542_v43 }
 0x472   : > { %2594 = vst.msk [vmem:[%s5079_s6 + $0x18] sm:$0xff] %vm2591_vm3, %v2589_v7 }
 0x473 PF: > { %s14_s14 = sadd.s32 1, %s3019_s14   ;;  %s5673_s12 = smov %s3015_s13 }
 0x474   : > { %p11_p8 = scmp.ge.s32.totalorder %s14_s14, 4   ;;  %s5674_s13 = smov %s5676_s16 }
 0x476   :  { %13 = sbr.rel (!%p11_p8) target bundleno = 2 (0x2), region = 67 }
 0x47b   :  { %2627 = vsyncpa [#allocation3], 1 }
 0x47c   :  { %2629 = vsyncpa [#allocation3 + $0x1], 1 }

</bundles_post_ra>
